<compile_context>
chip_gen: v6e
topology: v6e:2x2x1
jax: 0.10.0
libtpu: 0.0.40
codegen_flags: <defaults>
</compile_context>

<pallas_src>
import jax
import jax.numpy as jnp
from jax.experimental import pallas as pl
from jax.experimental.pallas import tpu as pltpu

# ------------------------- model dimensions (synthetic) ----------------------
B = 4                       # batch size (user-visible)
BP = ((B + 7) // 8) * 8     # batch padded to sublane multiple (8)
X = 8                       # number of visual regions
F = 2048                    # visual feature dim (hard-coded by the module)
A = 512                     # attention hidden dim (hard-coded by the module)
H = 128                     # token_dim (LSTM hidden size)
V = 256                     # vocab size
T = 6                       # caption length


# --------------------------------- kernel ------------------------------------
def _lstm_gates(gates, c_prev):
    """PyTorch LSTMCell gate order: i, f, g, o.  All math in f32."""
    i = jax.nn.sigmoid(gates[:, 0 * H:1 * H])
    f = jax.nn.sigmoid(gates[:, 1 * H:2 * H])
    g = jnp.tanh(gates[:, 2 * H:3 * H])
    o = jax.nn.sigmoid(gates[:, 3 * H:4 * H])
    c_new = f * c_prev + i * g
    h_new = o * jnp.tanh(c_new)
    return h_new, c_new


def dual_lstm_kernel(
    emb_ref,        # [T, BP, H]  f32   embeddings (all steps)
    pre_a_ref,      # [BP, 4H]    f32   v_bar@W_ih_a[F-slab] + b_lstm_a
    pre_l_ref,      # [BP, 4H]    f32   v_hat@W_ih_l[F-slab] + b_lstm_l
    wca_ref,        # [3H, 4H]    bf16  stacked [W_ih_a[h_lang]; W_ih_a[emb]; W_hh_a]
    wcl_ref,        # [2H, 4H]    bf16  stacked [W_ih_l[h_attn]; W_hh_l]
    wfc_ref,        # [H, V]      bf16
    bfc_ref,        # [1, V]      f32
    out_ref,        # [T, BP, V]  f32   log-probs
):
    bf16 = jnp.bfloat16
    pre_a = pre_a_ref[...]
    pre_l = pre_l_ref[...]

    # Static weight-slab views (loaded once; no per-step lane concatenation).
    w_a_hl = wca_ref[0 * H:1 * H, :]     # h_lang slab
    w_a_em = wca_ref[1 * H:2 * H, :]     # embedding slab
    w_a_hh = wca_ref[2 * H:3 * H, :]     # recurrent (h_attn) slab
    w_l_ha = wcl_ref[0 * H:1 * H, :]     # h_attn slab
    w_l_hh = wcl_ref[1 * H:2 * H, :]     # recurrent (h_lang) slab

    h_attn = jnp.zeros((BP, H), jnp.float32)
    c_attn = jnp.zeros((BP, H), jnp.float32)
    h_lang = jnp.zeros((BP, H), jnp.float32)
    c_lang = jnp.zeros((BP, H), jnp.float32)

    hl_steps = []
    for t in range(T):                               # T=6, fully unrolled at trace time
        emb_t = emb_ref[t].astype(bf16)              # [BP, H]

        # ---- lstm_attn: per-slab dots, bf16 operands, f32 accumulate ----------
        gates_a = (
            pre_a
            + jnp.dot(h_lang.astype(bf16), w_a_hl, preferred_element_type=jnp.float32)
            + jnp.dot(emb_t,               w_a_em, preferred_element_type=jnp.float32)
            + jnp.dot(h_attn.astype(bf16), w_a_hh, preferred_element_type=jnp.float32)
        )
        h_attn, c_attn = _lstm_gates(gates_a, c_attn)

        # ---- lstm_lang (attention contribution is time-invariant -> in pre_l) --
        gates_l = (
            pre_l
            + jnp.dot(h_attn.astype(bf16), w_l_ha, preferred_element_type=jnp.float32)
            + jnp.dot(h_lang.astype(bf16), w_l_hh, preferred_element_type=jnp.float32)
        )
        h_lang, c_lang = _lstm_gates(gates_l, c_lang)
        hl_steps.append(h_lang)

    # ---- fc + log_softmax, batched over all T steps (out of the recurrence) ---
    h_all = jnp.concatenate(hl_steps, axis=0).astype(bf16)        # [T*BP, H]
    logits = (jnp.dot(h_all, wfc_ref[...], preferred_element_type=jnp.float32)
              + bfc_ref[...])                                     # [T*BP, V]
    mx = jnp.max(logits, axis=-1, keepdims=True)
    sh = logits - mx
    lse = jnp.log(jnp.sum(jnp.exp(sh), axis=-1, keepdims=True))
    lp = sh - lse                                                 # [T*BP, V]

    for t in range(T):
        out_ref[t] = lp[t * BP:(t + 1) * BP, :]


# --------------------------------- wrapper -----------------------------------
@jax.jit
def dual_lstm_forward(features, caption, params):
    # -------- one-time, loop-invariant precompute (plain JAX, runs once) ------
    emb = jnp.take(params["emb"], caption, axis=0)        # [B, T, H]
    emb_tm = jnp.transpose(emb, (1, 0, 2))                # [T, B, H]

    v_bar = jnp.mean(features, axis=1)                    # [B, F]
    # Softmax over the size-1 score axis is identically 1.0 -> v_hat is the
    # plain sum over regions and is time-invariant (exactly matches PyTorch).
    v_hat = jnp.sum(features, axis=1)                     # [B, F]

    pre_a = v_bar @ params["w_ih_a"][H:H + F, :] + params["b_lstm_a"]   # [B, 4H]
    pre_l = v_hat @ params["w_ih_l"][H:H + F, :] + params["b_lstm_l"]   # [B, 4H]

    # Stacked recurrent weight slabs (bf16 for single-pass MXU matmuls).
    w_cat_a = jnp.concatenate(
        [params["w_ih_a"][0:H, :],               # h_lang slab
         params["w_ih_a"][H + F:2 * H + F, :],   # embedding slab
         params["w_hh_a"]], axis=0).astype(jnp.bfloat16)            # [3H, 4H]
    w_cat_l = jnp.concatenate(
        [params["w_ih_l"][0:H, :],               # h_attn slab
         params["w_hh_l"]], axis=0).astype(jnp.bfloat16)            # [2H, 4H]
    w_fc = params["w_fc"].astype(jnp.bfloat16)                       # [H, V]

    # -------- pad batch to a sublane multiple (8 rows per f32 vreg) ------------
    pad = BP - B
    emb_tm_p = jnp.pad(emb_tm, ((0, 0), (0, pad), (0, 0)))
    pre_a_p = jnp.pad(pre_a, ((0, pad), (0, 0)))
    pre_l_p = jnp.pad(pre_l, ((0, pad), (0, 0)))

    vmem = pl.BlockSpec(memory_space=pltpu.MemorySpace.VMEM)
    out_tm = pl.pallas_call(
        dual_lstm_kernel,
        out_shape=jax.ShapeDtypeStruct((T, BP, V), jnp.float32),
        in_specs=[vmem] * 7,
        out_specs=vmem,
        compiler_params=pltpu.CompilerParams(
            vmem_limit_bytes=32 * 1024 * 1024,   # actual footprint < 1 MiB
        ),
    )(emb_tm_p, pre_a_p, pre_l_p, w_cat_a, w_cat_l, w_fc, params["b_fc"])

    # [T, BP, V] -> [B, T, V]
    return jnp.transpose(out_tm[:, :B, :], (1, 0, 2))


# --------------------------- pure-JAX reference -------------------------------
# Faithful re-implementation of the PyTorch forward (including the degenerate
# softmax over the size-1 score axis), used to validate the optimized kernel.
def _cell_ref(x, h, c, w_ih, w_hh, b):
    gates = x @ w_ih + h @ w_hh + b
    i = jax.nn.sigmoid(gates[:, 0 * H:1 * H])
    f = jax.nn.sigmoid(gates[:, 1 * H:2 * H])
    g = jnp.tanh(gates[:, 2 * H:3 * H])
    o = jax.nn.sigmoid(gates[:, 3 * H:4 * H])
    c_new = f * c + i * g
    return o * jnp.tanh(c_new), c_new


def reference_forward(features, caption, p):
    h_attn = c_attn = h_lang = c_lang = jnp.zeros((B, H), jnp.float32)
    emb = jnp.take(p["emb"], caption, axis=0)
    v_bar = jnp.mean(features, axis=1)
    preds = []
    for t in range(T):
        x = jnp.concatenate([h_lang, v_bar, emb[:, t, :]], axis=1)
        h_attn, c_attn = _cell_ref(x, h_attn, c_attn,
                                   p["w_ih_a"], p["w_hh_a"], p["b_lstm_a"])
        a_v = features @ p["w_v"] + p["b_v"]
        a_h = h_attn @ p["w_h"] + p["b_h"]
        a = jnp.tanh(a_v + a_h[:, None, :]) @ p["w_a"] + p["b_aatt"]
        a_w = jax.nn.softmax(a, axis=-1)          # size-1 axis, == 1.0 (as in torch)
        v_hat = jnp.sum(a_w * features, axis=1)
        x = jnp.concatenate([h_attn, v_hat], axis=1)
        h_lang, c_lang = _cell_ref(x, h_lang, c_lang,
                                   p["w_ih_l"], p["w_hh_l"], p["b_lstm_l"])
        preds.append(h_lang @ p["w_fc"] + p["b_fc"])
    logits = jnp.stack(preds, axis=1)
    return jax.nn.log_softmax(logits, axis=2)


# ----------------------------------- main -------------------------------------
def _init_params(key):
    ks = jax.random.split(key, 16)
    s = 0.05
    p = {
        "emb":      jax.random.normal(ks[0], (V, H), jnp.float32) * s,
        "w_v":      jax.random.normal(ks[1], (F, A), jnp.float32) * s,
        "b_v":      jax.random.normal(ks[2], (1, A), jnp.float32) * s,
        "w_h":      jax.random.normal(ks[3], (H, A), jnp.float32) * s,
        "b_h":      jax.random.normal(ks[4], (1, A), jnp.float32) * s,
        "w_a":      jax.random.normal(ks[5], (A, 1), jnp.float32) * s,
        "b_aatt":   jax.random.normal(ks[6], (1, 1), jnp.float32) * s,
        "w_ih_a":   jax.random.normal(ks[7], (2 * H + F, 4 * H), jnp.float32) * s,
        "w_hh_a":   jax.random.normal(ks[8], (H, 4 * H), jnp.float32) * s,
        # b_ih + b_hh folded into a single bias (same semantics as summing both)
        "b_lstm_a": jax.random.normal(ks[9], (1, 4 * H), jnp.float32) * s,
        "w_ih_l":   jax.random.normal(ks[10], (H + F, 4 * H), jnp.float32) * s,
        "w_hh_l":   jax.random.normal(ks[11], (H, 4 * H), jnp.float32) * s,
        "b_lstm_l": jax.random.normal(ks[12], (1, 4 * H), jnp.float32) * s,
        "w_fc":     jax.random.normal(ks[13], (H, V), jnp.float32) * s,
        "b_fc":     jax.random.normal(ks[14], (1, V), jnp.float32) * s,
    }
    return p


if __name__ == "__main__":
    key = jax.random.PRNGKey(0)
    k_feat, k_cap, k_par = jax.random.split(key, 3)

    features = jax.random.normal(k_feat, (B, X, F), jnp.float32)
    caption = jax.random.randint(k_cap, (B, T), 0, V, dtype=jnp.int32)
    params = _init_params(k_par)

    out = dual_lstm_forward(features, caption, params)
    out = jax.block_until_ready(out)

    assert out.shape == (B, T, V), out.shape
    assert bool(jnp.all(jnp.isfinite(out)))

    ref = reference_forward(features, caption, params)
    max_err = float(jnp.max(jnp.abs(out - ref)))
    # Tolerance covers bf16 MXU passes in the kernel (f32 accumulate) vs. the
    # default-precision f32 reference.
    assert max_err < 5e-2, max_err

    print("KERNEL_OK")
</pallas_src>

<mosaic_0001>
module attributes {stable_mosaic.version = 11 : i64} {
  func.func @dual_lstm_kernel(%arg0: memref<6x8x128xf32, #tpu.memory_space<vmem>>, %arg1: memref<8x512xf32, #tpu.memory_space<vmem>>, %arg2: memref<8x512xf32, #tpu.memory_space<vmem>>, %arg3: memref<384x512xbf16, #tpu.memory_space<vmem>>, %arg4: memref<256x512xbf16, #tpu.memory_space<vmem>>, %arg5: memref<128x256xbf16, #tpu.memory_space<vmem>>, %arg6: memref<1x256xf32, #tpu.memory_space<vmem>>, %arg7: memref<6x8x256xf32, #tpu.memory_space<vmem>>) attributes {dimension_semantics = [], scalar_prefetch = 0 : i64, scratch_operands = 0 : i64, tpu.core_type = #tpu.core_type<tc>} {
    %c0 = arith.constant 0 : index
    %c0_0 = arith.constant 0 : index
    %0 = vector.load %arg1[%c0, %c0_0] : memref<8x512xf32, #tpu.memory_space<vmem>>, vector<8x512xf32>
    %c0_1 = arith.constant 0 : index
    %c0_2 = arith.constant 0 : index
    %1 = vector.load %arg2[%c0_1, %c0_2] : memref<8x512xf32, #tpu.memory_space<vmem>>, vector<8x512xf32>
    %c0_3 = arith.constant 0 : index
    %c0_4 = arith.constant 0 : index
    %2 = vector.load %arg3[%c0_3, %c0_4] : memref<384x512xbf16, #tpu.memory_space<vmem>>, vector<128x512xbf16>
    %c128 = arith.constant 128 : index
    %c0_5 = arith.constant 0 : index
    %3 = vector.load %arg3[%c128, %c0_5] : memref<384x512xbf16, #tpu.memory_space<vmem>>, vector<128x512xbf16>
    %c256 = arith.constant 256 : index
    %c0_6 = arith.constant 0 : index
    %4 = vector.load %arg3[%c256, %c0_6] : memref<384x512xbf16, #tpu.memory_space<vmem>>, vector<128x512xbf16>
    %c0_7 = arith.constant 0 : index
    %c0_8 = arith.constant 0 : index
    %5 = vector.load %arg4[%c0_7, %c0_8] : memref<256x512xbf16, #tpu.memory_space<vmem>>, vector<128x512xbf16>
    %c128_9 = arith.constant 128 : index
    %c0_10 = arith.constant 0 : index
    %6 = vector.load %arg4[%c128_9, %c0_10] : memref<256x512xbf16, #tpu.memory_space<vmem>>, vector<128x512xbf16>
    %cst = arith.constant 0.000000e+00 : f32
    %7 = vector.broadcast %cst : f32 to vector<8x128xf32>
    %cst_11 = arith.constant 0.000000e+00 : f32
    %8 = vector.broadcast %cst_11 : f32 to vector<8x128xf32>
    %cst_12 = arith.constant 0.000000e+00 : f32
    %9 = vector.broadcast %cst_12 : f32 to vector<8x128xf32>
    %cst_13 = arith.constant 0.000000e+00 : f32
    %10 = vector.broadcast %cst_13 : f32 to vector<8x128xf32>
    %c0_14 = arith.constant 0 : index
    %c0_15 = arith.constant 0 : index
    %c0_16 = arith.constant 0 : index
    %11 = vector.load %arg0[%c0_14, %c0_15, %c0_16] : memref<6x8x128xf32, #tpu.memory_space<vmem>>, vector<1x8x128xf32>
    %12 = vector.shape_cast %11 : vector<1x8x128xf32> to vector<8x128xf32>
    %13 = arith.truncf %12 : vector<8x128xf32> to vector<8x128xbf16>
    %14 = arith.truncf %9 : vector<8x128xf32> to vector<8x128xbf16>
    %cst_17 = arith.constant dense<0.000000e+00> : vector<8x512xf32>
    %15 = tpu.matmul %14, %2, %cst_17 {dimension_numbers = #tpu.dot_dimension_numbers<[1], [0], [0], [1], [0, 0, 1, 1], [], []>} : vector<8x128xbf16>, vector<128x512xbf16>, vector<8x512xf32> -> vector<8x512xf32>
    %16 = arith.addf %0, %15 : vector<8x512xf32>
    %cst_18 = arith.constant dense<0.000000e+00> : vector<8x512xf32>
    %17 = tpu.matmul %13, %3, %cst_18 {dimension_numbers = #tpu.dot_dimension_numbers<[1], [0], [0], [1], [0, 0, 1, 1], [], []>} : vector<8x128xbf16>, vector<128x512xbf16>, vector<8x512xf32> -> vector<8x512xf32>
    %18 = arith.addf %16, %17 : vector<8x512xf32>
    %19 = arith.truncf %7 : vector<8x128xf32> to vector<8x128xbf16>
    %cst_19 = arith.constant dense<0.000000e+00> : vector<8x512xf32>
    %20 = tpu.matmul %19, %4, %cst_19 {dimension_numbers = #tpu.dot_dimension_numbers<[1], [0], [0], [1], [0, 0, 1, 1], [], []>} : vector<8x128xbf16>, vector<128x512xbf16>, vector<8x512xf32> -> vector<8x512xf32>
    %21 = arith.addf %18, %20 : vector<8x512xf32>
    %22 = vector.extract_strided_slice %21 {offsets = [0, 0], sizes = [8, 128], strides = [1, 1]} : vector<8x512xf32> to vector<8x128xf32>
    %23 = arith.negf %22 : vector<8x128xf32>
    %24 = math.exp %23 : vector<8x128xf32>
    %cst_20 = arith.constant 1.000000e+00 : f32
    %25 = vector.broadcast %cst_20 : f32 to vector<8x128xf32>
    %26 = arith.addf %25, %24 : vector<8x128xf32>
    %27 = arith.divf %25, %26 : vector<8x128xf32>
    %28 = vector.extract_strided_slice %21 {offsets = [0, 128], sizes = [8, 128], strides = [1, 1]} : vector<8x512xf32> to vector<8x128xf32>
    %29 = arith.negf %28 : vector<8x128xf32>
    %30 = math.exp %29 : vector<8x128xf32>
    %cst_21 = arith.constant 1.000000e+00 : f32
    %31 = vector.broadcast %cst_21 : f32 to vector<8x128xf32>
    %32 = arith.addf %31, %30 : vector<8x128xf32>
    %33 = arith.divf %31, %32 : vector<8x128xf32>
    %34 = vector.extract_strided_slice %21 {offsets = [0, 256], sizes = [8, 128], strides = [1, 1]} : vector<8x512xf32> to vector<8x128xf32>
    %35 = math.tanh %34 : vector<8x128xf32>
    %36 = vector.extract_strided_slice %21 {offsets = [0, 384], sizes = [8, 128], strides = [1, 1]} : vector<8x512xf32> to vector<8x128xf32>
    %37 = arith.negf %36 : vector<8x128xf32>
    %38 = math.exp %37 : vector<8x128xf32>
    %cst_22 = arith.constant 1.000000e+00 : f32
    %39 = vector.broadcast %cst_22 : f32 to vector<8x128xf32>
    %40 = arith.addf %39, %38 : vector<8x128xf32>
    %41 = arith.divf %39, %40 : vector<8x128xf32>
    %42 = arith.mulf %33, %8 : vector<8x128xf32>
    %43 = arith.mulf %27, %35 : vector<8x128xf32>
    %44 = arith.addf %42, %43 : vector<8x128xf32>
    %45 = math.tanh %44 : vector<8x128xf32>
    %46 = arith.mulf %41, %45 : vector<8x128xf32>
    %47 = arith.truncf %46 : vector<8x128xf32> to vector<8x128xbf16>
    %cst_23 = arith.constant dense<0.000000e+00> : vector<8x512xf32>
    %48 = tpu.matmul %47, %5, %cst_23 {dimension_numbers = #tpu.dot_dimension_numbers<[1], [0], [0], [1], [0, 0, 1, 1], [], []>} : vector<8x128xbf16>, vector<128x512xbf16>, vector<8x512xf32> -> vector<8x512xf32>
    %49 = arith.addf %1, %48 : vector<8x512xf32>
    %50 = arith.truncf %9 : vector<8x128xf32> to vector<8x128xbf16>
    %cst_24 = arith.constant dense<0.000000e+00> : vector<8x512xf32>
    %51 = tpu.matmul %50, %6, %cst_24 {dimension_numbers = #tpu.dot_dimension_numbers<[1], [0], [0], [1], [0, 0, 1, 1], [], []>} : vector<8x128xbf16>, vector<128x512xbf16>, vector<8x512xf32> -> vector<8x512xf32>
    %52 = arith.addf %49, %51 : vector<8x512xf32>
    %53 = vector.extract_strided_slice %52 {offsets = [0, 0], sizes = [8, 128], strides = [1, 1]} : vector<8x512xf32> to vector<8x128xf32>
    %54 = arith.negf %53 : vector<8x128xf32>
    %55 = math.exp %54 : vector<8x128xf32>
    %cst_25 = arith.constant 1.000000e+00 : f32
    %56 = vector.broadcast %cst_25 : f32 to vector<8x128xf32>
    %57 = arith.addf %56, %55 : vector<8x128xf32>
    %58 = arith.divf %56, %57 : vector<8x128xf32>
    %59 = vector.extract_strided_slice %52 {offsets = [0, 128], sizes = [8, 128], strides = [1, 1]} : vector<8x512xf32> to vector<8x128xf32>
    %60 = arith.negf %59 : vector<8x128xf32>
    %61 = math.exp %60 : vector<8x128xf32>
    %cst_26 = arith.constant 1.000000e+00 : f32
    %62 = vector.broadcast %cst_26 : f32 to vector<8x128xf32>
    %63 = arith.addf %62, %61 : vector<8x128xf32>
    %64 = arith.divf %62, %63 : vector<8x128xf32>
    %65 = vector.extract_strided_slice %52 {offsets = [0, 256], sizes = [8, 128], strides = [1, 1]} : vector<8x512xf32> to vector<8x128xf32>
    %66 = math.tanh %65 : vector<8x128xf32>
    %67 = vector.extract_strided_slice %52 {offsets = [0, 384], sizes = [8, 128], strides = [1, 1]} : vector<8x512xf32> to vector<8x128xf32>
    %68 = arith.negf %67 : vector<8x128xf32>
    %69 = math.exp %68 : vector<8x128xf32>
    %cst_27 = arith.constant 1.000000e+00 : f32
    %70 = vector.broadcast %cst_27 : f32 to vector<8x128xf32>
    %71 = arith.addf %70, %69 : vector<8x128xf32>
    %72 = arith.divf %70, %71 : vector<8x128xf32>
    %73 = arith.mulf %64, %10 : vector<8x128xf32>
    %74 = arith.mulf %58, %66 : vector<8x128xf32>
    %75 = arith.addf %73, %74 : vector<8x128xf32>
    %76 = math.tanh %75 : vector<8x128xf32>
    %77 = arith.mulf %72, %76 : vector<8x128xf32>
    %c1 = arith.constant 1 : index
    %c0_28 = arith.constant 0 : index
    %c0_29 = arith.constant 0 : index
    %78 = vector.load %arg0[%c1, %c0_28, %c0_29] : memref<6x8x128xf32, #tpu.memory_space<vmem>>, vector<1x8x128xf32>
    %79 = vector.shape_cast %78 : vector<1x8x128xf32> to vector<8x128xf32>
    %80 = arith.truncf %79 : vector<8x128xf32> to vector<8x128xbf16>
    %81 = arith.truncf %77 : vector<8x128xf32> to vector<8x128xbf16>
    %cst_30 = arith.constant dense<0.000000e+00> : vector<8x512xf32>
    %82 = tpu.matmul %81, %2, %cst_30 {dimension_numbers = #tpu.dot_dimension_numbers<[1], [0], [0], [1], [0, 0, 1, 1], [], []>} : vector<8x128xbf16>, vector<128x512xbf16>, vector<8x512xf32> -> vector<8x512xf32>
    %83 = arith.addf %0, %82 : vector<8x512xf32>
    %cst_31 = arith.constant dense<0.000000e+00> : vector<8x512xf32>
    %84 = tpu.matmul %80, %3, %cst_31 {dimension_numbers = #tpu.dot_dimension_numbers<[1], [0], [0], [1], [0, 0, 1, 1], [], []>} : vector<8x128xbf16>, vector<128x512xbf16>, vector<8x512xf32> -> vector<8x512xf32>
    %85 = arith.addf %83, %84 : vector<8x512xf32>
    %86 = arith.truncf %46 : vector<8x128xf32> to vector<8x128xbf16>
    %cst_32 = arith.constant dense<0.000000e+00> : vector<8x512xf32>
    %87 = tpu.matmul %86, %4, %cst_32 {dimension_numbers = #tpu.dot_dimension_numbers<[1], [0], [0], [1], [0, 0, 1, 1], [], []>} : vector<8x128xbf16>, vector<128x512xbf16>, vector<8x512xf32> -> vector<8x512xf32>
    %88 = arith.addf %85, %87 : vector<8x512xf32>
    %89 = vector.extract_strided_slice %88 {offsets = [0, 0], sizes = [8, 128], strides = [1, 1]} : vector<8x512xf32> to vector<8x128xf32>
    %90 = arith.negf %89 : vector<8x128xf32>
    %91 = math.exp %90 : vector<8x128xf32>
    %cst_33 = arith.constant 1.000000e+00 : f32
    %92 = vector.broadcast %cst_33 : f32 to vector<8x128xf32>
    %93 = arith.addf %92, %91 : vector<8x128xf32>
    %94 = arith.divf %92, %93 : vector<8x128xf32>
    %95 = vector.extract_strided_slice %88 {offsets = [0, 128], sizes = [8, 128], strides = [1, 1]} : vector<8x512xf32> to vector<8x128xf32>
    %96 = arith.negf %95 : vector<8x128xf32>
    %97 = math.exp %96 : vector<8x128xf32>
    %cst_34 = arith.constant 1.000000e+00 : f32
    %98 = vector.broadcast %cst_34 : f32 to vector<8x128xf32>
    %99 = arith.addf %98, %97 : vector<8x128xf32>
    %100 = arith.divf %98, %99 : vector<8x128xf32>
    %101 = vector.extract_strided_slice %88 {offsets = [0, 256], sizes = [8, 128], strides = [1, 1]} : vector<8x512xf32> to vector<8x128xf32>
    %102 = math.tanh %101 : vector<8x128xf32>
    %103 = vector.extract_strided_slice %88 {offsets = [0, 384], sizes = [8, 128], strides = [1, 1]} : vector<8x512xf32> to vector<8x128xf32>
    %104 = arith.negf %103 : vector<8x128xf32>
    %105 = math.exp %104 : vector<8x128xf32>
    %cst_35 = arith.constant 1.000000e+00 : f32
    %106 = vector.broadcast %cst_35 : f32 to vector<8x128xf32>
    %107 = arith.addf %106, %105 : vector<8x128xf32>
    %108 = arith.divf %106, %107 : vector<8x128xf32>
    %109 = arith.mulf %100, %44 : vector<8x128xf32>
    %110 = arith.mulf %94, %102 : vector<8x128xf32>
    %111 = arith.addf %109, %110 : vector<8x128xf32>
    %112 = math.tanh %111 : vector<8x128xf32>
    %113 = arith.mulf %108, %112 : vector<8x128xf32>
    %114 = arith.truncf %113 : vector<8x128xf32> to vector<8x128xbf16>
    %cst_36 = arith.constant dense<0.000000e+00> : vector<8x512xf32>
    %115 = tpu.matmul %114, %5, %cst_36 {dimension_numbers = #tpu.dot_dimension_numbers<[1], [0], [0], [1], [0, 0, 1, 1], [], []>} : vector<8x128xbf16>, vector<128x512xbf16>, vector<8x512xf32> -> vector<8x512xf32>
    %116 = arith.addf %1, %115 : vector<8x512xf32>
    %117 = arith.truncf %77 : vector<8x128xf32> to vector<8x128xbf16>
    %cst_37 = arith.constant dense<0.000000e+00> : vector<8x512xf32>
    %118 = tpu.matmul %117, %6, %cst_37 {dimension_numbers = #tpu.dot_dimension_numbers<[1], [0], [0], [1], [0, 0, 1, 1], [], []>} : vector<8x128xbf16>, vector<128x512xbf16>, vector<8x512xf32> -> vector<8x512xf32>
    %119 = arith.addf %116, %118 : vector<8x512xf32>
    %120 = vector.extract_strided_slice %119 {offsets = [0, 0], sizes = [8, 128], strides = [1, 1]} : vector<8x512xf32> to vector<8x128xf32>
    %121 = arith.negf %120 : vector<8x128xf32>
    %122 = math.exp %121 : vector<8x128xf32>
    %cst_38 = arith.constant 1.000000e+00 : f32
    %123 = vector.broadcast %cst_38 : f32 to vector<8x128xf32>
    %124 = arith.addf %123, %122 : vector<8x128xf32>
    %125 = arith.divf %123, %124 : vector<8x128xf32>
    %126 = vector.extract_strided_slice %119 {offsets = [0, 128], sizes = [8, 128], strides = [1, 1]} : vector<8x512xf32> to vector<8x128xf32>
    %127 = arith.negf %126 : vector<8x128xf32>
    %128 = math.exp %127 : vector<8x128xf32>
    %cst_39 = arith.constant 1.000000e+00 : f32
    %129 = vector.broadcast %cst_39 : f32 to vector<8x128xf32>
    %130 = arith.addf %129, %128 : vector<8x128xf32>
    %131 = arith.divf %129, %130 : vector<8x128xf32>
    %132 = vector.extract_strided_slice %119 {offsets = [0, 256], sizes = [8, 128], strides = [1, 1]} : vector<8x512xf32> to vector<8x128xf32>
    %133 = math.tanh %132 : vector<8x128xf32>
    %134 = vector.extract_strided_slice %119 {offsets = [0, 384], sizes = [8, 128], strides = [1, 1]} : vector<8x512xf32> to vector<8x128xf32>
    %135 = arith.negf %134 : vector<8x128xf32>
    %136 = math.exp %135 : vector<8x128xf32>
    %cst_40 = arith.constant 1.000000e+00 : f32
    %137 = vector.broadcast %cst_40 : f32 to vector<8x128xf32>
    %138 = arith.addf %137, %136 : vector<8x128xf32>
    %139 = arith.divf %137, %138 : vector<8x128xf32>
    %140 = arith.mulf %131, %75 : vector<8x128xf32>
    %141 = arith.mulf %125, %133 : vector<8x128xf32>
    %142 = arith.addf %140, %141 : vector<8x128xf32>
    %143 = math.tanh %142 : vector<8x128xf32>
    %144 = arith.mulf %139, %143 : vector<8x128xf32>
    %c2 = arith.constant 2 : index
    %c0_41 = arith.constant 0 : index
    %c0_42 = arith.constant 0 : index
    %145 = vector.load %arg0[%c2, %c0_41, %c0_42] : memref<6x8x128xf32, #tpu.memory_space<vmem>>, vector<1x8x128xf32>
    %146 = vector.shape_cast %145 : vector<1x8x128xf32> to vector<8x128xf32>
    %147 = arith.truncf %146 : vector<8x128xf32> to vector<8x128xbf16>
    %148 = arith.truncf %144 : vector<8x128xf32> to vector<8x128xbf16>
    %cst_43 = arith.constant dense<0.000000e+00> : vector<8x512xf32>
    %149 = tpu.matmul %148, %2, %cst_43 {dimension_numbers = #tpu.dot_dimension_numbers<[1], [0], [0], [1], [0, 0, 1, 1], [], []>} : vector<8x128xbf16>, vector<128x512xbf16>, vector<8x512xf32> -> vector<8x512xf32>
    %150 = arith.addf %0, %149 : vector<8x512xf32>
    %cst_44 = arith.constant dense<0.000000e+00> : vector<8x512xf32>
    %151 = tpu.matmul %147, %3, %cst_44 {dimension_numbers = #tpu.dot_dimension_numbers<[1], [0], [0], [1], [0, 0, 1, 1], [], []>} : vector<8x128xbf16>, vector<128x512xbf16>, vector<8x512xf32> -> vector<8x512xf32>
    %152 = arith.addf %150, %151 : vector<8x512xf32>
    %153 = arith.truncf %113 : vector<8x128xf32> to vector<8x128xbf16>
    %cst_45 = arith.constant dense<0.000000e+00> : vector<8x512xf32>
    %154 = tpu.matmul %153, %4, %cst_45 {dimension_numbers = #tpu.dot_dimension_numbers<[1], [0], [0], [1], [0, 0, 1, 1], [], []>} : vector<8x128xbf16>, vector<128x512xbf16>, vector<8x512xf32> -> vector<8x512xf32>
    %155 = arith.addf %152, %154 : vector<8x512xf32>
    %156 = vector.extract_strided_slice %155 {offsets = [0, 0], sizes = [8, 128], strides = [1, 1]} : vector<8x512xf32> to vector<8x128xf32>
    %157 = arith.negf %156 : vector<8x128xf32>
    %158 = math.exp %157 : vector<8x128xf32>
    %cst_46 = arith.constant 1.000000e+00 : f32
    %159 = vector.broadcast %cst_46 : f32 to vector<8x128xf32>
    %160 = arith.addf %159, %158 : vector<8x128xf32>
    %161 = arith.divf %159, %160 : vector<8x128xf32>
    %162 = vector.extract_strided_slice %155 {offsets = [0, 128], sizes = [8, 128], strides = [1, 1]} : vector<8x512xf32> to vector<8x128xf32>
    %163 = arith.negf %162 : vector<8x128xf32>
    %164 = math.exp %163 : vector<8x128xf32>
    %cst_47 = arith.constant 1.000000e+00 : f32
    %165 = vector.broadcast %cst_47 : f32 to vector<8x128xf32>
    %166 = arith.addf %165, %164 : vector<8x128xf32>
    %167 = arith.divf %165, %166 : vector<8x128xf32>
    %168 = vector.extract_strided_slice %155 {offsets = [0, 256], sizes = [8, 128], strides = [1, 1]} : vector<8x512xf32> to vector<8x128xf32>
    %169 = math.tanh %168 : vector<8x128xf32>
    %170 = vector.extract_strided_slice %155 {offsets = [0, 384], sizes = [8, 128], strides = [1, 1]} : vector<8x512xf32> to vector<8x128xf32>
    %171 = arith.negf %170 : vector<8x128xf32>
    %172 = math.exp %171 : vector<8x128xf32>
    %cst_48 = arith.constant 1.000000e+00 : f32
    %173 = vector.broadcast %cst_48 : f32 to vector<8x128xf32>
    %174 = arith.addf %173, %172 : vector<8x128xf32>
    %175 = arith.divf %173, %174 : vector<8x128xf32>
    %176 = arith.mulf %167, %111 : vector<8x128xf32>
    %177 = arith.mulf %161, %169 : vector<8x128xf32>
    %178 = arith.addf %176, %177 : vector<8x128xf32>
    %179 = math.tanh %178 : vector<8x128xf32>
    %180 = arith.mulf %175, %179 : vector<8x128xf32>
    %181 = arith.truncf %180 : vector<8x128xf32> to vector<8x128xbf16>
    %cst_49 = arith.constant dense<0.000000e+00> : vector<8x512xf32>
    %182 = tpu.matmul %181, %5, %cst_49 {dimension_numbers = #tpu.dot_dimension_numbers<[1], [0], [0], [1], [0, 0, 1, 1], [], []>} : vector<8x128xbf16>, vector<128x512xbf16>, vector<8x512xf32> -> vector<8x512xf32>
    %183 = arith.addf %1, %182 : vector<8x512xf32>
    %184 = arith.truncf %144 : vector<8x128xf32> to vector<8x128xbf16>
    %cst_50 = arith.constant dense<0.000000e+00> : vector<8x512xf32>
    %185 = tpu.matmul %184, %6, %cst_50 {dimension_numbers = #tpu.dot_dimension_numbers<[1], [0], [0], [1], [0, 0, 1, 1], [], []>} : vector<8x128xbf16>, vector<128x512xbf16>, vector<8x512xf32> -> vector<8x512xf32>
    %186 = arith.addf %183, %185 : vector<8x512xf32>
    %187 = vector.extract_strided_slice %186 {offsets = [0, 0], sizes = [8, 128], strides = [1, 1]} : vector<8x512xf32> to vector<8x128xf32>
    %188 = arith.negf %187 : vector<8x128xf32>
    %189 = math.exp %188 : vector<8x128xf32>
    %cst_51 = arith.constant 1.000000e+00 : f32
    %190 = vector.broadcast %cst_51 : f32 to vector<8x128xf32>
    %191 = arith.addf %190, %189 : vector<8x128xf32>
    %192 = arith.divf %190, %191 : vector<8x128xf32>
    %193 = vector.extract_strided_slice %186 {offsets = [0, 128], sizes = [8, 128], strides = [1, 1]} : vector<8x512xf32> to vector<8x128xf32>
    %194 = arith.negf %193 : vector<8x128xf32>
    %195 = math.exp %194 : vector<8x128xf32>
    %cst_52 = arith.constant 1.000000e+00 : f32
    %196 = vector.broadcast %cst_52 : f32 to vector<8x128xf32>
    %197 = arith.addf %196, %195 : vector<8x128xf32>
    %198 = arith.divf %196, %197 : vector<8x128xf32>
    %199 = vector.extract_strided_slice %186 {offsets = [0, 256], sizes = [8, 128], strides = [1, 1]} : vector<8x512xf32> to vector<8x128xf32>
    %200 = math.tanh %199 : vector<8x128xf32>
    %201 = vector.extract_strided_slice %186 {offsets = [0, 384], sizes = [8, 128], strides = [1, 1]} : vector<8x512xf32> to vector<8x128xf32>
    %202 = arith.negf %201 : vector<8x128xf32>
    %203 = math.exp %202 : vector<8x128xf32>
    %cst_53 = arith.constant 1.000000e+00 : f32
    %204 = vector.broadcast %cst_53 : f32 to vector<8x128xf32>
    %205 = arith.addf %204, %203 : vector<8x128xf32>
    %206 = arith.divf %204, %205 : vector<8x128xf32>
    %207 = arith.mulf %198, %142 : vector<8x128xf32>
    %208 = arith.mulf %192, %200 : vector<8x128xf32>
    %209 = arith.addf %207, %208 : vector<8x128xf32>
    %210 = math.tanh %209 : vector<8x128xf32>
    %211 = arith.mulf %206, %210 : vector<8x128xf32>
    %c3 = arith.constant 3 : index
    %c0_54 = arith.constant 0 : index
    %c0_55 = arith.constant 0 : index
    %212 = vector.load %arg0[%c3, %c0_54, %c0_55] : memref<6x8x128xf32, #tpu.memory_space<vmem>>, vector<1x8x128xf32>
    %213 = vector.shape_cast %212 : vector<1x8x128xf32> to vector<8x128xf32>
    %214 = arith.truncf %213 : vector<8x128xf32> to vector<8x128xbf16>
    %215 = arith.truncf %211 : vector<8x128xf32> to vector<8x128xbf16>
    %cst_56 = arith.constant dense<0.000000e+00> : vector<8x512xf32>
    %216 = tpu.matmul %215, %2, %cst_56 {dimension_numbers = #tpu.dot_dimension_numbers<[1], [0], [0], [1], [0, 0, 1, 1], [], []>} : vector<8x128xbf16>, vector<128x512xbf16>, vector<8x512xf32> -> vector<8x512xf32>
    %217 = arith.addf %0, %216 : vector<8x512xf32>
    %cst_57 = arith.constant dense<0.000000e+00> : vector<8x512xf32>
    %218 = tpu.matmul %214, %3, %cst_57 {dimension_numbers = #tpu.dot_dimension_numbers<[1], [0], [0], [1], [0, 0, 1, 1], [], []>} : vector<8x128xbf16>, vector<128x512xbf16>, vector<8x512xf32> -> vector<8x512xf32>
    %219 = arith.addf %217, %218 : vector<8x512xf32>
    %220 = arith.truncf %180 : vector<8x128xf32> to vector<8x128xbf16>
    %cst_58 = arith.constant dense<0.000000e+00> : vector<8x512xf32>
    %221 = tpu.matmul %220, %4, %cst_58 {dimension_numbers = #tpu.dot_dimension_numbers<[1], [0], [0], [1], [0, 0, 1, 1], [], []>} : vector<8x128xbf16>, vector<128x512xbf16>, vector<8x512xf32> -> vector<8x512xf32>
    %222 = arith.addf %219, %221 : vector<8x512xf32>
    %223 = vector.extract_strided_slice %222 {offsets = [0, 0], sizes = [8, 128], strides = [1, 1]} : vector<8x512xf32> to vector<8x128xf32>
    %224 = arith.negf %223 : vector<8x128xf32>
    %225 = math.exp %224 : vector<8x128xf32>
    %cst_59 = arith.constant 1.000000e+00 : f32
    %226 = vector.broadcast %cst_59 : f32 to vector<8x128xf32>
    %227 = arith.addf %226, %225 : vector<8x128xf32>
    %228 = arith.divf %226, %227 : vector<8x128xf32>
    %229 = vector.extract_strided_slice %222 {offsets = [0, 128], sizes = [8, 128], strides = [1, 1]} : vector<8x512xf32> to vector<8x128xf32>
    %230 = arith.negf %229 : vector<8x128xf32>
    %231 = math.exp %230 : vector<8x128xf32>
    %cst_60 = arith.constant 1.000000e+00 : f32
    %232 = vector.broadcast %cst_60 : f32 to vector<8x128xf32>
    %233 = arith.addf %232, %231 : vector<8x128xf32>
    %234 = arith.divf %232, %233 : vector<8x128xf32>
    %235 = vector.extract_strided_slice %222 {offsets = [0, 256], sizes = [8, 128], strides = [1, 1]} : vector<8x512xf32> to vector<8x128xf32>
    %236 = math.tanh %235 : vector<8x128xf32>
    %237 = vector.extract_strided_slice %222 {offsets = [0, 384], sizes = [8, 128], strides = [1, 1]} : vector<8x512xf32> to vector<8x128xf32>
    %238 = arith.negf %237 : vector<8x128xf32>
    %239 = math.exp %238 : vector<8x128xf32>
    %cst_61 = arith.constant 1.000000e+00 : f32
    %240 = vector.broadcast %cst_61 : f32 to vector<8x128xf32>
    %241 = arith.addf %240, %239 : vector<8x128xf32>
    %242 = arith.divf %240, %241 : vector<8x128xf32>
    %243 = arith.mulf %234, %178 : vector<8x128xf32>
    %244 = arith.mulf %228, %236 : vector<8x128xf32>
    %245 = arith.addf %243, %244 : vector<8x128xf32>
    %246 = math.tanh %245 : vector<8x128xf32>
    %247 = arith.mulf %242, %246 : vector<8x128xf32>
    %248 = arith.truncf %247 : vector<8x128xf32> to vector<8x128xbf16>
    %cst_62 = arith.constant dense<0.000000e+00> : vector<8x512xf32>
    %249 = tpu.matmul %248, %5, %cst_62 {dimension_numbers = #tpu.dot_dimension_numbers<[1], [0], [0], [1], [0, 0, 1, 1], [], []>} : vector<8x128xbf16>, vector<128x512xbf16>, vector<8x512xf32> -> vector<8x512xf32>
    %250 = arith.addf %1, %249 : vector<8x512xf32>
    %251 = arith.truncf %211 : vector<8x128xf32> to vector<8x128xbf16>
    %cst_63 = arith.constant dense<0.000000e+00> : vector<8x512xf32>
    %252 = tpu.matmul %251, %6, %cst_63 {dimension_numbers = #tpu.dot_dimension_numbers<[1], [0], [0], [1], [0, 0, 1, 1], [], []>} : vector<8x128xbf16>, vector<128x512xbf16>, vector<8x512xf32> -> vector<8x512xf32>
    %253 = arith.addf %250, %252 : vector<8x512xf32>
    %254 = vector.extract_strided_slice %253 {offsets = [0, 0], sizes = [8, 128], strides = [1, 1]} : vector<8x512xf32> to vector<8x128xf32>
    %255 = arith.negf %254 : vector<8x128xf32>
    %256 = math.exp %255 : vector<8x128xf32>
    %cst_64 = arith.constant 1.000000e+00 : f32
    %257 = vector.broadcast %cst_64 : f32 to vector<8x128xf32>
    %258 = arith.addf %257, %256 : vector<8x128xf32>
    %259 = arith.divf %257, %258 : vector<8x128xf32>
    %260 = vector.extract_strided_slice %253 {offsets = [0, 128], sizes = [8, 128], strides = [1, 1]} : vector<8x512xf32> to vector<8x128xf32>
    %261 = arith.negf %260 : vector<8x128xf32>
    %262 = math.exp %261 : vector<8x128xf32>
    %cst_65 = arith.constant 1.000000e+00 : f32
    %263 = vector.broadcast %cst_65 : f32 to vector<8x128xf32>
    %264 = arith.addf %263, %262 : vector<8x128xf32>
    %265 = arith.divf %263, %264 : vector<8x128xf32>
    %266 = vector.extract_strided_slice %253 {offsets = [0, 256], sizes = [8, 128], strides = [1, 1]} : vector<8x512xf32> to vector<8x128xf32>
    %267 = math.tanh %266 : vector<8x128xf32>
    %268 = vector.extract_strided_slice %253 {offsets = [0, 384], sizes = [8, 128], strides = [1, 1]} : vector<8x512xf32> to vector<8x128xf32>
    %269 = arith.negf %268 : vector<8x128xf32>
    %270 = math.exp %269 : vector<8x128xf32>
    %cst_66 = arith.constant 1.000000e+00 : f32
    %271 = vector.broadcast %cst_66 : f32 to vector<8x128xf32>
    %272 = arith.addf %271, %270 : vector<8x128xf32>
    %273 = arith.divf %271, %272 : vector<8x128xf32>
    %274 = arith.mulf %265, %209 : vector<8x128xf32>
    %275 = arith.mulf %259, %267 : vector<8x128xf32>
    %276 = arith.addf %274, %275 : vector<8x128xf32>
    %277 = math.tanh %276 : vector<8x128xf32>
    %278 = arith.mulf %273, %277 : vector<8x128xf32>
    %c4 = arith.constant 4 : index
    %c0_67 = arith.constant 0 : index
    %c0_68 = arith.constant 0 : index
    %279 = vector.load %arg0[%c4, %c0_67, %c0_68] : memref<6x8x128xf32, #tpu.memory_space<vmem>>, vector<1x8x128xf32>
    %280 = vector.shape_cast %279 : vector<1x8x128xf32> to vector<8x128xf32>
    %281 = arith.truncf %280 : vector<8x128xf32> to vector<8x128xbf16>
    %282 = arith.truncf %278 : vector<8x128xf32> to vector<8x128xbf16>
    %cst_69 = arith.constant dense<0.000000e+00> : vector<8x512xf32>
    %283 = tpu.matmul %282, %2, %cst_69 {dimension_numbers = #tpu.dot_dimension_numbers<[1], [0], [0], [1], [0, 0, 1, 1], [], []>} : vector<8x128xbf16>, vector<128x512xbf16>, vector<8x512xf32> -> vector<8x512xf32>
    %284 = arith.addf %0, %283 : vector<8x512xf32>
    %cst_70 = arith.constant dense<0.000000e+00> : vector<8x512xf32>
    %285 = tpu.matmul %281, %3, %cst_70 {dimension_numbers = #tpu.dot_dimension_numbers<[1], [0], [0], [1], [0, 0, 1, 1], [], []>} : vector<8x128xbf16>, vector<128x512xbf16>, vector<8x512xf32> -> vector<8x512xf32>
    %286 = arith.addf %284, %285 : vector<8x512xf32>
    %287 = arith.truncf %247 : vector<8x128xf32> to vector<8x128xbf16>
    %cst_71 = arith.constant dense<0.000000e+00> : vector<8x512xf32>
    %288 = tpu.matmul %287, %4, %cst_71 {dimension_numbers = #tpu.dot_dimension_numbers<[1], [0], [0], [1], [0, 0, 1, 1], [], []>} : vector<8x128xbf16>, vector<128x512xbf16>, vector<8x512xf32> -> vector<8x512xf32>
    %289 = arith.addf %286, %288 : vector<8x512xf32>
    %290 = vector.extract_strided_slice %289 {offsets = [0, 0], sizes = [8, 128], strides = [1, 1]} : vector<8x512xf32> to vector<8x128xf32>
    %291 = arith.negf %290 : vector<8x128xf32>
    %292 = math.exp %291 : vector<8x128xf32>
    %cst_72 = arith.constant 1.000000e+00 : f32
    %293 = vector.broadcast %cst_72 : f32 to vector<8x128xf32>
    %294 = arith.addf %293, %292 : vector<8x128xf32>
    %295 = arith.divf %293, %294 : vector<8x128xf32>
    %296 = vector.extract_strided_slice %289 {offsets = [0, 128], sizes = [8, 128], strides = [1, 1]} : vector<8x512xf32> to vector<8x128xf32>
    %297 = arith.negf %296 : vector<8x128xf32>
    %298 = math.exp %297 : vector<8x128xf32>
    %cst_73 = arith.constant 1.000000e+00 : f32
    %299 = vector.broadcast %cst_73 : f32 to vector<8x128xf32>
    %300 = arith.addf %299, %298 : vector<8x128xf32>
    %301 = arith.divf %299, %300 : vector<8x128xf32>
    %302 = vector.extract_strided_slice %289 {offsets = [0, 256], sizes = [8, 128], strides = [1, 1]} : vector<8x512xf32> to vector<8x128xf32>
    %303 = math.tanh %302 : vector<8x128xf32>
    %304 = vector.extract_strided_slice %289 {offsets = [0, 384], sizes = [8, 128], strides = [1, 1]} : vector<8x512xf32> to vector<8x128xf32>
    %305 = arith.negf %304 : vector<8x128xf32>
    %306 = math.exp %305 : vector<8x128xf32>
    %cst_74 = arith.constant 1.000000e+00 : f32
    %307 = vector.broadcast %cst_74 : f32 to vector<8x128xf32>
    %308 = arith.addf %307, %306 : vector<8x128xf32>
    %309 = arith.divf %307, %308 : vector<8x128xf32>
    %310 = arith.mulf %301, %245 : vector<8x128xf32>
    %311 = arith.mulf %295, %303 : vector<8x128xf32>
    %312 = arith.addf %310, %311 : vector<8x128xf32>
    %313 = math.tanh %312 : vector<8x128xf32>
    %314 = arith.mulf %309, %313 : vector<8x128xf32>
    %315 = arith.truncf %314 : vector<8x128xf32> to vector<8x128xbf16>
    %cst_75 = arith.constant dense<0.000000e+00> : vector<8x512xf32>
    %316 = tpu.matmul %315, %5, %cst_75 {dimension_numbers = #tpu.dot_dimension_numbers<[1], [0], [0], [1], [0, 0, 1, 1], [], []>} : vector<8x128xbf16>, vector<128x512xbf16>, vector<8x512xf32> -> vector<8x512xf32>
    %317 = arith.addf %1, %316 : vector<8x512xf32>
    %318 = arith.truncf %278 : vector<8x128xf32> to vector<8x128xbf16>
    %cst_76 = arith.constant dense<0.000000e+00> : vector<8x512xf32>
    %319 = tpu.matmul %318, %6, %cst_76 {dimension_numbers = #tpu.dot_dimension_numbers<[1], [0], [0], [1], [0, 0, 1, 1], [], []>} : vector<8x128xbf16>, vector<128x512xbf16>, vector<8x512xf32> -> vector<8x512xf32>
    %320 = arith.addf %317, %319 : vector<8x512xf32>
    %321 = vector.extract_strided_slice %320 {offsets = [0, 0], sizes = [8, 128], strides = [1, 1]} : vector<8x512xf32> to vector<8x128xf32>
    %322 = arith.negf %321 : vector<8x128xf32>
    %323 = math.exp %322 : vector<8x128xf32>
    %cst_77 = arith.constant 1.000000e+00 : f32
    %324 = vector.broadcast %cst_77 : f32 to vector<8x128xf32>
    %325 = arith.addf %324, %323 : vector<8x128xf32>
    %326 = arith.divf %324, %325 : vector<8x128xf32>
    %327 = vector.extract_strided_slice %320 {offsets = [0, 128], sizes = [8, 128], strides = [1, 1]} : vector<8x512xf32> to vector<8x128xf32>
    %328 = arith.negf %327 : vector<8x128xf32>
    %329 = math.exp %328 : vector<8x128xf32>
    %cst_78 = arith.constant 1.000000e+00 : f32
    %330 = vector.broadcast %cst_78 : f32 to vector<8x128xf32>
    %331 = arith.addf %330, %329 : vector<8x128xf32>
    %332 = arith.divf %330, %331 : vector<8x128xf32>
    %333 = vector.extract_strided_slice %320 {offsets = [0, 256], sizes = [8, 128], strides = [1, 1]} : vector<8x512xf32> to vector<8x128xf32>
    %334 = math.tanh %333 : vector<8x128xf32>
    %335 = vector.extract_strided_slice %320 {offsets = [0, 384], sizes = [8, 128], strides = [1, 1]} : vector<8x512xf32> to vector<8x128xf32>
    %336 = arith.negf %335 : vector<8x128xf32>
    %337 = math.exp %336 : vector<8x128xf32>
    %cst_79 = arith.constant 1.000000e+00 : f32
    %338 = vector.broadcast %cst_79 : f32 to vector<8x128xf32>
    %339 = arith.addf %338, %337 : vector<8x128xf32>
    %340 = arith.divf %338, %339 : vector<8x128xf32>
    %341 = arith.mulf %332, %276 : vector<8x128xf32>
    %342 = arith.mulf %326, %334 : vector<8x128xf32>
    %343 = arith.addf %341, %342 : vector<8x128xf32>
    %344 = math.tanh %343 : vector<8x128xf32>
    %345 = arith.mulf %340, %344 : vector<8x128xf32>
    %c5 = arith.constant 5 : index
    %c0_80 = arith.constant 0 : index
    %c0_81 = arith.constant 0 : index
    %346 = vector.load %arg0[%c5, %c0_80, %c0_81] : memref<6x8x128xf32, #tpu.memory_space<vmem>>, vector<1x8x128xf32>
    %347 = vector.shape_cast %346 : vector<1x8x128xf32> to vector<8x128xf32>
    %348 = arith.truncf %347 : vector<8x128xf32> to vector<8x128xbf16>
    %349 = arith.truncf %345 : vector<8x128xf32> to vector<8x128xbf16>
    %cst_82 = arith.constant dense<0.000000e+00> : vector<8x512xf32>
    %350 = tpu.matmul %349, %2, %cst_82 {dimension_numbers = #tpu.dot_dimension_numbers<[1], [0], [0], [1], [0, 0, 1, 1], [], []>} : vector<8x128xbf16>, vector<128x512xbf16>, vector<8x512xf32> -> vector<8x512xf32>
    %351 = arith.addf %0, %350 : vector<8x512xf32>
    %cst_83 = arith.constant dense<0.000000e+00> : vector<8x512xf32>
    %352 = tpu.matmul %348, %3, %cst_83 {dimension_numbers = #tpu.dot_dimension_numbers<[1], [0], [0], [1], [0, 0, 1, 1], [], []>} : vector<8x128xbf16>, vector<128x512xbf16>, vector<8x512xf32> -> vector<8x512xf32>
    %353 = arith.addf %351, %352 : vector<8x512xf32>
    %354 = arith.truncf %314 : vector<8x128xf32> to vector<8x128xbf16>
    %cst_84 = arith.constant dense<0.000000e+00> : vector<8x512xf32>
    %355 = tpu.matmul %354, %4, %cst_84 {dimension_numbers = #tpu.dot_dimension_numbers<[1], [0], [0], [1], [0, 0, 1, 1], [], []>} : vector<8x128xbf16>, vector<128x512xbf16>, vector<8x512xf32> -> vector<8x512xf32>
    %356 = arith.addf %353, %355 : vector<8x512xf32>
    %357 = vector.extract_strided_slice %356 {offsets = [0, 0], sizes = [8, 128], strides = [1, 1]} : vector<8x512xf32> to vector<8x128xf32>
    %358 = arith.negf %357 : vector<8x128xf32>
    %359 = math.exp %358 : vector<8x128xf32>
    %cst_85 = arith.constant 1.000000e+00 : f32
    %360 = vector.broadcast %cst_85 : f32 to vector<8x128xf32>
    %361 = arith.addf %360, %359 : vector<8x128xf32>
    %362 = arith.divf %360, %361 : vector<8x128xf32>
    %363 = vector.extract_strided_slice %356 {offsets = [0, 128], sizes = [8, 128], strides = [1, 1]} : vector<8x512xf32> to vector<8x128xf32>
    %364 = arith.negf %363 : vector<8x128xf32>
    %365 = math.exp %364 : vector<8x128xf32>
    %cst_86 = arith.constant 1.000000e+00 : f32
    %366 = vector.broadcast %cst_86 : f32 to vector<8x128xf32>
    %367 = arith.addf %366, %365 : vector<8x128xf32>
    %368 = arith.divf %366, %367 : vector<8x128xf32>
    %369 = vector.extract_strided_slice %356 {offsets = [0, 256], sizes = [8, 128], strides = [1, 1]} : vector<8x512xf32> to vector<8x128xf32>
    %370 = math.tanh %369 : vector<8x128xf32>
    %371 = vector.extract_strided_slice %356 {offsets = [0, 384], sizes = [8, 128], strides = [1, 1]} : vector<8x512xf32> to vector<8x128xf32>
    %372 = arith.negf %371 : vector<8x128xf32>
    %373 = math.exp %372 : vector<8x128xf32>
    %cst_87 = arith.constant 1.000000e+00 : f32
    %374 = vector.broadcast %cst_87 : f32 to vector<8x128xf32>
    %375 = arith.addf %374, %373 : vector<8x128xf32>
    %376 = arith.divf %374, %375 : vector<8x128xf32>
    %377 = arith.mulf %368, %312 : vector<8x128xf32>
    %378 = arith.mulf %362, %370 : vector<8x128xf32>
    %379 = arith.addf %377, %378 : vector<8x128xf32>
    %380 = math.tanh %379 : vector<8x128xf32>
    %381 = arith.mulf %376, %380 : vector<8x128xf32>
    %382 = arith.truncf %381 : vector<8x128xf32> to vector<8x128xbf16>
    %cst_88 = arith.constant dense<0.000000e+00> : vector<8x512xf32>
    %383 = tpu.matmul %382, %5, %cst_88 {dimension_numbers = #tpu.dot_dimension_numbers<[1], [0], [0], [1], [0, 0, 1, 1], [], []>} : vector<8x128xbf16>, vector<128x512xbf16>, vector<8x512xf32> -> vector<8x512xf32>
    %384 = arith.addf %1, %383 : vector<8x512xf32>
    %385 = arith.truncf %345 : vector<8x128xf32> to vector<8x128xbf16>
    %cst_89 = arith.constant dense<0.000000e+00> : vector<8x512xf32>
    %386 = tpu.matmul %385, %6, %cst_89 {dimension_numbers = #tpu.dot_dimension_numbers<[1], [0], [0], [1], [0, 0, 1, 1], [], []>} : vector<8x128xbf16>, vector<128x512xbf16>, vector<8x512xf32> -> vector<8x512xf32>
    %387 = arith.addf %384, %386 : vector<8x512xf32>
    %388 = vector.extract_strided_slice %387 {offsets = [0, 0], sizes = [8, 128], strides = [1, 1]} : vector<8x512xf32> to vector<8x128xf32>
    %389 = arith.negf %388 : vector<8x128xf32>
    %390 = math.exp %389 : vector<8x128xf32>
    %cst_90 = arith.constant 1.000000e+00 : f32
    %391 = vector.broadcast %cst_90 : f32 to vector<8x128xf32>
    %392 = arith.addf %391, %390 : vector<8x128xf32>
    %393 = arith.divf %391, %392 : vector<8x128xf32>
    %394 = vector.extract_strided_slice %387 {offsets = [0, 128], sizes = [8, 128], strides = [1, 1]} : vector<8x512xf32> to vector<8x128xf32>
    %395 = arith.negf %394 : vector<8x128xf32>
    %396 = math.exp %395 : vector<8x128xf32>
    %cst_91 = arith.constant 1.000000e+00 : f32
    %397 = vector.broadcast %cst_91 : f32 to vector<8x128xf32>
    %398 = arith.addf %397, %396 : vector<8x128xf32>
    %399 = arith.divf %397, %398 : vector<8x128xf32>
    %400 = vector.extract_strided_slice %387 {offsets = [0, 256], sizes = [8, 128], strides = [1, 1]} : vector<8x512xf32> to vector<8x128xf32>
    %401 = math.tanh %400 : vector<8x128xf32>
    %402 = vector.extract_strided_slice %387 {offsets = [0, 384], sizes = [8, 128], strides = [1, 1]} : vector<8x512xf32> to vector<8x128xf32>
    %403 = arith.negf %402 : vector<8x128xf32>
    %404 = math.exp %403 : vector<8x128xf32>
    %cst_92 = arith.constant 1.000000e+00 : f32
    %405 = vector.broadcast %cst_92 : f32 to vector<8x128xf32>
    %406 = arith.addf %405, %404 : vector<8x128xf32>
    %407 = arith.divf %405, %406 : vector<8x128xf32>
    %408 = arith.mulf %399, %343 : vector<8x128xf32>
    %409 = arith.mulf %393, %401 : vector<8x128xf32>
    %410 = arith.addf %408, %409 : vector<8x128xf32>
    %411 = math.tanh %410 : vector<8x128xf32>
    %412 = arith.mulf %407, %411 : vector<8x128xf32>
    %413 = tpu.concatenate %77, %144, %211, %278, %345, %412 in 0 : vector<8x128xf32>, vector<8x128xf32>, vector<8x128xf32>, vector<8x128xf32>, vector<8x128xf32>, vector<8x128xf32> -> vector<48x128xf32>
    %414 = arith.truncf %413 : vector<48x128xf32> to vector<48x128xbf16>
    %c0_93 = arith.constant 0 : index
    %c0_94 = arith.constant 0 : index
    %415 = vector.load %arg5[%c0_93, %c0_94] : memref<128x256xbf16, #tpu.memory_space<vmem>>, vector<128x256xbf16>
    %cst_95 = arith.constant dense<0.000000e+00> : vector<48x256xf32>
    %416 = tpu.matmul %414, %415, %cst_95 {dimension_numbers = #tpu.dot_dimension_numbers<[1], [0], [0], [1], [0, 0, 1, 1], [], []>} : vector<48x128xbf16>, vector<128x256xbf16>, vector<48x256xf32> -> vector<48x256xf32>
    %c0_96 = arith.constant 0 : index
    %c0_97 = arith.constant 0 : index
    %417 = vector.load %arg6[%c0_96, %c0_97] : memref<1x256xf32, #tpu.memory_space<vmem>>, vector<1x256xf32>
    %418 = vector.broadcast %417 : vector<1x256xf32> to vector<48x256xf32>
    %419 = arith.addf %416, %418 : vector<48x256xf32>
    %cst_98 = arith.constant dense<0xFF800000> : vector<48xf32>
    %420 = vector.multi_reduction <maximumf>, %419, %cst_98 [1] : vector<48x256xf32> to vector<48xf32>
    %421 = vector.shape_cast %420 : vector<48xf32> to vector<48x1xf32>
    %422 = vector.broadcast %421 : vector<48x1xf32> to vector<48x256xf32>
    %423 = arith.subf %419, %422 : vector<48x256xf32>
    %424 = math.exp %423 : vector<48x256xf32>
    %cst_99 = arith.constant dense<0.000000e+00> : vector<48xf32>
    %425 = vector.multi_reduction <add>, %424, %cst_99 [1] : vector<48x256xf32> to vector<48xf32>
    %426 = vector.shape_cast %425 : vector<48xf32> to vector<48x1xf32>
    %427 = math.log %426 : vector<48x1xf32>
    %428 = vector.broadcast %427 : vector<48x1xf32> to vector<48x256xf32>
    %429 = arith.subf %423, %428 : vector<48x256xf32>
    %430 = vector.extract_strided_slice %429 {offsets = [0, 0], sizes = [8, 256], strides = [1, 1]} : vector<48x256xf32> to vector<8x256xf32>
    %c0_100 = arith.constant 0 : index
    %c0_101 = arith.constant 0 : index
    %c0_102 = arith.constant 0 : index
    %431 = vector.load %arg7[%c0_100, %c0_101, %c0_102] : memref<6x8x256xf32, #tpu.memory_space<vmem>>, vector<1x8x256xf32>
    %432 = vector.shape_cast %431 : vector<1x8x256xf32> to vector<8x256xf32>
    %433 = vector.shape_cast %430 : vector<8x256xf32> to vector<1x8x256xf32>
    tpu.vector_store %arg7[%c0_100, %c0_101, %c0_102], %433 {strides = array<i32>} : memref<6x8x256xf32, #tpu.memory_space<vmem>>, vector<1x8x256xf32>,
    %434 = vector.extract_strided_slice %429 {offsets = [8, 0], sizes = [8, 256], strides = [1, 1]} : vector<48x256xf32> to vector<8x256xf32>
    %c1_103 = arith.constant 1 : index
    %c0_104 = arith.constant 0 : index
    %c0_105 = arith.constant 0 : index
    %435 = vector.load %arg7[%c1_103, %c0_104, %c0_105] : memref<6x8x256xf32, #tpu.memory_space<vmem>>, vector<1x8x256xf32>
    %436 = vector.shape_cast %435 : vector<1x8x256xf32> to vector<8x256xf32>
    %437 = vector.shape_cast %434 : vector<8x256xf32> to vector<1x8x256xf32>
    tpu.vector_store %arg7[%c1_103, %c0_104, %c0_105], %437 {strides = array<i32>} : memref<6x8x256xf32, #tpu.memory_space<vmem>>, vector<1x8x256xf32>,
    %438 = vector.extract_strided_slice %429 {offsets = [16, 0], sizes = [8, 256], strides = [1, 1]} : vector<48x256xf32> to vector<8x256xf32>
    %c2_106 = arith.constant 2 : index
    %c0_107 = arith.constant 0 : index
    %c0_108 = arith.constant 0 : index
    %439 = vector.load %arg7[%c2_106, %c0_107, %c0_108] : memref<6x8x256xf32, #tpu.memory_space<vmem>>, vector<1x8x256xf32>
    %440 = vector.shape_cast %439 : vector<1x8x256xf32> to vector<8x256xf32>
    %441 = vector.shape_cast %438 : vector<8x256xf32> to vector<1x8x256xf32>
    tpu.vector_store %arg7[%c2_106, %c0_107, %c0_108], %441 {strides = array<i32>} : memref<6x8x256xf32, #tpu.memory_space<vmem>>, vector<1x8x256xf32>,
    %442 = vector.extract_strided_slice %429 {offsets = [24, 0], sizes = [8, 256], strides = [1, 1]} : vector<48x256xf32> to vector<8x256xf32>
    %c3_109 = arith.constant 3 : index
    %c0_110 = arith.constant 0 : index
    %c0_111 = arith.constant 0 : index
    %443 = vector.load %arg7[%c3_109, %c0_110, %c0_111] : memref<6x8x256xf32, #tpu.memory_space<vmem>>, vector<1x8x256xf32>
    %444 = vector.shape_cast %443 : vector<1x8x256xf32> to vector<8x256xf32>
    %445 = vector.shape_cast %442 : vector<8x256xf32> to vector<1x8x256xf32>
    tpu.vector_store %arg7[%c3_109, %c0_110, %c0_111], %445 {strides = array<i32>} : memref<6x8x256xf32, #tpu.memory_space<vmem>>, vector<1x8x256xf32>,
    %446 = vector.extract_strided_slice %429 {offsets = [32, 0], sizes = [8, 256], strides = [1, 1]} : vector<48x256xf32> to vector<8x256xf32>
    %c4_112 = arith.constant 4 : index
    %c0_113 = arith.constant 0 : index
    %c0_114 = arith.constant 0 : index
    %447 = vector.load %arg7[%c4_112, %c0_113, %c0_114] : memref<6x8x256xf32, #tpu.memory_space<vmem>>, vector<1x8x256xf32>
    %448 = vector.shape_cast %447 : vector<1x8x256xf32> to vector<8x256xf32>
    %449 = vector.shape_cast %446 : vector<8x256xf32> to vector<1x8x256xf32>
    tpu.vector_store %arg7[%c4_112, %c0_113, %c0_114], %449 {strides = array<i32>} : memref<6x8x256xf32, #tpu.memory_space<vmem>>, vector<1x8x256xf32>,
    %450 = vector.extract_strided_slice %429 {offsets = [40, 0], sizes = [8, 256], strides = [1, 1]} : vector<48x256xf32> to vector<8x256xf32>
    %c5_115 = arith.constant 5 : index
    %c0_116 = arith.constant 0 : index
    %c0_117 = arith.constant 0 : index
    %451 = vector.load %arg7[%c5_115, %c0_116, %c0_117] : memref<6x8x256xf32, #tpu.memory_space<vmem>>, vector<1x8x256xf32>
    %452 = vector.shape_cast %451 : vector<1x8x256xf32> to vector<8x256xf32>
    %453 = vector.shape_cast %450 : vector<8x256xf32> to vector<1x8x256xf32>
    tpu.vector_store %arg7[%c5_115, %c0_116, %c0_117], %453 {strides = array<i32>} : memref<6x8x256xf32, #tpu.memory_space<vmem>>, vector<1x8x256xf32>,
    return
  }
}

</mosaic_0001>

<bundles_post_ra>
// kernel: dual_lstm_forward.1
= control target key start
LH: loop header
LB: loop body
LE: loop exit
PB: predicated region body
PF: predicated region fallthrough
CT: control target
= control target key end

     0   :  { %v9174_v1 = vmov 0   ;;  %s9166_s3 = inlined_call_operand.vmem [shape: bf16[384,512], index: 3, kind: input, shape index: {}]   ;;  %s9167_s0 = inlined_call_operand.vmem [shape: f32[6,8,128], index: 0, kind: input, shape index: {}]   ;;  %s9168_s4 = inlined_call_operand.vmem [shape: bf16[256,512], index: 4, kind: input, shape index: {}]   ;;  %s9169_s1 = inlined_call_operand.vmem [shape: f32[8,512], index: 1, kind: input, shape index: {}]   ;;  %s9170_s2 = inlined_call_operand.vmem [shape: f32[8,512], index: 2, kind: input, shape index: {}]   ;;  %s9171_s5 = inlined_call_operand.vmem [shape: bf16[128,256], index: 5, kind: input, shape index: {}]   ;;  %s9172_s6 = inlined_call_operand.vmem [shape: f32[1,256], index: 6, kind: input, shape index: {}]   ;;  %s9173_s7 = inlined_call_operand.vmem [shape: f32[6,8,256], index: 7, kind: output, shape index: {}]  }
   0x1   :  { %v4410_v0 = vld [vmem:[%s9166_s3 + $0xe4] ss:$16 sps:$4 sm:$0xff]   ;;  %389 = vmatprep.mubr.bf16.mxu1 %v9174_v1  ;;  %635 = vmatprep.mubr.bf16.mxu0 %v9174_v1  ;;  %v4414_v3 = vld [vmem:[%s9166_s3 + $0xe0] ss:$16 sps:$4 sm:$0xff]   ;;  %v5432_v34 = vld [vmem:[%s9166_s3 + $0xec] ss:$16 sps:$4 sm:$0xff]  }
   0x2   :  { %v4412_v2 = vld [vmem:[%s9166_s3 + $0x1e4] ss:$16 sps:$4 sm:$0xff]   ;;  %357 = vmatprep.subr.bf16.mxu1 %v4410_v0  ;;  %v4415_v4 = vld [vmem:[%s9166_s3 + $0x1e0] ss:$16 sps:$4 sm:$0xff]   ;;  %v5440_v36 = vld [vmem:[%s9166_s3 + $0xe8] ss:$16 sps:$4 sm:$0xff]  }
   0x3   :  { %603 = vmatprep.subr.bf16.mxu0 %v4412_v2  ;;  %v4416_v5 = vld [vmem:[%s9166_s3 + $0xc4] ss:$16 sps:$4 sm:$0xff]   ;;  %358 = vmatpush1.bf16.msra.mxu1 %v4414_v3  ;;  %v4420_v7 = vld [vmem:[%s9166_s3 + $0xc0] ss:$16 sps:$4 sm:$0xff]   ;;  %v5451_v39 = vld [vmem:[%s9166_s3 + $0xcc] ss:$16 sps:$4 sm:$0xff]  }
   0x4   :  { %604 = vmatpush1.bf16.msra.mxu0 %v4415_v4  ;;  %v4418_v6 = vld [vmem:[%s9166_s3 + $0x1c4] ss:$16 sps:$4 sm:$0xff]   ;;  %359 = vmatprep.subr.bf16.mxu1 %v4416_v5  ;;  %v4421_v8 = vld [vmem:[%s9166_s3 + $0x1c0] ss:$16 sps:$4 sm:$0xff]   ;;  %v5462_v41 = vld [vmem:[%s9166_s3 + $0xc8] ss:$16 sps:$4 sm:$0xff]  }
   0x5   :  { %605 = vmatprep.subr.bf16.mxu0 %v4418_v6  ;;  %v4422_v9 = vld [vmem:[%s9166_s3 + $0xa4] ss:$16 sps:$4 sm:$0xff]   ;;  %v4426_v11 = vld [vmem:[%s9166_s3 + $0xa0] ss:$16 sps:$4 sm:$0xff]   ;;  %v5472_v43 = vld [vmem:[%s9166_s3 + $0xac] ss:$16 sps:$4 sm:$0xff]  }
   0x6   :  { %v4424_v10 = vld [vmem:[%s9166_s3 + $0x1a4] ss:$16 sps:$4 sm:$0xff]   ;;  %v4427_v12 = vld [vmem:[%s9166_s3 + $0x1a0] ss:$16 sps:$4 sm:$0xff]   ;;  %v5482_v45 = vld [vmem:[%s9166_s3 + $0xa8] ss:$16 sps:$4 sm:$0xff]  }
   0x7   :  { %360 = vmatpush1.bf16.msra.mxu1 %v4420_v7  ;;  %v4428_v13 = vld [vmem:[%s9166_s3 + $0x84] ss:$16 sps:$4 sm:$0xff]   ;;  %v4432_v15 = vld [vmem:[%s9166_s3 + $0x80] ss:$16 sps:$4 sm:$0xff]   ;;  %v5491_v47 = vld [vmem:[%s9166_s3 + $0x8c] ss:$16 sps:$4 sm:$0xff]  }
   0x8   :  { %606 = vmatpush1.bf16.msra.mxu0 %v4421_v8  ;;  %361 = vmatprep.subr.bf16.mxu1 %v4422_v9  ;;  %v4430_v14 = vld [vmem:[%s9166_s3 + $0x184] ss:$16 sps:$4 sm:$0xff]   ;;  %v4433_v16 = vld [vmem:[%s9166_s3 + $0x180] ss:$16 sps:$4 sm:$0xff]   ;;  %v5500_v49 = vld [vmem:[%s9166_s3 + $0x88] ss:$16 sps:$4 sm:$0xff]  }
   0x9   :  { %607 = vmatprep.subr.bf16.mxu0 %v4424_v10  ;;  %v4434_v17 = vld [vmem:[%s9166_s3 + $0x64] ss:$16 sps:$4 sm:$0xff]   ;;  %v4438_v19 = vld [vmem:[%s9166_s3 + $0x60] ss:$16 sps:$4 sm:$0xff]   ;;  %v5510_v51 = vld [vmem:[%s9166_s3 + $0x6c] ss:$16 sps:$4 sm:$0xff]  }
   0xa   :  { %v4436_v18 = vld [vmem:[%s9166_s3 + $0x164] ss:$16 sps:$4 sm:$0xff]   ;;  %v4439_v20 = vld [vmem:[%s9166_s3 + $0x160] ss:$16 sps:$4 sm:$0xff]   ;;  %v5518_v53 = vld [vmem:[%s9166_s3 + $0x68] ss:$16 sps:$4 sm:$0xff]  }
   0xb   :  { %362 = vmatpush1.bf16.msra.mxu1 %v4426_v11  ;;  %v4440_v21 = vld [vmem:[%s9166_s3 + $0x44] ss:$16 sps:$4 sm:$0xff]   ;;  %v4444_v23 = vld [vmem:[%s9166_s3 + $0x40] ss:$16 sps:$4 sm:$0xff]   ;;  %v5528_v55 = vld [vmem:[%s9166_s3 + $0x4c] ss:$16 sps:$4 sm:$0xff]  }
   0xc   :  { %608 = vmatpush1.bf16.msra.mxu0 %v4427_v12  ;;  %363 = vmatprep.subr.bf16.mxu1 %v4428_v13  ;;  %v4442_v22 = vld [vmem:[%s9166_s3 + $0x144] ss:$16 sps:$4 sm:$0xff]   ;;  %v4445_v24 = vld [vmem:[%s9166_s3 + $0x140] ss:$16 sps:$4 sm:$0xff]   ;;  %v5536_v57 = vld [vmem:[%s9166_s3 + $0x48] ss:$16 sps:$4 sm:$0xff]  }
   0xd   :  { %609 = vmatprep.subr.bf16.mxu0 %v4430_v14  ;;  %v4446_v25 = vld [vmem:[%s9166_s3 + $0x24] ss:$16 sps:$4 sm:$0xff]   ;;  %v4450_v27 = vld [vmem:[%s9166_s3 + $0x20] ss:$16 sps:$4 sm:$0xff]   ;;  %v5546_v59 = vld [vmem:[%s9166_s3 + $0x2c] ss:$16 sps:$4 sm:$0xff]  }
   0xe   :  { %v4448_v26 = vld [vmem:[%s9166_s3 + $0x124] ss:$16 sps:$4 sm:$0xff]   ;;  %v4451_v28 = vld [vmem:[%s9166_s3 + $0x120] ss:$16 sps:$4 sm:$0xff]   ;;  %v5554_v61 = vld [vmem:[%s9166_s3 + $0x28] ss:$16 sps:$4 sm:$0xff]  }
   0xf   :  { %364 = vmatpush1.bf16.msra.mxu1 %v4432_v15  ;;  %v4452_v29 = vld [vmem:[%s9166_s3 + $0x4] ss:$16 sps:$4 sm:$0xff]   ;;  %v5421_v31 = vld [vmem:[%s9166_s3] ss:$16 sps:$4 sm:$0xff]   ;;  %v5564_v63 = vld [vmem:[%s9166_s3 + $0xc] ss:$16 sps:$4 sm:$0xff]  }
  0x10   :  { %610 = vmatpush1.bf16.msra.mxu0 %v4433_v16  ;;  %365 = vmatprep.subr.bf16.mxu1 %v4434_v17  ;;  %v4454_v30 = vld [vmem:[%s9166_s3 + $0x104] ss:$16 sps:$4 sm:$0xff]   ;;  %v4457_v32 = vld [vmem:[%s9166_s3 + $0x100] ss:$16 sps:$4 sm:$0xff]   ;;  %v5572_v2 = vld [vmem:[%s9166_s3 + $0x8] ss:$16 sps:$4 sm:$0xff]  }
  0x11   :  { %611 = vmatprep.subr.bf16.mxu0 %v4436_v18  ;;  %v195_v33 = vld [vmem:[%s9167_s0] sm:$0xff]  ;;  %v5582_v4 = vld [vmem:[%s9166_s3 + $0x1ec] ss:$16 sps:$4 sm:$0xff]   ;;  %v5588_v5 = vld [vmem:[%s9166_s3 + $0x1e8] ss:$16 sps:$4 sm:$0xff]  }
  0x12   :  { %v4460_v35 = vld [vmem:[%s9166_s3 + $0x2e4] ss:$16 sps:$4 sm:$0xff]   ;;  %v5442_v37 = vpack.c.bf16 %v195_v33, %v195_v33  ;;  %v4463_v38 = vld [vmem:[%s9166_s3 + $0x2e0] ss:$16 sps:$4 sm:$0xff]   ;;  %v5594_v6 = vld [vmem:[%s9166_s3 + $0x1cc] ss:$16 sps:$4 sm:$0xff]  }
  0x13   :  { %366 = vmatpush1.bf16.msra.mxu1 %v4438_v19  ;;  %v4466_v40 = vld [vmem:[%s9166_s3 + $0x2c4] ss:$16 sps:$4 sm:$0xff]   ;;  %v4469_v42 = vld [vmem:[%s9166_s3 + $0x2c0] ss:$16 sps:$4 sm:$0xff]   ;;  %v5602_v7 = vld [vmem:[%s9166_s3 + $0x1c8] ss:$16 sps:$4 sm:$0xff]  }
  0x14   :  { %612 = vmatpush1.bf16.msra.mxu0 %v4439_v20  ;;  %367 = vmatprep.subr.bf16.mxu1 %v4440_v21  ;;  %v4472_v44 = vld [vmem:[%s9166_s3 + $0x2a4] ss:$16 sps:$4 sm:$0xff]   ;;  %v4475_v46 = vld [vmem:[%s9166_s3 + $0x2a0] ss:$16 sps:$4 sm:$0xff]   ;;  %v5609_v8 = vld [vmem:[%s9166_s3 + $0x1ac] ss:$16 sps:$4 sm:$0xff]  }
  0x15   :  { %613 = vmatprep.subr.bf16.mxu0 %v4442_v22  ;;  %v4478_v48 = vld [vmem:[%s9166_s3 + $0x284] ss:$16 sps:$4 sm:$0xff]   ;;  %v4481_v50 = vld [vmem:[%s9166_s3 + $0x280] ss:$16 sps:$4 sm:$0xff]   ;;  %v5616_v9 = vld [vmem:[%s9166_s3 + $0x1a8] ss:$16 sps:$4 sm:$0xff]  }
  0x16   :  { %v4484_v52 = vld [vmem:[%s9166_s3 + $0x264] ss:$16 sps:$4 sm:$0xff]   ;;  %v4487_v54 = vld [vmem:[%s9166_s3 + $0x260] ss:$16 sps:$4 sm:$0xff]   ;;  %v5622_v10 = vld [vmem:[%s9166_s3 + $0x18c] ss:$16 sps:$4 sm:$0xff]  }
  0x17   :  { %368 = vmatpush1.bf16.msra.mxu1 %v4444_v23  ;;  %v4490_v56 = vld [vmem:[%s9166_s3 + $0x244] ss:$16 sps:$4 sm:$0xff]   ;;  %v4493_v58 = vld [vmem:[%s9166_s3 + $0x240] ss:$16 sps:$4 sm:$0xff]   ;;  %v5628_v11 = vld [vmem:[%s9166_s3 + $0x188] ss:$16 sps:$4 sm:$0xff]  }
  0x18   :  { %614 = vmatpush1.bf16.msra.mxu0 %v4445_v24  ;;  %369 = vmatprep.subr.bf16.mxu1 %v4446_v25  ;;  %v4496_v60 = vld [vmem:[%s9166_s3 + $0x224] ss:$16 sps:$4 sm:$0xff]   ;;  %v4499_v62 = vld [vmem:[%s9166_s3 + $0x220] ss:$16 sps:$4 sm:$0xff]   ;;  %v5634_v12 = vld [vmem:[%s9166_s3 + $0x16c] ss:$16 sps:$4 sm:$0xff]  }
  0x19   :  { %615 = vmatprep.subr.bf16.mxu0 %v4448_v26  ;;  %v4502_v0 = vld [vmem:[%s9166_s3 + $0x204] ss:$16 sps:$4 sm:$0xff]   ;;  %v4505_v3 = vld [vmem:[%s9166_s3 + $0x200] ss:$16 sps:$4 sm:$0xff]   ;;  %v5640_v13 = vld [vmem:[%s9166_s3 + $0x168] ss:$16 sps:$4 sm:$0xff]  }
  0x1a   :  { %v5646_v14 = vld [vmem:[%s9166_s3 + $0x14c] ss:$16 sps:$4 sm:$0xff]   ;;  %v5652_v15 = vld [vmem:[%s9166_s3 + $0x148] ss:$16 sps:$4 sm:$0xff]  }
  0x1b   :  { %370 = vmatpush1.bf16.msra.mxu1 %v4450_v27  ;;  %v5658_v16 = vld [vmem:[%s9166_s3 + $0x12c] ss:$16 sps:$4 sm:$0xff]   ;;  %v5664_v17 = vld [vmem:[%s9166_s3 + $0x128] ss:$16 sps:$4 sm:$0xff]  }
  0x1c   :  { %616 = vmatpush1.bf16.msra.mxu0 %v4451_v28  ;;  %371 = vmatprep.subr.bf16.mxu1 %v4452_v29  ;;  %v5670_v18 = vld [vmem:[%s9166_s3 + $0x10c] ss:$16 sps:$4 sm:$0xff]   ;;  %v5676_v19 = vld [vmem:[%s9166_s3 + $0x108] ss:$16 sps:$4 sm:$0xff]  }
  0x1d   :  { %617 = vmatprep.subr.bf16.mxu0 %v4454_v30  ;;  %v5682_v20 = vld [vmem:[%s9166_s3 + $0x2ec] ss:$16 sps:$4 sm:$0xff]   ;;  %v5688_v21 = vld [vmem:[%s9166_s3 + $0x2e8] ss:$16 sps:$4 sm:$0xff]  }
  0x1e   :  { %v5694_v22 = vld [vmem:[%s9166_s3 + $0x2cc] ss:$16 sps:$4 sm:$0xff]   ;;  %v5701_v23 = vld [vmem:[%s9166_s3 + $0x2c8] ss:$16 sps:$4 sm:$0xff]  }
  0x1f   :  { %372 = vmatpush1.bf16.msra.mxu1 %v5421_v31  ;;  %v5708_v24 = vld [vmem:[%s9166_s3 + $0x2ac] ss:$16 sps:$4 sm:$0xff]   ;;  %v5714_v25 = vld [vmem:[%s9166_s3 + $0x2a8] ss:$16 sps:$4 sm:$0xff]  }
  0x20   :  { %618 = vmatpush1.bf16.msra.mxu0 %v4457_v32  ;;  %398 = vmatprep.subr.bf16.mxu1 %v5432_v34  ;;  %v5720_v26 = vld [vmem:[%s9166_s3 + $0x28c] ss:$16 sps:$4 sm:$0xff]   ;;  %v5726_v27 = vld [vmem:[%s9166_s3 + $0x288] ss:$16 sps:$4 sm:$0xff]  }
  0x21   :  { %849 = vmatprep.subr.bf16.mxu0 %v4460_v35  ;;  %v5732_v28 = vld [vmem:[%s9166_s3 + $0x26c] ss:$16 sps:$4 sm:$0xff]   ;;  %v5738_v29 = vld [vmem:[%s9166_s3 + $0x268] ss:$16 sps:$4 sm:$0xff]  }
  0x22   :  { %390 = vmatmul.mubr.bf16.vlgmr.msra.gmra.mxu1 %v9174_v1  ;;  %9433 = vst [vmem:[#allocation2_spill] sm:$0xff] %v5732_v28  ;;  %9434 = vst [vmem:[#allocation3_spill] sm:$0xff] %v5738_v29  ;;  %v5744_v30 = vld [vmem:[%s9166_s3 + $0x24c] ss:$16 sps:$4 sm:$0xff]   ;;  %v5750_v32 = vld [vmem:[%s9166_s3 + $0x248] ss:$16 sps:$4 sm:$0xff]  }
  0x23   :  { %636 = vmatmul.mubr.bf16.vlgmr.msra.gmra.mxu0 %v5442_v37  ;;  %399 = vmatpush1.bf16.msra.mxu1 %v5440_v36  ;;  %9435 = vst [vmem:[#allocation4_spill] sm:$0xff] %v5744_v30  ;;  %9436 = vst [vmem:[#allocation5_spill] sm:$0xff] %v5750_v32  ;;  %v5756_v33 = vld [vmem:[%s9166_s3 + $0x22c] ss:$16 sps:$4 sm:$0xff]   ;;  %v5762_v35 = vld [vmem:[%s9166_s3 + $0x228] ss:$16 sps:$4 sm:$0xff]  }
  0x24   :  { %850 = vmatpush1.bf16.msra.mxu0 %v4463_v38  ;;  %400 = vmatprep.subr.bf16.mxu1 %v5451_v39  ;;  %9437 = vst [vmem:[#allocation6_spill] sm:$0xff] %v5756_v33  ;;  %9438 = vst [vmem:[#allocation7_spill] sm:$0xff] %v5762_v35  ;;  %v5774_v38 = vld [vmem:[%s9166_s3 + $0x208] ss:$16 sps:$4 sm:$0xff]  }
  0x25   :  { %851 = vmatprep.subr.bf16.mxu0 %v4466_v40  ;;  %430 = vmatprep.mubr.bf16.mxu1 %v9174_v1  ;;  %9440 = vst [vmem:[#allocation9_spill] sm:$0xff] %v5774_v38  ;;  %v5783_v40 = vld [vmem:[%s9168_s4 + $0xe4] ss:$16 sps:$4 sm:$0xff]  }
  0x26   :  { %881 = vmatprep.mubr.bf16.mxu0 %v9174_v1  ;;  %9441 = vst [vmem:[#allocation10_spill] sm:$0xff] %v5783_v40 }
  0x27   :  { %401 = vmatpush1.bf16.msra.mxu1 %v5462_v41 }
  0x28   :  { %852 = vmatpush1.bf16.msra.mxu0 %v4469_v42  ;;  %402 = vmatprep.subr.bf16.mxu1 %v5472_v43  ;;  %v5788_v42 = vld [vmem:[%s9168_s4 + $0xec] ss:$16 sps:$4 sm:$0xff]  }
  0x29   :  { %853 = vmatprep.subr.bf16.mxu0 %v4472_v44  ;;  %9442 = vst [vmem:[#allocation11_spill] sm:$0xff] %v5788_v42  ;;  %v5794_v44 = vld [vmem:[%s9168_s4 + $0xe0] ss:$16 sps:$4 sm:$0xff]  }
  0x2a   :  { %9443 = vst [vmem:[#allocation12_spill] sm:$0xff] %v5794_v44 }
  0x2b   :  { %403 = vmatpush1.bf16.msra.mxu1 %v5482_v45 }
  0x2c   :  { %854 = vmatpush1.bf16.msra.mxu0 %v4475_v46  ;;  %404 = vmatprep.subr.bf16.mxu1 %v5491_v47  ;;  %v5799_v46 = vld [vmem:[%s9168_s4 + $0xe8] ss:$16 sps:$4 sm:$0xff]  }
  0x2d   :  { %855 = vmatprep.subr.bf16.mxu0 %v4478_v48  ;;  %9444 = vst [vmem:[#allocation13_spill] sm:$0xff] %v5799_v46  ;;  %v5807_v48 = vld [vmem:[%s9168_s4 + $0xc4] ss:$16 sps:$4 sm:$0xff]  }
  0x2e   :  { %9445 = vst [vmem:[#allocation14_spill] sm:$0xff] %v5807_v48 }
  0x2f   :  { %405 = vmatpush1.bf16.msra.mxu1 %v5500_v49 }
  0x30   :  { %856 = vmatpush1.bf16.msra.mxu0 %v4481_v50  ;;  %406 = vmatprep.subr.bf16.mxu1 %v5510_v51  ;;  %v5812_v50 = vld [vmem:[%s9168_s4 + $0xcc] ss:$16 sps:$4 sm:$0xff]  }
  0x31   :  { %857 = vmatprep.subr.bf16.mxu0 %v4484_v52  ;;  %9446 = vst [vmem:[#allocation15_spill] sm:$0xff] %v5812_v50  ;;  %v5817_v52 = vld [vmem:[%s9168_s4 + $0xc0] ss:$16 sps:$4 sm:$0xff]  }
  0x32   :  { %9447 = vst [vmem:[#allocation16_spill] sm:$0xff] %v5817_v52 }
  0x33   :  { %407 = vmatpush1.bf16.msra.mxu1 %v5518_v53 }
  0x34   :  { %858 = vmatpush1.bf16.msra.mxu0 %v4487_v54  ;;  %408 = vmatprep.subr.bf16.mxu1 %v5528_v55  ;;  %v5822_v54 = vld [vmem:[%s9168_s4 + $0xc8] ss:$16 sps:$4 sm:$0xff]  }
  0x35   :  { %859 = vmatprep.subr.bf16.mxu0 %v4490_v56  ;;  %9448 = vst [vmem:[#allocation17_spill] sm:$0xff] %v5822_v54  ;;  %v5831_v56 = vld [vmem:[%s9168_s4 + $0xa4] ss:$16 sps:$4 sm:$0xff]  }
  0x36   :  { %9449 = vst [vmem:[#allocation18_spill] sm:$0xff] %v5831_v56 }
  0x37   :  { %409 = vmatpush1.bf16.msra.mxu1 %v5536_v57 }
  0x38   :  { %860 = vmatpush1.bf16.msra.mxu0 %v4493_v58  ;;  %410 = vmatprep.subr.bf16.mxu1 %v5546_v59  ;;  %v5836_v58 = vld [vmem:[%s9168_s4 + $0xac] ss:$16 sps:$4 sm:$0xff]  }
  0x39   :  { %861 = vmatprep.subr.bf16.mxu0 %v4496_v60  ;;  %9450 = vst [vmem:[#allocation19_spill] sm:$0xff] %v5836_v58  ;;  %v5841_v60 = vld [vmem:[%s9168_s4 + $0xa0] ss:$16 sps:$4 sm:$0xff]  }
  0x3a   :  { %9451 = vst [vmem:[#allocation20_spill] sm:$0xff] %v5841_v60 }
  0x3b   :  { %411 = vmatpush1.bf16.msra.mxu1 %v5554_v61 }
  0x3c   :  { %862 = vmatpush1.bf16.msra.mxu0 %v4499_v62  ;;  %412 = vmatprep.subr.bf16.mxu1 %v5564_v63  ;;  %v5846_v62 = vld [vmem:[%s9168_s4 + $0xa8] ss:$16 sps:$4 sm:$0xff]  }
  0x3d   :  { %863 = vmatprep.subr.bf16.mxu0 %v4502_v0  ;;  %9452 = vst [vmem:[#allocation21_spill] sm:$0xff] %v5846_v62  ;;  %v5855_v0 = vld [vmem:[%s9168_s4 + $0x84] ss:$16 sps:$4 sm:$0xff]  }
  0x3e   :  { %9453 = vst [vmem:[#allocation22_spill] sm:$0xff] %v5855_v0 }
  0x3f   :  { %413 = vmatpush1.bf16.msra.mxu1 %v5572_v2 }
  0x40   :  { %864 = vmatpush1.bf16.msra.mxu0 %v4505_v3  ;;  %644 = vmatprep.subr.bf16.mxu1 %v5582_v4  ;;  %v5860_v3 = vld [vmem:[%s9168_s4 + $0x8c] ss:$16 sps:$4 sm:$0xff]  }
  0x41   :  { %1120 = vmatprep.subr.bf16.mxu0 %v5783_v40  ;;  %9454 = vst [vmem:[#allocation23_spill] sm:$0xff] %v5860_v3 }
  0x42   :  { %431 = vmatmul.mubr.bf16.vlgmr.msra.gmra.mxu1 %v9174_v1 }
  0x43   :  { %882 = vmatmul.mubr.bf16.vlgmr.msra.gmra.mxu0 %v9174_v1  ;;  %645 = vmatpush1.bf16.msra.mxu1 %v5588_v5 }
  0x44   :  { %676 = vmatprep.mubr.bf16.mxu1 %v9174_v1  ;;  %646 = vmatprep.subr.bf16.mxu1 %v5594_v6 }
  0x45   :  { %1152 = vmatprep.mubr.bf16.mxu0 %v9174_v1  ;;  %1121 = vmatpush1.bf16.msra.mxu0 %v5794_v44  ;;  %v5969_v44 = vld [vmem:[%s9168_s4] ss:$16 sps:$4 sm:$0xff]  }
  0x46   :  { %1122 = vmatprep.subr.bf16.mxu0 %v5807_v48  ;;  %9473 = vst [vmem:[#allocation42_spill] sm:$0xff] %v5969_v44 }
  0x47   :  { %647 = vmatpush1.bf16.msra.mxu1 %v5602_v7 }
  0x48   :  { %648 = vmatprep.subr.bf16.mxu1 %v5609_v8 }
  0x49   :  { %1123 = vmatpush1.bf16.msra.mxu0 %v5817_v52  ;;  %v5955_v52 = vld [vmem:[%s9168_s4 + $0xc] ss:$16 sps:$4 sm:$0xff]  }
  0x4a   :  { %1124 = vmatprep.subr.bf16.mxu0 %v5831_v56  ;;  %v5913_v56 = vld [vmem:[%s9168_s4 + $0x40] ss:$16 sps:$4 sm:$0xff]   ;;  %9471 = vst [vmem:[#allocation40_spill] sm:$0xff] %v5955_v52 }
  0x4b   :  { %649 = vmatpush1.bf16.msra.mxu1 %v5616_v9  ;;  %9463 = vst [vmem:[#allocation32_spill] sm:$0xff] %v5913_v56 }
  0x4c   :  { %650 = vmatprep.subr.bf16.mxu1 %v5622_v10 }
  0x4d   :  { %1125 = vmatpush1.bf16.msra.mxu0 %v5841_v60  ;;  %v5870_v60 = vld [vmem:[%s9168_s4 + $0x88] ss:$16 sps:$4 sm:$0xff]  }
  0x4e   :  { %9456 = vst [vmem:[#allocation25_spill] sm:$0xff] %v5870_v60  ;;  %1126 = vmatprep.subr.bf16.mxu0 %v5855_v0  ;;  %v5889_v0 = vld [vmem:[%s9168_s4 + $0x60] ss:$16 sps:$4 sm:$0xff]  }
  0x4f   :  { %651 = vmatpush1.bf16.msra.mxu1 %v5628_v11  ;;  %9459 = vst [vmem:[#allocation28_spill] sm:$0xff] %v5889_v0 }
  0x50   :  { %652 = vmatprep.subr.bf16.mxu1 %v5634_v12 }
  0x53   :  { %653 = vmatpush1.bf16.msra.mxu1 %v5640_v13 }
  0x54   :  { %654 = vmatprep.subr.bf16.mxu1 %v5646_v14 }
  0x57   :  { %655 = vmatpush1.bf16.msra.mxu1 %v5652_v15 }
  0x58   :  { %656 = vmatprep.subr.bf16.mxu1 %v5658_v16 }
  0x5b   :  { %657 = vmatpush1.bf16.msra.mxu1 %v5664_v17 }
  0x5c   :  { %658 = vmatprep.subr.bf16.mxu1 %v5670_v18 }
  0x5f   :  { %659 = vmatpush1.bf16.msra.mxu1 %v5676_v19 }
  0x60   :  { %890 = vmatprep.subr.bf16.mxu1 %v5682_v20 }
  0x62   :  { %677 = vmatmul.mubr.bf16.vlgmr.msra.gmra.mxu1 %v5442_v37  ;;  %v5768_v37 = vld [vmem:[%s9166_s3 + $0x20c] ss:$16 sps:$4 sm:$0xff]  }
  0x63   :  { %891 = vmatpush1.bf16.msra.mxu1 %v5688_v21  ;;  %922 = vmatprep.mubr.bf16.mxu1 %v9174_v1  ;;  %9439 = vst [vmem:[#allocation8_spill] sm:$0xff] %v5768_v37 }
  0x64   :  { %892 = vmatprep.subr.bf16.mxu1 %v5694_v22 }
  0x67   :  { %893 = vmatpush1.bf16.msra.mxu1 %v5701_v23 }
  0x68   :  { %894 = vmatprep.subr.bf16.mxu1 %v5708_v24 }
  0x6b   :  { %895 = vmatpush1.bf16.msra.mxu1 %v5714_v25 }
  0x6c   :  { %896 = vmatprep.subr.bf16.mxu1 %v5720_v26 }
  0x6f   :  { %897 = vmatpush1.bf16.msra.mxu1 %v5726_v27 }
  0x70   :  { %898 = vmatprep.subr.bf16.mxu1 %v5732_v28 }
  0x73   :  { %899 = vmatpush1.bf16.msra.mxu1 %v5738_v29 }
  0x74   :  { %900 = vmatprep.subr.bf16.mxu1 %v5744_v30 }
  0x77   :  { %901 = vmatpush1.bf16.msra.mxu1 %v5750_v32 }
  0x78   :  { %902 = vmatprep.subr.bf16.mxu1 %v5756_v33 }
  0x7b   :  { %903 = vmatpush1.bf16.msra.mxu1 %v5762_v35 }
  0x7c   :  { %904 = vmatprep.subr.bf16.mxu1 %v5768_v37 }
  0x7f   :  { %905 = vmatpush1.bf16.msra.mxu1 %v5774_v38 }
  0x80   :  { %1161 = vmatprep.subr.bf16.mxu1 %v5788_v42  ;;  %v5974_v42 = vld [vmem:[%s9168_s4 + $0x8] ss:$16 sps:$4 sm:$0xff]  }
  0x81   :  { %9474 = vst [vmem:[#allocation43_spill] sm:$0xff] %v5974_v42 }
  0x82   :  { %923 = vmatmul.mubr.bf16.vlgmr.msra.gmra.mxu1 %v9174_v1 }
  0x83   :  { %1193 = vmatprep.mubr.bf16.mxu1 %v9174_v1  ;;  %1162 = vmatpush1.bf16.msra.mxu1 %v5799_v46  ;;  %v5865_v1 = vld [vmem:[%s9168_s4 + $0x80] ss:$16 sps:$4 sm:$0xff]  }
  0x84   :  { %1163 = vmatprep.subr.bf16.mxu1 %v5812_v50  ;;  %9455 = vst [vmem:[#allocation24_spill] sm:$0xff] %v5865_v1  ;;  %1127 = vmatpush1.bf16.msra.mxu0 %v5865_v1  ;;  %v5894_v1 = vld [vmem:[%s9168_s4 + $0x68] ss:$16 sps:$4 sm:$0xff]  }
  0x85   :  { %9460 = vst [vmem:[#allocation29_spill] sm:$0xff] %v5894_v1  ;;  %v5960_v50 = vld [vmem:[%s9169_s1 + $0x8] sm:$0xff] }
  0x86   :  { %9472 = vst [vmem:[#allocation41_spill] sm:$0xff] %v5960_v50 }
  0x87   :  { %1164 = vmatpush1.bf16.msra.mxu1 %v5822_v54  ;;  %v5950_v54 = vld [vmem:[%s9168_s4 + $0x4] ss:$16 sps:$4 sm:$0xff]  }
  0x88   :  { %1165 = vmatprep.subr.bf16.mxu1 %v5836_v58  ;;  %v5884_v58 = vld [vmem:[%s9168_s4 + $0x6c] ss:$16 sps:$4 sm:$0xff]   ;;  %9470 = vst [vmem:[#allocation39_spill] sm:$0xff] %v5950_v54 }
  0x89   :  { %9458 = vst [vmem:[#allocation27_spill] sm:$0xff] %v5884_v58 }
  0x8b   :  { %1166 = vmatpush1.bf16.msra.mxu1 %v5846_v62  ;;  %v5879_v62 = vld [vmem:[%s9168_s4 + $0x64] ss:$16 sps:$4 sm:$0xff]  }
  0x8c   :  { %1167 = vmatprep.subr.bf16.mxu1 %v5860_v3  ;;  %9457 = vst [vmem:[#allocation26_spill] sm:$0xff] %v5879_v62  ;;  %1128 = vmatprep.subr.bf16.mxu0 %v5879_v62  ;;  %v5906_v3 = vld [vmem:[%s9168_s4 + $0x4c] ss:$16 sps:$4 sm:$0xff]   ;;  %v5918_v62 = vld [vmem:[%s9168_s4 + $0x48] ss:$16 sps:$4 sm:$0xff]  }
  0x8d   :  { %9462 = vst [vmem:[#allocation31_spill] sm:$0xff] %v5906_v3  ;;  %1129 = vmatpush1.bf16.msra.mxu0 %v5889_v0  ;;  %9464 = vst [vmem:[#allocation33_spill] sm:$0xff] %v5918_v62  ;;  %v5925_v0 = vld [vmem:[%s9168_s4 + $0x24] ss:$16 sps:$4 sm:$0xff]  }
  0x8e   :  { %9465 = vst [vmem:[#allocation34_spill] sm:$0xff] %v5925_v0 }
  0x8f   :  { %1168 = vmatpush1.bf16.msra.mxu1 %v5870_v60  ;;  %v5899_v60 = vld [vmem:[%s9168_s4 + $0x44] ss:$16 sps:$4 sm:$0xff]  }
  0x90   :  { %9461 = vst [vmem:[#allocation30_spill] sm:$0xff] %v5899_v60  ;;  %1169 = vmatprep.subr.bf16.mxu1 %v5884_v58  ;;  %1130 = vmatprep.subr.bf16.mxu0 %v5899_v60  ;;  %v5935_v58 = vld [vmem:[%s9169_s1] sm:$0xff] }
  0x91   :  { %9467 = vst [vmem:[#allocation36_spill] sm:$0xff] %v5935_v58  ;;  %v5940_v60 = vld [vmem:[%s9168_s4 + $0x20] ss:$16 sps:$4 sm:$0xff]   ;;  %1131 = vmatpush1.bf16.msra.mxu0 %v5913_v56 }
  0x92   :  { %9468 = vst [vmem:[#allocation37_spill] sm:$0xff] %v5940_v60  ;;  %1132 = vmatprep.subr.bf16.mxu0 %v5925_v0  ;;  %v5980_v0 = vld [vmem:[%s9168_s4 + $0x1e4] ss:$16 sps:$4 sm:$0xff]  }
  0x93   :  { %1170 = vmatpush1.bf16.msra.mxu1 %v5894_v1  ;;  %v5930_v1 = vld [vmem:[%s9168_s4 + $0x2c] ss:$16 sps:$4 sm:$0xff]   ;;  %9475 = vst [vmem:[#allocation44_spill] sm:$0xff] %v5980_v0 }
  0x94   :  { %1171 = vmatprep.subr.bf16.mxu1 %v5906_v3  ;;  %9466 = vst [vmem:[#allocation35_spill] sm:$0xff] %v5930_v1  ;;  %v5945_v3 = vld [vmem:[%s9168_s4 + $0x28] ss:$16 sps:$4 sm:$0xff]  }
  0x95   :  { %9469 = vst [vmem:[#allocation38_spill] sm:$0xff] %v5945_v3  ;;  %1133 = vmatpush1.bf16.msra.mxu0 %v5940_v60 }
  0x96   :  { %1134 = vmatprep.subr.bf16.mxu0 %v5950_v54 }
  0x97   :  { %1172 = vmatpush1.bf16.msra.mxu1 %v5918_v62 }
  0x98   :  { %1173 = vmatprep.subr.bf16.mxu1 %v5930_v1  ;;  %v5985_v1 = vld [vmem:[%s9168_s4 + $0x1ec] ss:$16 sps:$4 sm:$0xff]  }
  0x99   :  { %9476 = vst [vmem:[#allocation45_spill] sm:$0xff] %v5985_v1  ;;  %1135 = vmatpush1.bf16.msra.mxu0 %v5969_v44 }
  0x9a   :  { %1366 = vmatprep.subr.bf16.mxu0 %v5980_v0 }
  0x9b   :  { %1174 = vmatpush1.bf16.msra.mxu1 %v5945_v3 }
  0x9c   :  { %1175 = vmatprep.subr.bf16.mxu1 %v5955_v52 }
  0x9f   :  { %1176 = vmatpush1.bf16.msra.mxu1 %v5974_v42 }
  0xa0   :  { %1407 = vmatprep.subr.bf16.mxu1 %v5985_v1  ;;  %v5999_v1 = vld [vmem:[%s9169_s1 + $0x10] sm:$0xff] }
  0xa1   :  { %9477 = vst [vmem:[#allocation46_spill] sm:$0xff] %v5999_v1 }
  0xe2   :  { %v391_v48 = vpop.f32.mrf.mxu1 }
  0xe3   :  { %v637_v46 = vpop.f32.mrf.mxu0  ;;  %v439_v56 = vadd.f32 %v391_v48, %v5935_v58 }
  0xe4   :  { %v393_v62 = vpop.f32.mrf.mxu1 }
  0xe5   :  { %v639_v40 = vpop.f32.mrf.mxu0  ;;  %v440_v38 = vadd.f32 %v393_v62, %v5960_v50  ;;  %v685_v37 = vadd.f32 %v637_v46, %v439_v56 }
  0xe6   :  { %v395_v48 = vpop.f32.mrf.mxu1 }
  0xe7   :  { %v641_v58 = vpop.f32.mrf.mxu0  ;;  %v686_v35 = vadd.f32 %v639_v40, %v440_v38 }
  0xe8   :  { %v396_v33 = vpop.f32.mrf.mxu1 }
  0xe9   :  { %v642_v32 = vpop.f32.mrf.mxu0 }
 0x102   :  { %v432_v3 = vpop.f32.mrf.mxu1 }
 0x103   :  { %v883_v62 = vpop.f32.mrf.mxu0 }
 0x104   :  { %v434_v46 = vpop.f32.mrf.mxu1  ;;  %v931_v40 = vadd.f32 %v883_v62, %v685_v37 }
 0x105   :  { %v885_v56 = vpop.f32.mrf.mxu0 }
 0x106   :  { %v436_v50 = vpop.f32.mrf.mxu1  ;;  %v932_v32 = vadd.f32 %v885_v56, %v686_v35  ;;  %v4278_v42 = vmul.f32 -1.442695, %v931_v40  ;;  %v441_v35 = vadd.f32 %v432_v3, %v5999_v1 }
 0x107   :  { %v887_v54 = vpop.f32.mrf.mxu0 }
 0x108   :  { %v437_v52 = vpop.f32.mrf.mxu1  ;;  %v4279_v60 = vmul.f32 -1.442695, %v932_v32 }
 0x109   :  { %v888_v48 = vpop.f32.mrf.mxu0  ;;  %v6004_v52 = vld [vmem:[%s9169_s1 + $0x18] sm:$0xff] }
 0x10a   :  { %4674 = vpow2.f32 %v4279_v60  ;;  %v442_v54 = vadd.f32 %v434_v46, %v6004_v52 }
 0x10b   :  { %4676 = vpow2.f32 %v4278_v42 }
 0x117   :  { %v4675_v0 = vpop.eup %4674 }
 0x118   :  { %v4677_v50 = vpop.eup %4676  ;;  %v944_v37 = vadd.f32 1.0, %v4675_v0 }
 0x11a   :  { %4678 = vrcp.f32 %v944_v37 }
 0x122   :  { %v678_v58 = vpop.f32.mrf.mxu1 }
 0x123   :  { %v687_v60 = vadd.f32 %v678_v58, %v441_v35 }
 0x124   :  { %v680_v38 = vpop.f32.mrf.mxu1 }
 0x125   :  { %v688_v62 = vadd.f32 %v680_v38, %v442_v54  ;;  %v6031_v54 = vld [vmem:[%s9168_s4 + $0x1cc] ss:$16 sps:$4 sm:$0xff]  }
 0x126   :  { %v682_v33 = vpop.f32.mrf.mxu1 }
 0x127   :  { %v4679_v29 = vpop.eup %4678 }
 0x128   :  { %v683_v44 = vpop.f32.mrf.mxu1  ;;  %v954_v0 = vmul.f32 0.0, %v4679_v29  ;;  %v6019_v29 = vld [vmem:[%s9168_s4 + $0x1e8] ss:$16 sps:$4 sm:$0xff]  }
 0x129   :  { %v938_v44 = vadd.f32 1.0, %v4677_v50 }
 0x12b   :  { %4680 = vrcp.f32 %v938_v44  ;;  %v6026_v44 = vld [vmem:[%s9168_s4 + $0x1c4] ss:$16 sps:$4 sm:$0xff]  }
 0x138   :  { %v4681_v28 = vpop.eup %4680 }
 0x142   :  { %v924_v42 = vpop.f32.mrf.mxu1 }
 0x143   :  { %v933_v56 = vadd.f32 %v924_v42, %v687_v60  ;;  %v6040_v60 = vld [vmem:[%s9168_s4 + $0x1c0] ss:$16 sps:$4 sm:$0xff]   ;;  %v6045_v42 = vld [vmem:[%s9168_s4 + $0x1c8] ss:$16 sps:$4 sm:$0xff]  }
 0x144   :  { %v926_v48 = vpop.f32.mrf.mxu1 }
 0x145   :  { %4682 = vtanh.f32 %v933_v56  ;;  %v934_v33 = vadd.f32 %v926_v48, %v688_v62  ;;  %v6052_v62 = vld [vmem:[%s9168_s4 + $0x1a4] ss:$16 sps:$4 sm:$0xff]   ;;  %v6057_v56 = vld [vmem:[%s9168_s4 + $0x1ac] ss:$16 sps:$4 sm:$0xff]   ;;  %v9478_v48 = vmov 0  }
 0x146   :  { %v928_v32 = vpop.f32.mrf.mxu1 }
 0x147   :  { %v4280_v40 = vmul.f32 -1.442695, %v934_v33  ;;  %v6066_v33 = vld [vmem:[%s9168_s4 + $0x1a0] ss:$16 sps:$4 sm:$0xff]   ;;  %v6071_v32 = vld [vmem:[%s9168_s4 + $0x1a8] ss:$16 sps:$4 sm:$0xff]  }
 0x148   :  { %v929_v30 = vpop.f32.mrf.mxu1 }
 0x149   :  { %4684 = vpow2.f32 %v4280_v40  ;;  %v6014_v30 = vld [vmem:[%s9168_s4 + $0x1e0] ss:$16 sps:$4 sm:$0xff]   ;;  %v6078_v40 = vld [vmem:[%s9168_s4 + $0x184] ss:$16 sps:$4 sm:$0xff]  }
 0x152   :  { %v4683_v3 = vpop.eup %4682 }
 0x153   :  { %v955_v50 = vmul.f32 %v4683_v3, %v4681_v28  ;;  %v6083_v3 = vld [vmem:[%s9168_s4 + $0x18c] ss:$16 sps:$4 sm:$0xff]  }
 0x155   :  { %v6008_v1 = vadd.f32 %v955_v50, %v954_v0  ;;  %v6090_v0 = vld [vmem:[%s9168_s4 + $0x180] ss:$16 sps:$4 sm:$0xff]   ;;  %v6095_v50 = vld [vmem:[%s9168_s4 + $0x188] ss:$16 sps:$4 sm:$0xff]  }
 0x156   :  { %v4685_v46 = vpop.eup %4684  ;;  %9479 = vst [vmem:[#allocation47_spill] sm:$0xff] %v6095_v50 }
 0x157   :  { %v951_v58 = vadd.f32 1.0, %v4685_v46  ;;  %4686 = vtanh.f32 %v6008_v1  ;;  %v6102_v46 = vld [vmem:[%s9168_s4 + $0x164] ss:$16 sps:$4 sm:$0xff]  }
 0x158   :  { %9480 = vst [vmem:[#allocation48_spill] sm:$0xff] %v6102_v46 }
 0x159   :  { %4688 = vrcp.f32 %v951_v58  ;;  %v6107_v58 = vld [vmem:[%s9168_s4 + $0x16c] ss:$16 sps:$4 sm:$0xff]  }
 0x15a   :  { %9481 = vst [vmem:[#allocation49_spill] sm:$0xff] %v6107_v58 }
 0x164   :  { %v4687_v38 = vpop.eup %4686 }
 0x166   :  { %v4689_v35 = vpop.eup %4688 }
 0x167   :  { %v958_v37 = vmul.f32 %v4689_v35, %v4687_v38  ;;  %v6114_v38 = vld [vmem:[%s9168_s4 + $0x160] ss:$16 sps:$4 sm:$0xff]   ;;  %v6119_v35 = vld [vmem:[%s9168_s4 + $0x168] ss:$16 sps:$4 sm:$0xff]  }
 0x168   :  { %9482 = vst [vmem:[#allocation50_spill] sm:$0xff] %v6114_v38  ;;  %9483 = vst [vmem:[#allocation51_spill] sm:$0xff] %v6119_v35 }
 0x169   :  { %v6021_v28 = vpack.c.bf16 %v958_v37, %v958_v37  ;;  %v6126_v37 = vld [vmem:[%s9168_s4 + $0x144] ss:$16 sps:$4 sm:$0xff]  }
 0x16a   :  { %9484 = vst [vmem:[#allocation52_spill] sm:$0xff] %v6126_v37 }
 0x16b   :  { %1153 = vmatmul.mubr.bf16.vlgmr.msra.gmra.mxu0 %v6021_v28  ;;  %1194 = vmatmul.mubr.bf16.vlgmr.msra.gmra.mxu1 %v6021_v28 }
 0x16c   :  { %1367 = vmatpush1.bf16.msra.mxu0 %v6014_v30  ;;  %1408 = vmatpush1.bf16.msra.mxu1 %v6019_v29 }
 0x16d   :  { %1368 = vmatprep.subr.bf16.mxu0 %v6026_v44  ;;  %1409 = vmatprep.subr.bf16.mxu1 %v6031_v54 }
 0x16e   :  { %1398 = vmatprep.mubr.bf16.mxu0 %v9478_v48  ;;  %1439 = vmatprep.mubr.bf16.mxu1 %v9478_v48 }
 0x170   :  { %1369 = vmatpush1.bf16.msra.mxu0 %v6040_v60  ;;  %1410 = vmatpush1.bf16.msra.mxu1 %v6045_v42 }
 0x171   :  { %1370 = vmatprep.subr.bf16.mxu0 %v6052_v62  ;;  %1411 = vmatprep.subr.bf16.mxu1 %v6057_v56 }
 0x174   :  { %1371 = vmatpush1.bf16.msra.mxu0 %v6066_v33  ;;  %1412 = vmatpush1.bf16.msra.mxu1 %v6071_v32 }
 0x175   :  { %1372 = vmatprep.subr.bf16.mxu0 %v6078_v40  ;;  %1413 = vmatprep.subr.bf16.mxu1 %v6083_v3 }
 0x178   :  { %1373 = vmatpush1.bf16.msra.mxu0 %v6090_v0  ;;  %1414 = vmatpush1.bf16.msra.mxu1 %v6095_v50  ;;  %v6131_v50 = vld [vmem:[%s9168_s4 + $0x14c] ss:$16 sps:$4 sm:$0xff]  }
 0x179   :  { %1374 = vmatprep.subr.bf16.mxu0 %v6102_v46  ;;  %1415 = vmatprep.subr.bf16.mxu1 %v6107_v58  ;;  %9485 = vst [vmem:[#allocation53_spill] sm:$0xff] %v6131_v50  ;;  %v6138_v46 = vld [vmem:[%s9168_s4 + $0x140] ss:$16 sps:$4 sm:$0xff]   ;;  %v6143_v58 = vld [vmem:[%s9168_s4 + $0x148] ss:$16 sps:$4 sm:$0xff]  }
 0x17a   :  { %9486 = vst [vmem:[#allocation54_spill] sm:$0xff] %v6138_v46  ;;  %9487 = vst [vmem:[#allocation55_spill] sm:$0xff] %v6143_v58 }
 0x17c   :  { %1375 = vmatpush1.bf16.msra.mxu0 %v6114_v38  ;;  %1416 = vmatpush1.bf16.msra.mxu1 %v6119_v35  ;;  %v6150_v38 = vld [vmem:[%s9168_s4 + $0x124] ss:$16 sps:$4 sm:$0xff]   ;;  %v6155_v35 = vld [vmem:[%s9168_s4 + $0x12c] ss:$16 sps:$4 sm:$0xff]  }
 0x17d   :  { %1376 = vmatprep.subr.bf16.mxu0 %v6126_v37  ;;  %1417 = vmatprep.subr.bf16.mxu1 %v6131_v50  ;;  %9488 = vst [vmem:[#allocation56_spill] sm:$0xff] %v6150_v38  ;;  %9489 = vst [vmem:[#allocation57_spill] sm:$0xff] %v6155_v35  ;;  %v6162_v37 = vld [vmem:[%s9168_s4 + $0x120] ss:$16 sps:$4 sm:$0xff]   ;;  %v6167_v50 = vld [vmem:[%s9168_s4 + $0x128] ss:$16 sps:$4 sm:$0xff]  }
 0x17e   :  { %9490 = vst [vmem:[#allocation58_spill] sm:$0xff] %v6167_v50 }
 0x180   :  { %1377 = vmatpush1.bf16.msra.mxu0 %v6138_v46  ;;  %1418 = vmatpush1.bf16.msra.mxu1 %v6143_v58  ;;  %v6174_v46 = vld [vmem:[%s9168_s4 + $0x104] ss:$16 sps:$4 sm:$0xff]   ;;  %v6179_v58 = vld [vmem:[%s9168_s4 + $0x10c] ss:$16 sps:$4 sm:$0xff]  }
 0x181   :  { %1378 = vmatprep.subr.bf16.mxu0 %v6150_v38  ;;  %1419 = vmatprep.subr.bf16.mxu1 %v6155_v35  ;;  %9491 = vst [vmem:[#allocation59_spill] sm:$0xff] %v6179_v58  ;;  %v6186_v38 = vld [vmem:[%s9168_s4 + $0x100] ss:$16 sps:$4 sm:$0xff]   ;;  %v6191_v35 = vld [vmem:[%s9168_s4 + $0x108] ss:$16 sps:$4 sm:$0xff]  }
 0x182   :  { %9492 = vst [vmem:[#allocation60_spill] sm:$0xff] %v6191_v35 }
 0x184   :  { %1379 = vmatpush1.bf16.msra.mxu0 %v6162_v37  ;;  %1420 = vmatpush1.bf16.msra.mxu1 %v6167_v50  ;;  %v6200_v50 = vld [vmem:[%s9166_s3 + $0xe4] ss:$16 sps:$4 sm:$0xff]  }
 0x185   :  { %1380 = vmatprep.subr.bf16.mxu0 %v6174_v46  ;;  %1421 = vmatprep.subr.bf16.mxu1 %v6179_v58  ;;  %9493 = vst [vmem:[#allocation61_spill] sm:$0xff] %v6200_v50  ;;  %v6209_v58 = vld [vmem:[%s9166_s3 + $0xe0] ss:$16 sps:$4 sm:$0xff]  }
 0x186   :  { %9494 = vst [vmem:[#allocation62_spill] sm:$0xff] %v6209_v58 }
 0x188   :  { %1381 = vmatpush1.bf16.msra.mxu0 %v6186_v38  ;;  %1422 = vmatpush1.bf16.msra.mxu1 %v6191_v35  ;;  %v6216_v35 = vld [vmem:[%s9166_s3 + $0xc4] ss:$16 sps:$4 sm:$0xff]  }
 0x189   :  { %1480 = vmatprep.subr.bf16.mxu0 %v6200_v50  ;;  %1521 = vmatprep.subr.bf16.mxu1 %v5432_v34  ;;  %9495 = vst [vmem:[#allocation63_spill] sm:$0xff] %v6216_v35  ;;  %v6225_v34 = vld [vmem:[%s9166_s3 + $0xc0] ss:$16 sps:$4 sm:$0xff]   ;;  %v6330_v50 = vld [vmem:[%s9170_s2 + $0x18] sm:$0xff] }
 0x18a   :  { %9496 = vst [vmem:[#allocation64_spill] sm:$0xff] %v6225_v34  ;;  %9509 = vst [vmem:[#allocation77_spill] sm:$0xff] %v6330_v50 }
 0x18b   :  { %1399 = vmatmul.mubr.bf16.vlgmr.msra.gmra.mxu0 %v9478_v48  ;;  %1440 = vmatmul.mubr.bf16.vlgmr.msra.gmra.mxu1 %v9478_v48 }
 0x18c   :  { %1481 = vmatpush1.bf16.msra.mxu0 %v6209_v58  ;;  %1522 = vmatpush1.bf16.msra.mxu1 %v5440_v36  ;;  %v6232_v36 = vld [vmem:[%s9166_s3 + $0xa4] ss:$16 sps:$4 sm:$0xff]  }
 0x18d   :  { %1482 = vmatprep.subr.bf16.mxu0 %v6216_v35  ;;  %1523 = vmatprep.subr.bf16.mxu1 %v5451_v39  ;;  %9497 = vst [vmem:[#allocation65_spill] sm:$0xff] %v6232_v36  ;;  %v6239_v39 = vld [vmem:[%s9166_s3 + $0xa0] ss:$16 sps:$4 sm:$0xff]  }
 0x18e   :  { %1512 = vmatprep.mubr.bf16.mxu0 %v9478_v48  ;;  %1553 = vmatprep.mubr.bf16.mxu1 %v9478_v48  ;;  %9498 = vst [vmem:[#allocation66_spill] sm:$0xff] %v6239_v39 }
 0x190   :  { %1483 = vmatpush1.bf16.msra.mxu0 %v6225_v34  ;;  %1524 = vmatpush1.bf16.msra.mxu1 %v5462_v41  ;;  %v6246_v41 = vld [vmem:[%s9166_s3 + $0x84] ss:$16 sps:$4 sm:$0xff]  }
 0x191   :  { %1484 = vmatprep.subr.bf16.mxu0 %v6232_v36  ;;  %1525 = vmatprep.subr.bf16.mxu1 %v5472_v43  ;;  %9499 = vst [vmem:[#allocation67_spill] sm:$0xff] %v6246_v41  ;;  %v6253_v43 = vld [vmem:[%s9166_s3 + $0x80] ss:$16 sps:$4 sm:$0xff]  }
 0x192   :  { %9500 = vst [vmem:[#allocation68_spill] sm:$0xff] %v6253_v43 }
 0x194   :  { %1485 = vmatpush1.bf16.msra.mxu0 %v6239_v39  ;;  %1526 = vmatpush1.bf16.msra.mxu1 %v5482_v45  ;;  %v6260_v45 = vld [vmem:[%s9166_s3 + $0x64] ss:$16 sps:$4 sm:$0xff]  }
 0x195   :  { %1486 = vmatprep.subr.bf16.mxu0 %v6246_v41  ;;  %1527 = vmatprep.subr.bf16.mxu1 %v5491_v47  ;;  %9501 = vst [vmem:[#allocation69_spill] sm:$0xff] %v6260_v45  ;;  %v6267_v47 = vld [vmem:[%s9166_s3 + $0x60] ss:$16 sps:$4 sm:$0xff]  }
 0x196   :  { %9502 = vst [vmem:[#allocation70_spill] sm:$0xff] %v6267_v47 }
 0x198   :  { %1487 = vmatpush1.bf16.msra.mxu0 %v6253_v43  ;;  %1528 = vmatpush1.bf16.msra.mxu1 %v5500_v49  ;;  %v6274_v49 = vld [vmem:[%s9166_s3 + $0x44] ss:$16 sps:$4 sm:$0xff]  }
 0x199   :  { %1488 = vmatprep.subr.bf16.mxu0 %v6260_v45  ;;  %1529 = vmatprep.subr.bf16.mxu1 %v5510_v51  ;;  %9503 = vst [vmem:[#allocation71_spill] sm:$0xff] %v6274_v49  ;;  %v6281_v51 = vld [vmem:[%s9166_s3 + $0x40] ss:$16 sps:$4 sm:$0xff]  }
 0x19a   :  { %9504 = vst [vmem:[#allocation72_spill] sm:$0xff] %v6281_v51 }
 0x19c   :  { %1489 = vmatpush1.bf16.msra.mxu0 %v6267_v47  ;;  %1530 = vmatpush1.bf16.msra.mxu1 %v5518_v53  ;;  %v6288_v53 = vld [vmem:[%s9166_s3 + $0x24] ss:$16 sps:$4 sm:$0xff]  }
 0x19d   :  { %1490 = vmatprep.subr.bf16.mxu0 %v6274_v49  ;;  %1531 = vmatprep.subr.bf16.mxu1 %v5528_v55  ;;  %9505 = vst [vmem:[#allocation73_spill] sm:$0xff] %v6288_v53  ;;  %v6295_v55 = vld [vmem:[%s9166_s3 + $0x20] ss:$16 sps:$4 sm:$0xff]  }
 0x19e   :  { %9506 = vst [vmem:[#allocation74_spill] sm:$0xff] %v6295_v55 }
 0x1a0   :  { %1491 = vmatpush1.bf16.msra.mxu0 %v6281_v51  ;;  %1532 = vmatpush1.bf16.msra.mxu1 %v5536_v57  ;;  %v6302_v57 = vld [vmem:[%s9166_s3 + $0x4] ss:$16 sps:$4 sm:$0xff]  }
 0x1a1   :  { %1492 = vmatprep.subr.bf16.mxu0 %v6288_v53  ;;  %1533 = vmatprep.subr.bf16.mxu1 %v5546_v59  ;;  %9507 = vst [vmem:[#allocation75_spill] sm:$0xff] %v6302_v57  ;;  %v6311_v59 = vld [vmem:[%s9166_s3 + $0x1e4] ss:$16 sps:$4 sm:$0xff]  }
 0x1a2   :  { %9508 = vst [vmem:[#allocation76_spill] sm:$0xff] %v6311_v59 }
 0x1a4   :  { %1493 = vmatpush1.bf16.msra.mxu0 %v6295_v55  ;;  %1534 = vmatpush1.bf16.msra.mxu1 %v5554_v61 }
 0x1a5   :  { %1494 = vmatprep.subr.bf16.mxu0 %v6302_v57  ;;  %1535 = vmatprep.subr.bf16.mxu1 %v5564_v63 }
 0x1a8   :  { %1495 = vmatpush1.bf16.msra.mxu0 %v5421_v31  ;;  %1536 = vmatpush1.bf16.msra.mxu1 %v5572_v2  ;;  %v6318_v31 = vld [vmem:[%s9170_s2] sm:$0xff]  ;;  %v6323_v2 = vld [vmem:[%s9170_s2 + $0x8] sm:$0xff] }
 0x1a9   :  { %1566 = vmatprep.subr.bf16.mxu0 %v6311_v59  ;;  %1607 = vmatprep.subr.bf16.mxu1 %v5582_v4 }
 0x22b   :  { %v1154_v61 = vpop.f32.mrf.mxu0  ;;  %v1195_v55 = vpop.f32.mrf.mxu1 }
 0x22c   :  { %v1202_v4 = vadd.f32 %v1154_v61, %v6318_v31 }
 0x22d   :  { %v1156_v53 = vpop.f32.mrf.mxu0  ;;  %v1197_v51 = vpop.f32.mrf.mxu1 }
 0x22e   :  { %v1203_v43 = vadd.f32 %v1156_v53, %v6323_v2  ;;  %v1205_v61 = vadd.f32 %v1197_v51, %v6330_v50 }
 0x22f   :  { %v1158_v57 = vpop.f32.mrf.mxu0  ;;  %v1199_v49 = vpop.f32.mrf.mxu1 }
 0x231   :  { %v1159_v63 = vpop.f32.mrf.mxu0  ;;  %v1200_v47 = vpop.f32.mrf.mxu1 }
 0x24b   :  { %v1400_v59 = vpop.f32.mrf.mxu0  ;;  %v1441_v45 = vpop.f32.mrf.mxu1 }
 0x24c   :  { %v1448_v57 = vadd.f32 %v1400_v59, %v1202_v4  ;;  %v6336_v59 = vld [vmem:[%s9170_s2 + $0x10] sm:$0xff] }
 0x24d   :  { %v1402_v49 = vpop.f32.mrf.mxu0  ;;  %v1443_v63 = vpop.f32.mrf.mxu1 }
 0x24e   :  { %v4345_v47 = vmul.f32 -1.442695, %v1448_v57  ;;  %v1449_v41 = vadd.f32 %v1402_v49, %v1203_v43  ;;  %v1451_v53 = vadd.f32 %v1443_v63, %v1205_v61 }
 0x24f   :  { %v1404_v39 = vpop.f32.mrf.mxu0  ;;  %v1445_v36 = vpop.f32.mrf.mxu1 }
 0x250   :  { %4690 = vpow2.f32 %v4345_v47  ;;  %v4346_v34 = vmul.f32 -1.442695, %v1449_v41  ;;  %v1204_v36 = vadd.f32 %v1195_v55, %v6336_v59  ;;  %v4347_v39 = vmul.f32 -1.442695, %v1451_v53 }
 0x251   :  { %v1405_v35 = vpop.f32.mrf.mxu0  ;;  %v1446_v58 = vpop.f32.mrf.mxu1 }
 0x252   :  { %4692 = vpow2.f32 %v4346_v34  ;;  %v1450_v35 = vadd.f32 %v1441_v45, %v1204_v36 }
 0x253   :  { %4694 = vpow2.f32 %v4347_v39  ;;  %v6353_v39 = vld [vmem:[%s9166_s3 + $0x1e0] ss:$16 sps:$4 sm:$0xff]  }
 0x25d   :  { %v4691_v41 = vpop.eup %4690 }
 0x25e   :  { %v1455_v58 = vadd.f32 1.0, %v4691_v41  ;;  %v6360_v41 = vld [vmem:[%s9166_s3 + $0x1c4] ss:$16 sps:$4 sm:$0xff]  }
 0x25f   :  { %v4693_v43 = vpop.eup %4692 }
 0x260   :  { %4696 = vrcp.f32 %v1455_v58  ;;  %v1461_v4 = vadd.f32 1.0, %v4693_v43  ;;  %v4695_v34 = vpop.eup %4694  ;;  %v6449_v58 = vld [vmem:[%s9166_s3 + $0x104] ss:$16 sps:$4 sm:$0xff]   ;;  %v6456_v43 = vld [vmem:[%s9166_s3 + $0x100] ss:$16 sps:$4 sm:$0xff]  }
 0x261   :  { %4698 = vtanh.f32 %v1450_v35  ;;  %v1468_v63 = vadd.f32 1.0, %v4695_v34  ;;  %v6369_v35 = vld [vmem:[%s9166_s3 + $0x1c0] ss:$16 sps:$4 sm:$0xff]   ;;  %9511 = vst [vmem:[#allocation79_spill] sm:$0xff] %v6449_v58  ;;  %9512 = vst [vmem:[#allocation80_spill] sm:$0xff] %v6456_v43  ;;  %v9524_v34 = vld [vmem:[#allocation3_spill] sm:$0xff] }
 0x262   :  { %4700 = vrcp.f32 %v1461_v4  ;;  %v9522_v4 = vld [vmem:[#allocation2_spill] sm:$0xff] }
 0x263   :  { %4702 = vrcp.f32 %v1468_v63  ;;  %v6549_v63 = vld [vmem:[%s9166_s3 + $0x224] ss:$16 sps:$4 sm:$0xff]  }
 0x26d   :  { %v4697_v51 = vpop.eup %4696 }
 0x26e   :  { %v4699_v57 = vpop.eup %4698 }
 0x26f   :  { %v4701_v49 = vpop.eup %4700  ;;  %v1472_v61 = vmul.f32 %v4699_v57, %v4697_v51  ;;  %v9526_v51 = vld [vmem:[#allocation4_spill] sm:$0xff] }
 0x270   :  { %v1471_v47 = vmul.f32 0.0, %v4701_v49  ;;  %v4703_v45 = vpop.eup %4702  ;;  %v6542_v57 = vld [vmem:[%s9166_s3 + $0x240] ss:$16 sps:$4 sm:$0xff]   ;;  %v9528_v49 = vld [vmem:[#allocation5_spill] sm:$0xff] }
 0x271   :  { %9527 = vst [vmem:[#allocation4_spill] sm:$0xff] %v6542_v57  ;;  %9529 = vst [vmem:[#allocation5_spill] sm:$0xff] %v6549_v63 }
 0x272   :  { %v6339_v50 = vadd.f32 %v1472_v61, %v1471_v47  ;;  %v9530_v47 = vld [vmem:[#allocation6_spill] sm:$0xff] }
 0x273   :  { %v6556_v61 = vld [vmem:[%s9166_s3 + $0x220] ss:$16 sps:$4 sm:$0xff]  }
 0x274   :  { %4704 = vtanh.f32 %v6339_v50  ;;  %9531 = vst [vmem:[#allocation6_spill] sm:$0xff] %v6556_v61 }
 0x281   :  { %v4705_v55 = vpop.eup %4704 }
 0x282   :  { %v6342_v53 = vmul.f32 %v4705_v55, %v4703_v45  ;;  %v9532_v45 = vld [vmem:[#allocation7_spill] sm:$0xff]  ;;  %v6563_v55 = vld [vmem:[%s9166_s3 + $0x204] ss:$16 sps:$4 sm:$0xff]  }
 0x283   :  { %9533 = vst [vmem:[#allocation7_spill] sm:$0xff] %v6563_v55 }
 0x284   :  { %9510 = vst [vmem:[#allocation78_spill] sm:$0xff] %v6342_v53  ;;  %v6346_v36 = vpack.c.bf16 %v6342_v53, %v6342_v53  ;;  %v9546_v53 = vld [vmem:[#allocation19_spill] sm:$0xff] }
 0x286   :  { %1513 = vmatmul.mubr.bf16.vlgmr.msra.gmra.mxu0 %v6346_v36  ;;  %1554 = vmatmul.mubr.bf16.vlgmr.msra.gmra.mxu1 %v6346_v36 }
 0x287   :  { %1567 = vmatpush1.bf16.msra.mxu0 %v6353_v39  ;;  %1608 = vmatpush1.bf16.msra.mxu1 %v5588_v5  ;;  %v6376_v5 = vld [vmem:[%s9166_s3 + $0x1a4] ss:$16 sps:$4 sm:$0xff]  }
 0x288   :  { %1568 = vmatprep.subr.bf16.mxu0 %v6360_v41  ;;  %1609 = vmatprep.subr.bf16.mxu1 %v5594_v6  ;;  %v6383_v6 = vld [vmem:[%s9166_s3 + $0x1a0] ss:$16 sps:$4 sm:$0xff]  }
 0x289   :  { %1598 = vmatprep.mubr.bf16.mxu0 %v9478_v48  ;;  %1639 = vmatprep.mubr.bf16.mxu1 %v9478_v48 }
 0x28b   :  { %1569 = vmatpush1.bf16.msra.mxu0 %v6369_v35  ;;  %1610 = vmatpush1.bf16.msra.mxu1 %v5602_v7  ;;  %v6390_v7 = vld [vmem:[%s9166_s3 + $0x184] ss:$16 sps:$4 sm:$0xff]  }
 0x28c   :  { %1570 = vmatprep.subr.bf16.mxu0 %v6376_v5  ;;  %1611 = vmatprep.subr.bf16.mxu1 %v5609_v8  ;;  %v6397_v8 = vld [vmem:[%s9166_s3 + $0x180] ss:$16 sps:$4 sm:$0xff]  }
 0x28f   :  { %1571 = vmatpush1.bf16.msra.mxu0 %v6383_v6  ;;  %1612 = vmatpush1.bf16.msra.mxu1 %v5616_v9  ;;  %v6404_v9 = vld [vmem:[%s9166_s3 + $0x164] ss:$16 sps:$4 sm:$0xff]  }
 0x290   :  { %1572 = vmatprep.subr.bf16.mxu0 %v6390_v7  ;;  %1613 = vmatprep.subr.bf16.mxu1 %v5622_v10  ;;  %v6411_v10 = vld [vmem:[%s9166_s3 + $0x160] ss:$16 sps:$4 sm:$0xff]  }
 0x293   :  { %1573 = vmatpush1.bf16.msra.mxu0 %v6397_v8  ;;  %1614 = vmatpush1.bf16.msra.mxu1 %v5628_v11  ;;  %v6418_v11 = vld [vmem:[%s9166_s3 + $0x144] ss:$16 sps:$4 sm:$0xff]  }
 0x294   :  { %1574 = vmatprep.subr.bf16.mxu0 %v6404_v9  ;;  %1615 = vmatprep.subr.bf16.mxu1 %v5634_v12  ;;  %v6425_v12 = vld [vmem:[%s9166_s3 + $0x140] ss:$16 sps:$4 sm:$0xff]  }
 0x297   :  { %1575 = vmatpush1.bf16.msra.mxu0 %v6411_v10  ;;  %1616 = vmatpush1.bf16.msra.mxu1 %v5640_v13  ;;  %v6432_v13 = vld [vmem:[%s9166_s3 + $0x124] ss:$16 sps:$4 sm:$0xff]  }
 0x298   :  { %1576 = vmatprep.subr.bf16.mxu0 %v6418_v11  ;;  %1617 = vmatprep.subr.bf16.mxu1 %v5646_v14  ;;  %v6439_v14 = vld [vmem:[%s9166_s3 + $0x120] ss:$16 sps:$4 sm:$0xff]  }
 0x29b   :  { %1577 = vmatpush1.bf16.msra.mxu0 %v6425_v12  ;;  %1618 = vmatpush1.bf16.msra.mxu1 %v5652_v15  ;;  %v4348_v15 = vld [vmem:[%s9167_s0 + $0x8] sm:$0xff] }
 0x29c   :  { %1578 = vmatprep.subr.bf16.mxu0 %v6432_v13  ;;  %1619 = vmatprep.subr.bf16.mxu1 %v5658_v16  ;;  %v1478_v16 = vpack.c.bf16 %v4348_v15, %v4348_v15  ;;  %v9534_v15 = vld [vmem:[#allocation8_spill] sm:$0xff] }
 0x29f   :  { %1579 = vmatpush1.bf16.msra.mxu0 %v6439_v14  ;;  %1620 = vmatpush1.bf16.msra.mxu1 %v5664_v17  ;;  %v6463_v17 = vld [vmem:[%s9166_s3 + $0x2e4] ss:$16 sps:$4 sm:$0xff]  }
 0x2a0   :  { %1580 = vmatprep.subr.bf16.mxu0 %v6449_v58  ;;  %1621 = vmatprep.subr.bf16.mxu1 %v5670_v18  ;;  %9513 = vst [vmem:[#allocation81_spill] sm:$0xff] %v6463_v17  ;;  %v6470_v18 = vld [vmem:[%s9166_s3 + $0x2e0] ss:$16 sps:$4 sm:$0xff]  }
 0x2a1   :  { %9514 = vst [vmem:[#allocation82_spill] sm:$0xff] %v6470_v18 }
 0x2a3   :  { %1581 = vmatpush1.bf16.msra.mxu0 %v6456_v43  ;;  %1622 = vmatpush1.bf16.msra.mxu1 %v5676_v19  ;;  %v6477_v19 = vld [vmem:[%s9166_s3 + $0x2c4] ss:$16 sps:$4 sm:$0xff]  }
 0x2a4   :  { %1652 = vmatprep.subr.bf16.mxu0 %v6463_v17  ;;  %1693 = vmatprep.subr.bf16.mxu1 %v5682_v20  ;;  %9515 = vst [vmem:[#allocation83_spill] sm:$0xff] %v6477_v19  ;;  %v6486_v20 = vld [vmem:[%s9166_s3 + $0x2c0] ss:$16 sps:$4 sm:$0xff]  }
 0x2a5   :  { %9516 = vst [vmem:[#allocation84_spill] sm:$0xff] %v6486_v20 }
 0x2a6   :  { %1599 = vmatmul.mubr.bf16.vlgmr.msra.gmra.mxu0 %v1478_v16  ;;  %1640 = vmatmul.mubr.bf16.vlgmr.msra.gmra.mxu1 %v1478_v16  ;;  %v6570_v16 = vld [vmem:[%s9166_s3 + $0x200] ss:$16 sps:$4 sm:$0xff]  }
 0x2a7   :  { %1653 = vmatpush1.bf16.msra.mxu0 %v6470_v18  ;;  %1694 = vmatpush1.bf16.msra.mxu1 %v5688_v21  ;;  %v6493_v21 = vld [vmem:[%s9166_s3 + $0x2a4] ss:$16 sps:$4 sm:$0xff]   ;;  %9535 = vst [vmem:[#allocation8_spill] sm:$0xff] %v6570_v16 }
 0x2a8   :  { %1654 = vmatprep.subr.bf16.mxu0 %v6477_v19  ;;  %1695 = vmatprep.subr.bf16.mxu1 %v5694_v22  ;;  %9517 = vst [vmem:[#allocation85_spill] sm:$0xff] %v6493_v21  ;;  %v6500_v22 = vld [vmem:[%s9166_s3 + $0x2a0] ss:$16 sps:$4 sm:$0xff]  }
 0x2a9   :  { %1684 = vmatprep.mubr.bf16.mxu0 %v9478_v48  ;;  %1725 = vmatprep.mubr.bf16.mxu1 %v9478_v48  ;;  %9518 = vst [vmem:[#allocation86_spill] sm:$0xff] %v6500_v22 }
 0x2ab   :  { %1655 = vmatpush1.bf16.msra.mxu0 %v6486_v20  ;;  %1696 = vmatpush1.bf16.msra.mxu1 %v5701_v23  ;;  %v6507_v23 = vld [vmem:[%s9166_s3 + $0x284] ss:$16 sps:$4 sm:$0xff]  }
 0x2ac   :  { %1656 = vmatprep.subr.bf16.mxu0 %v6493_v21  ;;  %1697 = vmatprep.subr.bf16.mxu1 %v5708_v24  ;;  %9519 = vst [vmem:[#allocation87_spill] sm:$0xff] %v6507_v23  ;;  %v6514_v24 = vld [vmem:[%s9166_s3 + $0x280] ss:$16 sps:$4 sm:$0xff]  }
 0x2ad   :  { %9520 = vst [vmem:[#allocation88_spill] sm:$0xff] %v6514_v24 }
 0x2af   :  { %1657 = vmatpush1.bf16.msra.mxu0 %v6500_v22  ;;  %1698 = vmatpush1.bf16.msra.mxu1 %v5714_v25  ;;  %v6521_v25 = vld [vmem:[%s9166_s3 + $0x264] ss:$16 sps:$4 sm:$0xff]   ;;  %v9572_v22 = vld [vmem:[#allocation41_spill] sm:$0xff] }
 0x2b0   :  { %1658 = vmatprep.subr.bf16.mxu0 %v6507_v23  ;;  %1699 = vmatprep.subr.bf16.mxu1 %v5720_v26  ;;  %9521 = vst [vmem:[#allocation89_spill] sm:$0xff] %v6521_v25  ;;  %v6528_v26 = vld [vmem:[%s9166_s3 + $0x260] ss:$16 sps:$4 sm:$0xff]  }
 0x2b1   :  { %9523 = vst [vmem:[#allocation2_spill] sm:$0xff] %v6528_v26  ;;  %v9571_v23 = vld [vmem:[#allocation36_spill] sm:$0xff] }
 0x2b3   :  { %1659 = vmatpush1.bf16.msra.mxu0 %v6514_v24  ;;  %1700 = vmatpush1.bf16.msra.mxu1 %v5726_v27  ;;  %v6535_v27 = vld [vmem:[%s9166_s3 + $0x244] ss:$16 sps:$4 sm:$0xff]  }
 0x2b4   :  { %1660 = vmatprep.subr.bf16.mxu0 %v6521_v25  ;;  %1701 = vmatprep.subr.bf16.mxu1 %v9522_v4  ;;  %9525 = vst [vmem:[#allocation3_spill] sm:$0xff] %v6535_v27  ;;  %v9536_v4 = vld [vmem:[#allocation9_spill] sm:$0xff] }
 0x2b7   :  { %1661 = vmatpush1.bf16.msra.mxu0 %v6528_v26  ;;  %1702 = vmatpush1.bf16.msra.mxu1 %v9524_v34  ;;  %v9537_v34 = vld [vmem:[#allocation10_spill] sm:$0xff] }
 0x2b8   :  { %1662 = vmatprep.subr.bf16.mxu0 %v6535_v27  ;;  %1703 = vmatprep.subr.bf16.mxu1 %v9526_v51  ;;  %v9538_v51 = vld [vmem:[#allocation11_spill] sm:$0xff] }
 0x2bb   :  { %1663 = vmatpush1.bf16.msra.mxu0 %v6542_v57  ;;  %1704 = vmatpush1.bf16.msra.mxu1 %v9528_v49  ;;  %v9539_v49 = vld [vmem:[#allocation12_spill] sm:$0xff] }
 0x2bc   :  { %1664 = vmatprep.subr.bf16.mxu0 %v6549_v63  ;;  %1705 = vmatprep.subr.bf16.mxu1 %v9530_v47  ;;  %v9540_v47 = vld [vmem:[#allocation13_spill] sm:$0xff] }
 0x2bf   :  { %1665 = vmatpush1.bf16.msra.mxu0 %v6556_v61  ;;  %1706 = vmatpush1.bf16.msra.mxu1 %v9532_v45  ;;  %v9541_v45 = vld [vmem:[#allocation14_spill] sm:$0xff] }
 0x2c0   :  { %1666 = vmatprep.subr.bf16.mxu0 %v6563_v55  ;;  %1707 = vmatprep.subr.bf16.mxu1 %v9534_v15  ;;  %v9542_v15 = vld [vmem:[#allocation15_spill] sm:$0xff]  ;;  %v9553_v55 = vld [vmem:[#allocation26_spill] sm:$0xff] }
 0x2c3   :  { %1667 = vmatpush1.bf16.msra.mxu0 %v6570_v16  ;;  %1708 = vmatpush1.bf16.msra.mxu1 %v9536_v4  ;;  %v9543_v4 = vld [vmem:[#allocation16_spill] sm:$0xff]  ;;  %v9552_v16 = vld [vmem:[#allocation25_spill] sm:$0xff] }
 0x2c4   :  { %1763 = vmatprep.subr.bf16.mxu0 %v9537_v34  ;;  %1804 = vmatprep.subr.bf16.mxu1 %v9538_v51  ;;  %v9544_v34 = vld [vmem:[#allocation17_spill] sm:$0xff]  ;;  %v9545_v51 = vld [vmem:[#allocation18_spill] sm:$0xff] }
 0x2c6   :  { %1685 = vmatmul.mubr.bf16.vlgmr.msra.gmra.mxu0 %v6021_v28  ;;  %1726 = vmatmul.mubr.bf16.vlgmr.msra.gmra.mxu1 %v6021_v28  ;;  %v9547_v28 = vld [vmem:[#allocation20_spill] sm:$0xff] }
 0x2c7   :  { %1764 = vmatpush1.bf16.msra.mxu0 %v9539_v49  ;;  %1805 = vmatpush1.bf16.msra.mxu1 %v9540_v47  ;;  %v9548_v49 = vld [vmem:[#allocation21_spill] sm:$0xff]  ;;  %v9549_v47 = vld [vmem:[#allocation22_spill] sm:$0xff] }
 0x2c8   :  { %1765 = vmatprep.subr.bf16.mxu0 %v9541_v45  ;;  %1806 = vmatprep.subr.bf16.mxu1 %v9542_v15  ;;  %v9550_v45 = vld [vmem:[#allocation23_spill] sm:$0xff]  ;;  %v9551_v15 = vld [vmem:[#allocation24_spill] sm:$0xff] }
 0x2c9   :  { %1795 = vmatprep.mubr.bf16.mxu0 %v9478_v48  ;;  %1836 = vmatprep.mubr.bf16.mxu1 %v9478_v48 }
 0x2cb   :  { %1766 = vmatpush1.bf16.msra.mxu0 %v9543_v4  ;;  %1807 = vmatpush1.bf16.msra.mxu1 %v9544_v34  ;;  %v9554_v4 = vld [vmem:[#allocation27_spill] sm:$0xff]  ;;  %v9555_v34 = vld [vmem:[#allocation28_spill] sm:$0xff] }
 0x2cc   :  { %1767 = vmatprep.subr.bf16.mxu0 %v9545_v51  ;;  %1808 = vmatprep.subr.bf16.mxu1 %v9546_v53  ;;  %v9556_v51 = vld [vmem:[#allocation29_spill] sm:$0xff]  ;;  %v9557_v53 = vld [vmem:[#allocation30_spill] sm:$0xff] }
 0x2cf   :  { %1768 = vmatpush1.bf16.msra.mxu0 %v9547_v28  ;;  %1809 = vmatpush1.bf16.msra.mxu1 %v9548_v49  ;;  %v9558_v28 = vld [vmem:[#allocation31_spill] sm:$0xff]  ;;  %v9559_v49 = vld [vmem:[#allocation32_spill] sm:$0xff] }
 0x2d0   :  { %1769 = vmatprep.subr.bf16.mxu0 %v9549_v47  ;;  %1810 = vmatprep.subr.bf16.mxu1 %v9550_v45  ;;  %v9560_v47 = vld [vmem:[#allocation33_spill] sm:$0xff]  ;;  %v9561_v45 = vld [vmem:[#allocation34_spill] sm:$0xff] }
 0x2d3   :  { %1770 = vmatpush1.bf16.msra.mxu0 %v9551_v15  ;;  %1811 = vmatpush1.bf16.msra.mxu1 %v9552_v16  ;;  %v9562_v15 = vld [vmem:[#allocation35_spill] sm:$0xff]  ;;  %v9563_v16 = vld [vmem:[#allocation37_spill] sm:$0xff] }
 0x2d4   :  { %1771 = vmatprep.subr.bf16.mxu0 %v9553_v55  ;;  %1812 = vmatprep.subr.bf16.mxu1 %v9554_v4  ;;  %v9564_v55 = vld [vmem:[#allocation38_spill] sm:$0xff]  ;;  %v9565_v4 = vld [vmem:[#allocation39_spill] sm:$0xff] }
 0x2d7   :  { %1772 = vmatpush1.bf16.msra.mxu0 %v9555_v34  ;;  %1813 = vmatpush1.bf16.msra.mxu1 %v9556_v51  ;;  %v9566_v34 = vld [vmem:[#allocation40_spill] sm:$0xff]  ;;  %v9567_v51 = vld [vmem:[#allocation42_spill] sm:$0xff] }
 0x2d8   :  { %1773 = vmatprep.subr.bf16.mxu0 %v9557_v53  ;;  %1814 = vmatprep.subr.bf16.mxu1 %v9558_v28  ;;  %v9568_v53 = vld [vmem:[#allocation43_spill] sm:$0xff]  ;;  %v9569_v28 = vld [vmem:[#allocation44_spill] sm:$0xff] }
 0x2db   :  { %1774 = vmatpush1.bf16.msra.mxu0 %v9559_v49  ;;  %1815 = vmatpush1.bf16.msra.mxu1 %v9560_v47  ;;  %v9570_v49 = vld [vmem:[#allocation45_spill] sm:$0xff] }
 0x2dc   :  { %1775 = vmatprep.subr.bf16.mxu0 %v9561_v45  ;;  %1816 = vmatprep.subr.bf16.mxu1 %v9562_v15 }
 0x2df   :  { %1776 = vmatpush1.bf16.msra.mxu0 %v9563_v16  ;;  %1817 = vmatpush1.bf16.msra.mxu1 %v9564_v55 }
 0x2e0   :  { %1777 = vmatprep.subr.bf16.mxu0 %v9565_v4  ;;  %1818 = vmatprep.subr.bf16.mxu1 %v9566_v34 }
 0x2e3   :  { %1778 = vmatpush1.bf16.msra.mxu0 %v9567_v51  ;;  %1819 = vmatpush1.bf16.msra.mxu1 %v9568_v53 }
 0x2e4   :  { %1849 = vmatprep.subr.bf16.mxu0 %v9569_v28  ;;  %1890 = vmatprep.subr.bf16.mxu1 %v9570_v49 }
 0x346   :  { %v1514_v47 = vpop.f32.mrf.mxu0  ;;  %v1555_v45 = vpop.f32.mrf.mxu1 }
 0x347   :  { %v1562_v28 = vadd.f32 %v1514_v47, %v9571_v23 }
 0x348   :  { %v1516_v61 = vpop.f32.mrf.mxu0  ;;  %v1557_v15 = vpop.f32.mrf.mxu1 }
 0x349   :  { %v1563_v49 = vadd.f32 %v1516_v61, %v9572_v22  ;;  %v1565_v23 = vadd.f32 %v1557_v15, %v6004_v52 }
 0x34a   :  { %v1518_v63 = vpop.f32.mrf.mxu0  ;;  %v1559_v16 = vpop.f32.mrf.mxu1 }
 0x34c   :  { %v1519_v57 = vpop.f32.mrf.mxu0  ;;  %v1560_v55 = vpop.f32.mrf.mxu1 }
 0x366   :  { %v1600_v27 = vpop.f32.mrf.mxu0  ;;  %v1641_v4 = vpop.f32.mrf.mxu1 }
 0x367   :  { %v1648_v21 = vadd.f32 %v1600_v27, %v1562_v28  ;;  %v9573_v27 = vld [vmem:[#allocation46_spill] sm:$0xff] }
 0x368   :  { %v1602_v26 = vpop.f32.mrf.mxu0  ;;  %v1643_v34 = vpop.f32.mrf.mxu1  ;;  %v1564_v61 = vadd.f32 %v1555_v45, %v9573_v27  ;;  %v6699_v27 = vld [vmem:[%s9166_s3 + $0xa8] ss:$16 sps:$4 sm:$0xff]  }
 0x369   :  { %v1649_v18 = vadd.f32 %v1602_v26, %v1563_v49  ;;  %v1651_v47 = vadd.f32 %v1643_v34, %v1565_v23  ;;  %v9592_v23 = vld [vmem:[#allocation65_spill] sm:$0xff] }
 0x36a   :  { %v1604_v25 = vpop.f32.mrf.mxu0  ;;  %v1645_v51 = vpop.f32.mrf.mxu1 }
 0x36c   :  { %v1605_v24 = vpop.f32.mrf.mxu0  ;;  %v1646_v53 = vpop.f32.mrf.mxu1 }
 0x36d   :  { %v1650_v53 = vadd.f32 %v1641_v4, %v1564_v61  ;;  %v9594_v61 = vld [vmem:[#allocation67_spill] sm:$0xff] }
 0x386   :  { %v1686_v20 = vpop.f32.mrf.mxu0  ;;  %v1727_v19 = vpop.f32.mrf.mxu1 }
 0x387   :  { %v1734_v63 = vadd.f32 %v1686_v20, %v1648_v21  ;;  %v1736_v21 = vadd.f32 %v1727_v19, %v1650_v53  ;;  %v6706_v53 = vld [vmem:[%s9166_s3 + $0x8c] ss:$16 sps:$4 sm:$0xff]  }
 0x388   :  { %v1688_v16 = vpop.f32.mrf.mxu0  ;;  %v1729_v57 = vpop.f32.mrf.mxu1 }
 0x389   :  { %v4349_v55 = vmul.f32 -1.442695, %v1734_v63  ;;  %v1735_v17 = vadd.f32 %v1688_v16, %v1649_v18  ;;  %v1737_v22 = vadd.f32 %v1729_v57, %v1651_v47  ;;  %v6692_v47 = vld [vmem:[%s9166_s3 + $0xac] ss:$16 sps:$4 sm:$0xff]  }
 0x38a   :  { %v1690_v43 = vpop.f32.mrf.mxu0  ;;  %v1731_v58 = vpop.f32.mrf.mxu1 }
 0x38b   :  { %4706 = vpow2.f32 %v4349_v55  ;;  %v4350_v25 = vmul.f32 -1.442695, %v1735_v17  ;;  %v4351_v26 = vmul.f32 -1.442695, %v1737_v22  ;;  %v9588_v55 = vld [vmem:[#allocation61_spill] sm:$0xff]  ;;  %v9593_v22 = vld [vmem:[#allocation66_spill] sm:$0xff] }
 0x38c   :  { %v1691_v51 = vpop.f32.mrf.mxu0  ;;  %v1732_v24 = vpop.f32.mrf.mxu1 }
 0x38d   :  { %4708 = vpow2.f32 %v4350_v25  ;;  %v6660_v25 = vld [vmem:[%s9166_s3 + $0xec] ss:$16 sps:$4 sm:$0xff]   ;;  %v6685_v24 = vld [vmem:[%s9166_s3 + $0xc8] ss:$16 sps:$4 sm:$0xff]  }
 0x38e   :  { %4710 = vpow2.f32 %v4351_v26  ;;  %v6676_v51 = vld [vmem:[%s9166_s3 + $0xcc] ss:$16 sps:$4 sm:$0xff]   ;;  %v9595_v26 = vld [vmem:[#allocation68_spill] sm:$0xff] }
 0x398   :  { %v4707_v20 = vpop.eup %4706 }
 0x399   :  { %v1741_v28 = vadd.f32 1.0, %v4707_v20  ;;  %v6713_v20 = vld [vmem:[%s9166_s3 + $0x88] ss:$16 sps:$4 sm:$0xff]  }
 0x39a   :  { %v4709_v49 = vpop.eup %4708 }
 0x39b   :  { %4712 = vrcp.f32 %v1741_v28  ;;  %v1747_v58 = vadd.f32 1.0, %v4709_v49  ;;  %v4711_v43 = vpop.eup %4710  ;;  %v6720_v28 = vld [vmem:[%s9166_s3 + $0x6c] ss:$16 sps:$4 sm:$0xff]   ;;  %v9597_v49 = vld [vmem:[#allocation70_spill] sm:$0xff] }
 0x39c   :  { %4714 = vtanh.f32 %v1736_v21  ;;  %v1754_v52 = vadd.f32 1.0, %v4711_v43  ;;  %v9596_v21 = vld [vmem:[#allocation69_spill] sm:$0xff]  ;;  %v9598_v43 = vld [vmem:[#allocation71_spill] sm:$0xff] }
 0x39d   :  { %4716 = vrcp.f32 %v1747_v58  ;;  %v6727_v58 = vld [vmem:[%s9166_s3 + $0x68] ss:$16 sps:$4 sm:$0xff]  }
 0x39e   :  { %4718 = vrcp.f32 %v1754_v52  ;;  %v9600_v52 = vld [vmem:[#allocation73_spill] sm:$0xff] }
 0x3a8   :  { %v4713_v17 = vpop.eup %4712 }
 0x3a9   :  { %v4715_v18 = vpop.eup %4714 }
 0x3aa   :  { %v4717_v63 = vpop.eup %4716  ;;  %v1758_v15 = vmul.f32 %v4715_v18, %v4713_v17  ;;  %v6734_v17 = vld [vmem:[%s9166_s3 + $0x4c] ss:$16 sps:$4 sm:$0xff]   ;;  %v9599_v18 = vld [vmem:[#allocation72_spill] sm:$0xff] }
 0x3ab   :  { %v1757_v34 = vmul.f32 %v4717_v63, %v6008_v1  ;;  %v4719_v19 = vpop.eup %4718  ;;  %v9574_v1 = vld [vmem:[#allocation47_spill] sm:$0xff] }
 0x3ac   :  { %v6741_v63 = vld [vmem:[%s9166_s3 + $0x48] ss:$16 sps:$4 sm:$0xff]  }
 0x3ad   :  { %v6617_v45 = vadd.f32 %v1758_v15, %v1757_v34  ;;  %v6748_v15 = vld [vmem:[%s9166_s3 + $0x2c] ss:$16 sps:$4 sm:$0xff]   ;;  %v9601_v34 = vld [vmem:[#allocation74_spill] sm:$0xff] }
 0x3af   :  { %4720 = vtanh.f32 %v6617_v45 }
 0x3bc   :  { %v4721_v4 = vpop.eup %4720 }
 0x3bd   :  { %v1761_v16 = vmul.f32 %v4721_v4, %v4719_v19  ;;  %v6755_v19 = vld [vmem:[%s9166_s3 + $0x28] ss:$16 sps:$4 sm:$0xff]  }
 0x3be   :  { %v9602_v4 = vld [vmem:[#allocation75_spill] sm:$0xff] }
 0x3bf   :  { %v6620_v57 = vpack.c.bf16 %v1761_v16, %v1761_v16  ;;  %v6762_v16 = vld [vmem:[%s9166_s3 + $0xc] ss:$16 sps:$4 sm:$0xff]  }
 0x3c1   :  { %1796 = vmatmul.mubr.bf16.vlgmr.msra.gmra.mxu0 %v6620_v57  ;;  %1837 = vmatmul.mubr.bf16.vlgmr.msra.gmra.mxu1 %v6620_v57 }
 0x3c2   :  { %1850 = vmatpush1.bf16.msra.mxu0 %v6014_v30  ;;  %1891 = vmatpush1.bf16.msra.mxu1 %v6019_v29  ;;  %v9575_v30 = vld [vmem:[#allocation48_spill] sm:$0xff]  ;;  %v9576_v29 = vld [vmem:[#allocation49_spill] sm:$0xff] }
 0x3c3   :  { %1851 = vmatprep.subr.bf16.mxu0 %v6026_v44  ;;  %1892 = vmatprep.subr.bf16.mxu1 %v6031_v54  ;;  %v9577_v44 = vld [vmem:[#allocation50_spill] sm:$0xff]  ;;  %v9578_v54 = vld [vmem:[#allocation51_spill] sm:$0xff] }
 0x3c4   :  { %1881 = vmatprep.mubr.bf16.mxu0 %v9478_v48  ;;  %1922 = vmatprep.mubr.bf16.mxu1 %v9478_v48 }
 0x3c6   :  { %1852 = vmatpush1.bf16.msra.mxu0 %v6040_v60  ;;  %1893 = vmatpush1.bf16.msra.mxu1 %v6045_v42  ;;  %v9579_v60 = vld [vmem:[#allocation52_spill] sm:$0xff]  ;;  %v9580_v42 = vld [vmem:[#allocation53_spill] sm:$0xff] }
 0x3c7   :  { %1853 = vmatprep.subr.bf16.mxu0 %v6052_v62  ;;  %1894 = vmatprep.subr.bf16.mxu1 %v6057_v56  ;;  %v9581_v62 = vld [vmem:[#allocation54_spill] sm:$0xff]  ;;  %v9582_v56 = vld [vmem:[#allocation55_spill] sm:$0xff] }
 0x3ca   :  { %1854 = vmatpush1.bf16.msra.mxu0 %v6066_v33  ;;  %1895 = vmatpush1.bf16.msra.mxu1 %v6071_v32  ;;  %v9583_v33 = vld [vmem:[#allocation56_spill] sm:$0xff]  ;;  %v9584_v32 = vld [vmem:[#allocation57_spill] sm:$0xff] }
 0x3cb   :  { %1855 = vmatprep.subr.bf16.mxu0 %v6078_v40  ;;  %1896 = vmatprep.subr.bf16.mxu1 %v6083_v3  ;;  %v9585_v40 = vld [vmem:[#allocation58_spill] sm:$0xff]  ;;  %v9586_v3 = vld [vmem:[#allocation59_spill] sm:$0xff] }
 0x3ce   :  { %1856 = vmatpush1.bf16.msra.mxu0 %v6090_v0  ;;  %1897 = vmatpush1.bf16.msra.mxu1 %v9574_v1  ;;  %v9587_v0 = vld [vmem:[#allocation60_spill] sm:$0xff] }
 0x3cf   :  { %1857 = vmatprep.subr.bf16.mxu0 %v9575_v30  ;;  %1898 = vmatprep.subr.bf16.mxu1 %v9576_v29  ;;  %v6768_v1 = vld [vmem:[%s9166_s3] ss:$16 sps:$4 sm:$0xff]   ;;  %v6774_v30 = vld [vmem:[%s9166_s3 + $0x8] ss:$16 sps:$4 sm:$0xff]  }
 0x3d0   :  { %v9603_v29 = vld [vmem:[#allocation76_spill] sm:$0xff] }
 0x3d2   :  { %1858 = vmatpush1.bf16.msra.mxu0 %v9577_v44  ;;  %1899 = vmatpush1.bf16.msra.mxu1 %v9578_v54  ;;  %v6781_v44 = vld [vmem:[%s9166_s3 + $0x1ec] ss:$16 sps:$4 sm:$0xff]  }
 0x3d3   :  { %1859 = vmatprep.subr.bf16.mxu0 %v9579_v60  ;;  %1900 = vmatprep.subr.bf16.mxu1 %v9580_v42 }
 0x3d6   :  { %1860 = vmatpush1.bf16.msra.mxu0 %v9581_v62  ;;  %1901 = vmatpush1.bf16.msra.mxu1 %v9582_v56 }
 0x3d7   :  { %1861 = vmatprep.subr.bf16.mxu0 %v9583_v33  ;;  %1902 = vmatprep.subr.bf16.mxu1 %v9584_v32 }
 0x3da   :  { %1862 = vmatpush1.bf16.msra.mxu0 %v6162_v37  ;;  %1903 = vmatpush1.bf16.msra.mxu1 %v9585_v40  ;;  %v9590_v37 = vld [vmem:[#allocation63_spill] sm:$0xff] }
 0x3db   :  { %1863 = vmatprep.subr.bf16.mxu0 %v6174_v46  ;;  %1904 = vmatprep.subr.bf16.mxu1 %v9586_v3  ;;  %v9589_v46 = vld [vmem:[#allocation62_spill] sm:$0xff] }
 0x3de   :  { %1864 = vmatpush1.bf16.msra.mxu0 %v6186_v38  ;;  %1905 = vmatpush1.bf16.msra.mxu1 %v9587_v0  ;;  %v6669_v38 = vld [vmem:[%s9166_s3 + $0xe8] ss:$16 sps:$4 sm:$0xff]  }
 0x3df   :  { %1963 = vmatprep.subr.bf16.mxu0 %v9588_v55  ;;  %2004 = vmatprep.subr.bf16.mxu1 %v6660_v25 }
 0x3e1   :  { %1882 = vmatmul.mubr.bf16.vlgmr.msra.gmra.mxu0 %v6346_v36  ;;  %1923 = vmatmul.mubr.bf16.vlgmr.msra.gmra.mxu1 %v6346_v36  ;;  %v9591_v36 = vld [vmem:[#allocation64_spill] sm:$0xff] }
 0x3e2   :  { %1964 = vmatpush1.bf16.msra.mxu0 %v9589_v46  ;;  %2005 = vmatpush1.bf16.msra.mxu1 %v6669_v38 }
 0x3e3   :  { %1965 = vmatprep.subr.bf16.mxu0 %v9590_v37  ;;  %2006 = vmatprep.subr.bf16.mxu1 %v6676_v51 }
 0x3e4   :  { %1995 = vmatprep.mubr.bf16.mxu0 %v9478_v48  ;;  %2036 = vmatprep.mubr.bf16.mxu1 %v9478_v48 }
 0x3e6   :  { %1966 = vmatpush1.bf16.msra.mxu0 %v9591_v36  ;;  %2007 = vmatpush1.bf16.msra.mxu1 %v6685_v24 }
 0x3e7   :  { %1967 = vmatprep.subr.bf16.mxu0 %v9592_v23  ;;  %2008 = vmatprep.subr.bf16.mxu1 %v6692_v47 }
 0x3ea   :  { %1968 = vmatpush1.bf16.msra.mxu0 %v9593_v22  ;;  %2009 = vmatpush1.bf16.msra.mxu1 %v6699_v27 }
 0x3eb   :  { %1969 = vmatprep.subr.bf16.mxu0 %v9594_v61  ;;  %2010 = vmatprep.subr.bf16.mxu1 %v6706_v53 }
 0x3ee   :  { %1970 = vmatpush1.bf16.msra.mxu0 %v9595_v26  ;;  %2011 = vmatpush1.bf16.msra.mxu1 %v6713_v20 }
 0x3ef   :  { %1971 = vmatprep.subr.bf16.mxu0 %v9596_v21  ;;  %2012 = vmatprep.subr.bf16.mxu1 %v6720_v28 }
 0x3f2   :  { %1972 = vmatpush1.bf16.msra.mxu0 %v9597_v49  ;;  %2013 = vmatpush1.bf16.msra.mxu1 %v6727_v58 }
 0x3f3   :  { %1973 = vmatprep.subr.bf16.mxu0 %v9598_v43  ;;  %2014 = vmatprep.subr.bf16.mxu1 %v6734_v17 }
 0x3f6   :  { %1974 = vmatpush1.bf16.msra.mxu0 %v9599_v18  ;;  %2015 = vmatpush1.bf16.msra.mxu1 %v6741_v63 }
 0x3f7   :  { %1975 = vmatprep.subr.bf16.mxu0 %v9600_v52  ;;  %2016 = vmatprep.subr.bf16.mxu1 %v6748_v15  ;;  %v9604_v52 = vld [vmem:[#allocation77_spill] sm:$0xff] }
 0x3fa   :  { %1976 = vmatpush1.bf16.msra.mxu0 %v9601_v34  ;;  %2017 = vmatpush1.bf16.msra.mxu1 %v6755_v19 }
 0x3fb   :  { %1977 = vmatprep.subr.bf16.mxu0 %v9602_v4  ;;  %2018 = vmatprep.subr.bf16.mxu1 %v6762_v16 }
 0x3fe   :  { %1978 = vmatpush1.bf16.msra.mxu0 %v6768_v1  ;;  %2019 = vmatpush1.bf16.msra.mxu1 %v6774_v30 }
 0x3ff   :  { %2049 = vmatprep.subr.bf16.mxu0 %v9603_v29  ;;  %2090 = vmatprep.subr.bf16.mxu1 %v6781_v44 }
 0x481   :  { %v1797_v54 = vpop.f32.mrf.mxu0  ;;  %v1838_v60 = vpop.f32.mrf.mxu1 }
 0x482   :  { %v1845_v3 = vadd.f32 %v1797_v54, %v6318_v31  ;;  %v1847_v31 = vadd.f32 %v1838_v60, %v6336_v59 }
 0x483   :  { %v1799_v42 = vpop.f32.mrf.mxu0  ;;  %v1840_v62 = vpop.f32.mrf.mxu1 }
 0x484   :  { %v1846_v46 = vadd.f32 %v1799_v42, %v6323_v2  ;;  %v1848_v34 = vadd.f32 %v1840_v62, %v9604_v52  ;;  %v9609_v52 = vld [vmem:[#allocation82_spill] sm:$0xff] }
 0x485   :  { %v1801_v56 = vpop.f32.mrf.mxu0  ;;  %v1842_v33 = vpop.f32.mrf.mxu1 }
 0x487   :  { %v1802_v32 = vpop.f32.mrf.mxu0  ;;  %v1843_v40 = vpop.f32.mrf.mxu1 }
 0x4a1   :  { %v1883_v0 = vpop.f32.mrf.mxu0  ;;  %v1924_v55 = vpop.f32.mrf.mxu1 }
 0x4a2   :  { %v1931_v37 = vadd.f32 %v1883_v0, %v1845_v3  ;;  %v1933_v2 = vadd.f32 %v1924_v55, %v1847_v31  ;;  %v6928_v31 = vld [vmem:[%s9166_s3 + $0x2cc] ss:$16 sps:$4 sm:$0xff]  }
 0x4a3   :  { %v1885_v36 = vpop.f32.mrf.mxu0  ;;  %v1926_v23 = vpop.f32.mrf.mxu1 }
 0x4a4   :  { %v4352_v22 = vmul.f32 -1.442695, %v1931_v37  ;;  %v1932_v61 = vadd.f32 %v1885_v36, %v1846_v46  ;;  %v1934_v4 = vadd.f32 %v1926_v23, %v1848_v34  ;;  %v6921_v34 = vld [vmem:[%s9166_s3 + $0x2e8] ss:$16 sps:$4 sm:$0xff]  }
 0x4a5   :  { %v1887_v26 = vpop.f32.mrf.mxu0  ;;  %v1928_v21 = vpop.f32.mrf.mxu1 }
 0x4a6   :  { %4722 = vpow2.f32 %v4352_v22  ;;  %v4353_v49 = vmul.f32 -1.442695, %v1932_v61  ;;  %v4354_v29 = vmul.f32 -1.442695, %v1934_v4  ;;  %v6811_v22 = vld [vmem:[%s9166_s3 + $0x1cc] ss:$16 sps:$4 sm:$0xff]  }
 0x4a7   :  { %v1888_v43 = vpop.f32.mrf.mxu0  ;;  %v1929_v18 = vpop.f32.mrf.mxu1  ;;  %v9606_v61 = vld [vmem:[#allocation79_spill] sm:$0xff]  ;;  %v9607_v21 = vld [vmem:[#allocation80_spill] sm:$0xff] }
 0x4a8   :  { %4724 = vpow2.f32 %v4353_v49  ;;  %v6900_v26 = vld [vmem:[%s9166_s3 + $0x10c] ss:$16 sps:$4 sm:$0xff]   ;;  %v6907_v49 = vld [vmem:[%s9166_s3 + $0x108] ss:$16 sps:$4 sm:$0xff]  }
 0x4a9   :  { %4726 = vpow2.f32 %v4354_v29  ;;  %v9608_v43 = vld [vmem:[#allocation81_spill] sm:$0xff]  ;;  %v9610_v4 = vld [vmem:[#allocation83_spill] sm:$0xff]  ;;  %v9611_v29 = vld [vmem:[#allocation84_spill] sm:$0xff] }
 0x4aa   :  { %v6914_v18 = vld [vmem:[%s9166_s3 + $0x2ec] ss:$16 sps:$4 sm:$0xff]  }
 0x4b3   :  { %v4723_v54 = vpop.eup %4722 }
 0x4b4   :  { %v1938_v42 = vadd.f32 1.0, %v4723_v54  ;;  %v6937_v54 = vld [vmem:[%s9166_s3 + $0x2c8] ss:$16 sps:$4 sm:$0xff]  }
 0x4b5   :  { %v4725_v56 = vpop.eup %4724  ;;  %9612 = vst [vmem:[#allocation10_spill] sm:$0xff] %v6937_v54 }
 0x4b6   :  { %4728 = vrcp.f32 %v1938_v42  ;;  %v1944_v33 = vadd.f32 1.0, %v4725_v56  ;;  %v4727_v32 = vpop.eup %4726  ;;  %v6944_v42 = vld [vmem:[%s9166_s3 + $0x2ac] ss:$16 sps:$4 sm:$0xff]   ;;  %v9615_v56 = vld [vmem:[#allocation86_spill] sm:$0xff] }
 0x4b7   :  { %4730 = vtanh.f32 %v1933_v2  ;;  %v1951_v46 = vadd.f32 1.0, %v4727_v32  ;;  %v9613_v2 = vld [vmem:[#allocation85_spill] sm:$0xff]  ;;  %9614 = vst [vmem:[#allocation11_spill] sm:$0xff] %v6944_v42  ;;  %v9617_v32 = vld [vmem:[#allocation87_spill] sm:$0xff] }
 0x4b8   :  { %4732 = vrcp.f32 %v1944_v33  ;;  %v6951_v33 = vld [vmem:[%s9166_s3 + $0x2a8] ss:$16 sps:$4 sm:$0xff]  }
 0x4b9   :  { %4734 = vrcp.f32 %v1951_v46  ;;  %9616 = vst [vmem:[#allocation12_spill] sm:$0xff] %v6951_v33  ;;  %v9621_v46 = vld [vmem:[#allocation89_spill] sm:$0xff] }
 0x4c3   :  { %v4729_v40 = vpop.eup %4728 }
 0x4c4   :  { %v4731_v3 = vpop.eup %4730 }
 0x4c5   :  { %v4733_v0 = vpop.eup %4732  ;;  %v1955_v37 = vmul.f32 %v4731_v3, %v4729_v40  ;;  %v6958_v40 = vld [vmem:[%s9166_s3 + $0x28c] ss:$16 sps:$4 sm:$0xff]   ;;  %v9619_v3 = vld [vmem:[#allocation88_spill] sm:$0xff] }
 0x4c6   :  { %v1954_v62 = vmul.f32 %v4733_v0, %v6339_v50  ;;  %v4735_v59 = vpop.eup %4734  ;;  %v6804_v50 = vld [vmem:[%s9166_s3 + $0x1e8] ss:$16 sps:$4 sm:$0xff]   ;;  %9618 = vst [vmem:[#allocation13_spill] sm:$0xff] %v6958_v40 }
 0x4c7   :  { %v6965_v0 = vld [vmem:[%s9166_s3 + $0x288] ss:$16 sps:$4 sm:$0xff]  }
 0x4c8   :  { %v6789_v36 = vadd.f32 %v1955_v37, %v1954_v62  ;;  %9620 = vst [vmem:[#allocation14_spill] sm:$0xff] %v6965_v0  ;;  %v6972_v37 = vld [vmem:[%s9166_s3 + $0x26c] ss:$16 sps:$4 sm:$0xff]   ;;  %v9623_v62 = vld [vmem:[#allocation2_spill] sm:$0xff] }
 0x4c9   :  { %9622 = vst [vmem:[#allocation15_spill] sm:$0xff] %v6972_v37 }
 0x4ca   :  { %4736 = vtanh.f32 %v6789_v36 }
 0x4d7   :  { %v4737_v60 = vpop.eup %4736 }
 0x4d8   :  { %v6792_v55 = vmul.f32 %v4737_v60, %v4735_v59  ;;  %v6979_v59 = vld [vmem:[%s9166_s3 + $0x268] ss:$16 sps:$4 sm:$0xff]  }
 0x4d9   :  { %9624 = vst [vmem:[#allocation16_spill] sm:$0xff] %v6979_v59  ;;  %v9625_v60 = vld [vmem:[#allocation3_spill] sm:$0xff] }
 0x4da   :  { %9605 = vst [vmem:[#allocation9_spill] sm:$0xff] %v6792_v55  ;;  %v6796_v23 = vpack.c.bf16 %v6792_v55, %v6792_v55  ;;  %v7091_v55 = vld [vmem:[%s9168_s4 + $0xa0] ss:$16 sps:$4 sm:$0xff]  }
 0x4db   :  { %9647 = vst [vmem:[#allocation33_spill] sm:$0xff] %v7091_v55 }
 0x4dc   :  { %1996 = vmatmul.mubr.bf16.vlgmr.msra.gmra.mxu0 %v6796_v23  ;;  %2037 = vmatmul.mubr.bf16.vlgmr.msra.gmra.mxu1 %v6796_v23 }
 0x4dd   :  { %2050 = vmatpush1.bf16.msra.mxu0 %v6353_v39  ;;  %2091 = vmatpush1.bf16.msra.mxu1 %v6804_v50  ;;  %v6820_v39 = vld [vmem:[%s9166_s3 + $0x1c8] ss:$16 sps:$4 sm:$0xff]  }
 0x4de   :  { %2051 = vmatprep.subr.bf16.mxu0 %v6360_v41  ;;  %2092 = vmatprep.subr.bf16.mxu1 %v6811_v22  ;;  %v6827_v41 = vld [vmem:[%s9166_s3 + $0x1ac] ss:$16 sps:$4 sm:$0xff]  }
 0x4df   :  { %2081 = vmatprep.mubr.bf16.mxu0 %v9478_v48  ;;  %2122 = vmatprep.mubr.bf16.mxu1 %v9478_v48 }
 0x4e1   :  { %2052 = vmatpush1.bf16.msra.mxu0 %v6369_v35  ;;  %2093 = vmatpush1.bf16.msra.mxu1 %v6820_v39  ;;  %v6834_v35 = vld [vmem:[%s9166_s3 + $0x1a8] ss:$16 sps:$4 sm:$0xff]  }
 0x4e2   :  { %2053 = vmatprep.subr.bf16.mxu0 %v6376_v5  ;;  %2094 = vmatprep.subr.bf16.mxu1 %v6827_v41  ;;  %v6841_v5 = vld [vmem:[%s9166_s3 + $0x18c] ss:$16 sps:$4 sm:$0xff]  }
 0x4e5   :  { %2054 = vmatpush1.bf16.msra.mxu0 %v6383_v6  ;;  %2095 = vmatpush1.bf16.msra.mxu1 %v6834_v35  ;;  %v6848_v6 = vld [vmem:[%s9166_s3 + $0x188] ss:$16 sps:$4 sm:$0xff]  }
 0x4e6   :  { %2055 = vmatprep.subr.bf16.mxu0 %v6390_v7  ;;  %2096 = vmatprep.subr.bf16.mxu1 %v6841_v5  ;;  %v6855_v7 = vld [vmem:[%s9166_s3 + $0x16c] ss:$16 sps:$4 sm:$0xff]  }
 0x4e9   :  { %2056 = vmatpush1.bf16.msra.mxu0 %v6397_v8  ;;  %2097 = vmatpush1.bf16.msra.mxu1 %v6848_v6  ;;  %v6862_v8 = vld [vmem:[%s9166_s3 + $0x168] ss:$16 sps:$4 sm:$0xff]  }
 0x4ea   :  { %2057 = vmatprep.subr.bf16.mxu0 %v6404_v9  ;;  %2098 = vmatprep.subr.bf16.mxu1 %v6855_v7  ;;  %v6869_v9 = vld [vmem:[%s9166_s3 + $0x14c] ss:$16 sps:$4 sm:$0xff]  }
 0x4ed   :  { %2058 = vmatpush1.bf16.msra.mxu0 %v6411_v10  ;;  %2099 = vmatpush1.bf16.msra.mxu1 %v6862_v8  ;;  %v6876_v10 = vld [vmem:[%s9166_s3 + $0x148] ss:$16 sps:$4 sm:$0xff]  }
 0x4ee   :  { %2059 = vmatprep.subr.bf16.mxu0 %v6418_v11  ;;  %2100 = vmatprep.subr.bf16.mxu1 %v6869_v9  ;;  %v6883_v11 = vld [vmem:[%s9166_s3 + $0x12c] ss:$16 sps:$4 sm:$0xff]  }
 0x4f1   :  { %2060 = vmatpush1.bf16.msra.mxu0 %v6425_v12  ;;  %2101 = vmatpush1.bf16.msra.mxu1 %v6876_v10  ;;  %v6890_v12 = vld [vmem:[%s9166_s3 + $0x128] ss:$16 sps:$4 sm:$0xff]  }
 0x4f2   :  { %2061 = vmatprep.subr.bf16.mxu0 %v6432_v13  ;;  %2102 = vmatprep.subr.bf16.mxu1 %v6883_v11  ;;  %v4355_v13 = vld [vmem:[%s9167_s0 + $0x10] sm:$0xff] }
 0x4f5   :  { %2062 = vmatpush1.bf16.msra.mxu0 %v6439_v14  ;;  %2103 = vmatpush1.bf16.msra.mxu1 %v6890_v12  ;;  %v1961_v14 = vpack.c.bf16 %v4355_v13, %v4355_v13  ;;  %v6986_v13 = vld [vmem:[%s9166_s3 + $0x24c] ss:$16 sps:$4 sm:$0xff]  }
 0x4f6   :  { %2063 = vmatprep.subr.bf16.mxu0 %v9606_v61  ;;  %2104 = vmatprep.subr.bf16.mxu1 %v6900_v26  ;;  %9626 = vst [vmem:[#allocation17_spill] sm:$0xff] %v6986_v13  ;;  %v9627_v61 = vld [vmem:[#allocation4_spill] sm:$0xff] }
 0x4f9   :  { %2064 = vmatpush1.bf16.msra.mxu0 %v9607_v21  ;;  %2105 = vmatpush1.bf16.msra.mxu1 %v6907_v49  ;;  %v9629_v21 = vld [vmem:[#allocation5_spill] sm:$0xff] }
 0x4fa   :  { %2135 = vmatprep.subr.bf16.mxu0 %v9608_v43  ;;  %2176 = vmatprep.subr.bf16.mxu1 %v6914_v18  ;;  %v7000_v43 = vld [vmem:[%s9166_s3 + $0x22c] ss:$16 sps:$4 sm:$0xff]  }
 0x4fb   :  { %9630 = vst [vmem:[#allocation19_spill] sm:$0xff] %v7000_v43 }
 0x4fc   :  { %2082 = vmatmul.mubr.bf16.vlgmr.msra.gmra.mxu0 %v1961_v14  ;;  %2123 = vmatmul.mubr.bf16.vlgmr.msra.gmra.mxu1 %v1961_v14  ;;  %v6993_v14 = vld [vmem:[%s9166_s3 + $0x248] ss:$16 sps:$4 sm:$0xff]  }
 0x4fd   :  { %2136 = vmatpush1.bf16.msra.mxu0 %v9609_v52  ;;  %2177 = vmatpush1.bf16.msra.mxu1 %v6921_v34  ;;  %9628 = vst [vmem:[#allocation18_spill] sm:$0xff] %v6993_v14  ;;  %v9631_v52 = vld [vmem:[#allocation6_spill] sm:$0xff] }
 0x4fe   :  { %2137 = vmatprep.subr.bf16.mxu0 %v9610_v4  ;;  %2178 = vmatprep.subr.bf16.mxu1 %v6928_v31  ;;  %v7007_v4 = vld [vmem:[%s9166_s3 + $0x228] ss:$16 sps:$4 sm:$0xff]  }
 0x4ff   :  { %2167 = vmatprep.mubr.bf16.mxu0 %v9478_v48  ;;  %2208 = vmatprep.mubr.bf16.mxu1 %v9478_v48  ;;  %9632 = vst [vmem:[#allocation20_spill] sm:$0xff] %v7007_v4 }
 0x501   :  { %2138 = vmatpush1.bf16.msra.mxu0 %v9611_v29  ;;  %2179 = vmatpush1.bf16.msra.mxu1 %v6937_v54  ;;  %v9633_v29 = vld [vmem:[#allocation7_spill] sm:$0xff] }
 0x502   :  { %2139 = vmatprep.subr.bf16.mxu0 %v9613_v2  ;;  %2180 = vmatprep.subr.bf16.mxu1 %v6944_v42  ;;  %v7014_v2 = vld [vmem:[%s9166_s3 + $0x20c] ss:$16 sps:$4 sm:$0xff]  }
 0x503   :  { %9634 = vst [vmem:[#allocation21_spill] sm:$0xff] %v7014_v2 }
 0x505   :  { %2140 = vmatpush1.bf16.msra.mxu0 %v9615_v56  ;;  %2181 = vmatpush1.bf16.msra.mxu1 %v6951_v33  ;;  %v9635_v56 = vld [vmem:[#allocation8_spill] sm:$0xff] }
 0x506   :  { %2141 = vmatprep.subr.bf16.mxu0 %v9617_v32  ;;  %2182 = vmatprep.subr.bf16.mxu1 %v6958_v40  ;;  %v7021_v32 = vld [vmem:[%s9166_s3 + $0x208] ss:$16 sps:$4 sm:$0xff]  }
 0x507   :  { %9636 = vst [vmem:[#allocation22_spill] sm:$0xff] %v7021_v32 }
 0x509   :  { %2142 = vmatpush1.bf16.msra.mxu0 %v9619_v3  ;;  %2183 = vmatpush1.bf16.msra.mxu1 %v6965_v0  ;;  %v7027_v3 = vld [vmem:[%s9168_s4 + $0xe4] ss:$16 sps:$4 sm:$0xff]  }
 0x50a   :  { %2143 = vmatprep.subr.bf16.mxu0 %v9621_v46  ;;  %2184 = vmatprep.subr.bf16.mxu1 %v6972_v37  ;;  %9637 = vst [vmem:[#allocation23_spill] sm:$0xff] %v7027_v3  ;;  %v7033_v46 = vld [vmem:[%s9168_s4 + $0xec] ss:$16 sps:$4 sm:$0xff]  }
 0x50b   :  { %9638 = vst [vmem:[#allocation24_spill] sm:$0xff] %v7033_v46 }
 0x50d   :  { %2144 = vmatpush1.bf16.msra.mxu0 %v9623_v62  ;;  %2185 = vmatpush1.bf16.msra.mxu1 %v6979_v59  ;;  %v7041_v62 = vld [vmem:[%s9168_s4 + $0xe0] ss:$16 sps:$4 sm:$0xff]  }
 0x50e   :  { %2145 = vmatprep.subr.bf16.mxu0 %v9625_v60  ;;  %2186 = vmatprep.subr.bf16.mxu1 %v6986_v13  ;;  %9639 = vst [vmem:[#allocation25_spill] sm:$0xff] %v7041_v62  ;;  %v7047_v60 = vld [vmem:[%s9168_s4 + $0xe8] ss:$16 sps:$4 sm:$0xff]  }
 0x50f   :  { %9640 = vst [vmem:[#allocation26_spill] sm:$0xff] %v7047_v60 }
 0x511   :  { %2146 = vmatpush1.bf16.msra.mxu0 %v9627_v61  ;;  %2187 = vmatpush1.bf16.msra.mxu1 %v6993_v14  ;;  %v7053_v61 = vld [vmem:[%s9168_s4 + $0xc4] ss:$16 sps:$4 sm:$0xff]  }
 0x512   :  { %2147 = vmatprep.subr.bf16.mxu0 %v9629_v21  ;;  %2188 = vmatprep.subr.bf16.mxu1 %v7000_v43  ;;  %9641 = vst [vmem:[#allocation27_spill] sm:$0xff] %v7053_v61  ;;  %v7067_v21 = vld [vmem:[%s9168_s4 + $0xc0] ss:$16 sps:$4 sm:$0xff]  }
 0x513   :  { %9643 = vst [vmem:[#allocation29_spill] sm:$0xff] %v7067_v21 }
 0x515   :  { %2148 = vmatpush1.bf16.msra.mxu0 %v9631_v52  ;;  %2189 = vmatpush1.bf16.msra.mxu1 %v7007_v4  ;;  %v7073_v52 = vld [vmem:[%s9168_s4 + $0xc8] ss:$16 sps:$4 sm:$0xff]  }
 0x516   :  { %2149 = vmatprep.subr.bf16.mxu0 %v9633_v29  ;;  %2190 = vmatprep.subr.bf16.mxu1 %v7014_v2  ;;  %9644 = vst [vmem:[#allocation30_spill] sm:$0xff] %v7073_v52  ;;  %v7079_v29 = vld [vmem:[%s9168_s4 + $0xa4] ss:$16 sps:$4 sm:$0xff]  }
 0x517   :  { %9645 = vst [vmem:[#allocation31_spill] sm:$0xff] %v7079_v29 }
 0x519   :  { %2150 = vmatpush1.bf16.msra.mxu0 %v9635_v56  ;;  %2191 = vmatpush1.bf16.msra.mxu1 %v7021_v32  ;;  %v7085_v56 = vld [vmem:[%s9168_s4 + $0xac] ss:$16 sps:$4 sm:$0xff]  }
 0x51a   :  { %2246 = vmatprep.subr.bf16.mxu0 %v7027_v3  ;;  %2287 = vmatprep.subr.bf16.mxu1 %v7033_v46  ;;  %9646 = vst [vmem:[#allocation32_spill] sm:$0xff] %v7085_v56 }
 0x51c   :  { %2168 = vmatmul.mubr.bf16.vlgmr.msra.gmra.mxu0 %v6620_v57  ;;  %2209 = vmatmul.mubr.bf16.vlgmr.msra.gmra.mxu1 %v6620_v57  ;;  %v7059_v57 = vld [vmem:[%s9168_s4 + $0xcc] ss:$16 sps:$4 sm:$0xff]  }
 0x51d   :  { %2247 = vmatpush1.bf16.msra.mxu0 %v7041_v62  ;;  %2288 = vmatpush1.bf16.msra.mxu1 %v7047_v60  ;;  %9642 = vst [vmem:[#allocation28_spill] sm:$0xff] %v7059_v57 }
 0x51e   :  { %2248 = vmatprep.subr.bf16.mxu0 %v7053_v61  ;;  %2289 = vmatprep.subr.bf16.mxu1 %v7059_v57 }
 0x51f   :  { %2278 = vmatprep.mubr.bf16.mxu0 %v9478_v48  ;;  %2319 = vmatprep.mubr.bf16.mxu1 %v9478_v48 }
 0x521   :  { %2249 = vmatpush1.bf16.msra.mxu0 %v7067_v21  ;;  %2290 = vmatpush1.bf16.msra.mxu1 %v7073_v52  ;;  %v7097_v52 = vld [vmem:[%s9168_s4 + $0xa8] ss:$16 sps:$4 sm:$0xff]  }
 0x522   :  { %2250 = vmatprep.subr.bf16.mxu0 %v7079_v29  ;;  %2291 = vmatprep.subr.bf16.mxu1 %v7085_v56  ;;  %9648 = vst [vmem:[#allocation34_spill] sm:$0xff] %v7097_v52  ;;  %v7103_v29 = vld [vmem:[%s9168_s4 + $0x84] ss:$16 sps:$4 sm:$0xff]   ;;  %v7109_v56 = vld [vmem:[%s9168_s4 + $0x8c] ss:$16 sps:$4 sm:$0xff]  }
 0x523   :  { %9649 = vst [vmem:[#allocation35_spill] sm:$0xff] %v7103_v29  ;;  %9650 = vst [vmem:[#allocation37_spill] sm:$0xff] %v7109_v56 }
 0x525   :  { %2251 = vmatpush1.bf16.msra.mxu0 %v7091_v55  ;;  %2292 = vmatpush1.bf16.msra.mxu1 %v7097_v52  ;;  %v7115_v55 = vld [vmem:[%s9168_s4 + $0x80] ss:$16 sps:$4 sm:$0xff]   ;;  %v7121_v52 = vld [vmem:[%s9168_s4 + $0x88] ss:$16 sps:$4 sm:$0xff]  }
 0x526   :  { %2252 = vmatprep.subr.bf16.mxu0 %v7103_v29  ;;  %2293 = vmatprep.subr.bf16.mxu1 %v7109_v56  ;;  %9651 = vst [vmem:[#allocation38_spill] sm:$0xff] %v7115_v55  ;;  %9652 = vst [vmem:[#allocation39_spill] sm:$0xff] %v7121_v52  ;;  %v7127_v29 = vld [vmem:[%s9168_s4 + $0x64] ss:$16 sps:$4 sm:$0xff]   ;;  %v7133_v56 = vld [vmem:[%s9168_s4 + $0x6c] ss:$16 sps:$4 sm:$0xff]  }
 0x527   :  { %9653 = vst [vmem:[#allocation40_spill] sm:$0xff] %v7127_v29  ;;  %9654 = vst [vmem:[#allocation42_spill] sm:$0xff] %v7133_v56 }
 0x529   :  { %2253 = vmatpush1.bf16.msra.mxu0 %v7115_v55  ;;  %2294 = vmatpush1.bf16.msra.mxu1 %v7121_v52  ;;  %v7139_v55 = vld [vmem:[%s9168_s4 + $0x60] ss:$16 sps:$4 sm:$0xff]   ;;  %v7145_v52 = vld [vmem:[%s9168_s4 + $0x68] ss:$16 sps:$4 sm:$0xff]  }
 0x52a   :  { %2254 = vmatprep.subr.bf16.mxu0 %v7127_v29  ;;  %2295 = vmatprep.subr.bf16.mxu1 %v7133_v56  ;;  %9655 = vst [vmem:[#allocation43_spill] sm:$0xff] %v7139_v55  ;;  %9656 = vst [vmem:[#allocation44_spill] sm:$0xff] %v7145_v52  ;;  %v7151_v29 = vld [vmem:[%s9168_s4 + $0x44] ss:$16 sps:$4 sm:$0xff]   ;;  %v7157_v56 = vld [vmem:[%s9168_s4 + $0x4c] ss:$16 sps:$4 sm:$0xff]  }
 0x52b   :  { %9657 = vst [vmem:[#allocation45_spill] sm:$0xff] %v7151_v29  ;;  %9658 = vst [vmem:[#allocation36_spill] sm:$0xff] %v7157_v56 }
 0x52d   :  { %2255 = vmatpush1.bf16.msra.mxu0 %v7139_v55  ;;  %2296 = vmatpush1.bf16.msra.mxu1 %v7145_v52  ;;  %v7163_v55 = vld [vmem:[%s9168_s4 + $0x40] ss:$16 sps:$4 sm:$0xff]   ;;  %v7169_v52 = vld [vmem:[%s9168_s4 + $0x48] ss:$16 sps:$4 sm:$0xff]  }
 0x52e   :  { %2256 = vmatprep.subr.bf16.mxu0 %v7151_v29  ;;  %2297 = vmatprep.subr.bf16.mxu1 %v7157_v56  ;;  %9659 = vst [vmem:[#allocation41_spill] sm:$0xff] %v7163_v55  ;;  %9660 = vst [vmem:[#allocation46_spill] sm:$0xff] %v7169_v52  ;;  %v7175_v29 = vld [vmem:[%s9168_s4 + $0x24] ss:$16 sps:$4 sm:$0xff]   ;;  %v7181_v56 = vld [vmem:[%s9168_s4 + $0x2c] ss:$16 sps:$4 sm:$0xff]  }
 0x52f   :  { %9661 = vst [vmem:[#allocation47_spill] sm:$0xff] %v7175_v29  ;;  %9662 = vst [vmem:[#allocation48_spill] sm:$0xff] %v7181_v56 }
 0x531   :  { %2257 = vmatpush1.bf16.msra.mxu0 %v7163_v55  ;;  %2298 = vmatpush1.bf16.msra.mxu1 %v7169_v52  ;;  %v7187_v55 = vld [vmem:[%s9168_s4 + $0x20] ss:$16 sps:$4 sm:$0xff]   ;;  %v7193_v52 = vld [vmem:[%s9168_s4 + $0x28] ss:$16 sps:$4 sm:$0xff]  }
 0x532   :  { %2258 = vmatprep.subr.bf16.mxu0 %v7175_v29  ;;  %2299 = vmatprep.subr.bf16.mxu1 %v7181_v56  ;;  %9663 = vst [vmem:[#allocation49_spill] sm:$0xff] %v7187_v55  ;;  %9664 = vst [vmem:[#allocation50_spill] sm:$0xff] %v7193_v52  ;;  %v7199_v29 = vld [vmem:[%s9168_s4 + $0x4] ss:$16 sps:$4 sm:$0xff]   ;;  %v7205_v56 = vld [vmem:[%s9168_s4 + $0xc] ss:$16 sps:$4 sm:$0xff]  }
 0x533   :  { %9665 = vst [vmem:[#allocation51_spill] sm:$0xff] %v7199_v29  ;;  %9666 = vst [vmem:[#allocation52_spill] sm:$0xff] %v7205_v56 }
 0x535   :  { %2259 = vmatpush1.bf16.msra.mxu0 %v7187_v55  ;;  %2300 = vmatpush1.bf16.msra.mxu1 %v7193_v52  ;;  %v7211_v55 = vld [vmem:[%s9168_s4] ss:$16 sps:$4 sm:$0xff]   ;;  %v7217_v52 = vld [vmem:[%s9168_s4 + $0x8] ss:$16 sps:$4 sm:$0xff]  }
 0x536   :  { %2260 = vmatprep.subr.bf16.mxu0 %v7199_v29  ;;  %2301 = vmatprep.subr.bf16.mxu1 %v7205_v56  ;;  %9667 = vst [vmem:[#allocation53_spill] sm:$0xff] %v7211_v55  ;;  %9668 = vst [vmem:[#allocation54_spill] sm:$0xff] %v7217_v52  ;;  %v7223_v29 = vld [vmem:[%s9168_s4 + $0x1e4] ss:$16 sps:$4 sm:$0xff]   ;;  %v7229_v56 = vld [vmem:[%s9168_s4 + $0x1ec] ss:$16 sps:$4 sm:$0xff]  }
 0x537   :  { %9669 = vst [vmem:[#allocation55_spill] sm:$0xff] %v7223_v29  ;;  %9670 = vst [vmem:[#allocation56_spill] sm:$0xff] %v7229_v56 }
 0x539   :  { %2261 = vmatpush1.bf16.msra.mxu0 %v7211_v55  ;;  %2302 = vmatpush1.bf16.msra.mxu1 %v7217_v52 }
 0x53a   :  { %2332 = vmatprep.subr.bf16.mxu0 %v7223_v29  ;;  %2373 = vmatprep.subr.bf16.mxu1 %v7229_v56  ;;  %v7235_v56 = vld [vmem:[%s9169_s1] sm:$0xff] }
 0x53b   :  { %9671 = vst [vmem:[#allocation57_spill] sm:$0xff] %v7235_v56 }
 0x59c   :  { %v1997_v55 = vpop.f32.mrf.mxu0  ;;  %v2038_v21 = vpop.f32.mrf.mxu1 }
 0x59d   :  { %v2045_v59 = vadd.f32 %v7235_v56, %v1997_v55 }
 0x59e   :  { %v1999_v57 = vpop.f32.mrf.mxu0  ;;  %v2040_v61 = vpop.f32.mrf.mxu1 }
 0x5a0   :  { %v2001_v60 = vpop.f32.mrf.mxu0  ;;  %v2042_v52 = vpop.f32.mrf.mxu1 }
 0x5a2   :  { %v2002_v62 = vpop.f32.mrf.mxu0  ;;  %v2043_v46 = vpop.f32.mrf.mxu1 }
 0x5a3   :  { %v7241_v62 = vld [vmem:[%s9169_s1 + $0x8] sm:$0xff] }
 0x5a4   :  { %v2046_v46 = vadd.f32 %v7241_v62, %v1999_v57  ;;  %v7247_v57 = vld [vmem:[%s9169_s1 + $0x18] sm:$0xff] }
 0x5bc   :  { %v2083_v3 = vpop.f32.mrf.mxu0  ;;  %v2124_v32 = vpop.f32.mrf.mxu1 }
 0x5bd   :  { %v2131_v60 = vadd.f32 %v2083_v3, %v2045_v59  ;;  %v2048_v59 = vadd.f32 %v7247_v57, %v2040_v61 }
 0x5be   :  { %v2085_v2 = vpop.f32.mrf.mxu0  ;;  %v2126_v4 = vpop.f32.mrf.mxu1 }
 0x5c0   :  { %v2087_v29 = vpop.f32.mrf.mxu0  ;;  %v2128_v43 = vpop.f32.mrf.mxu1 }
 0x5c1   :  { %v2132_v43 = vadd.f32 %v2085_v2, %v2046_v46  ;;  %v2134_v2 = vadd.f32 %v2126_v4, %v2048_v59  ;;  %v7253_v46 = vld [vmem:[%s9169_s1 + $0x10] sm:$0xff] }
 0x5c2   :  { %v2088_v14 = vpop.f32.mrf.mxu0  ;;  %v2129_v13 = vpop.f32.mrf.mxu1 }
 0x5dc   :  { %v2169_v52 = vpop.f32.mrf.mxu0  ;;  %v2210_v29 = vpop.f32.mrf.mxu1 }
 0x5dd   :  { %v2217_v14 = vadd.f32 %v2169_v52, %v2131_v60 }
 0x5de   :  { %v2171_v13 = vpop.f32.mrf.mxu0  ;;  %v2212_v37 = vpop.f32.mrf.mxu1 }
 0x5df   :  { %v4356_v0 = vmul.f32 -1.442695, %v2217_v14  ;;  %v2218_v40 = vadd.f32 %v2171_v13, %v2132_v43  ;;  %v2220_v3 = vadd.f32 %v2212_v37, %v2134_v2 }
 0x5e0   :  { %v2173_v33 = vpop.f32.mrf.mxu0  ;;  %v2214_v42 = vpop.f32.mrf.mxu1 }
 0x5e1   :  { %4738 = vpow2.f32 %v4356_v0  ;;  %v4357_v55 = vmul.f32 -1.442695, %v2218_v40  ;;  %v2047_v42 = vadd.f32 %v7253_v46, %v2038_v21  ;;  %v4358_v40 = vmul.f32 -1.442695, %v2220_v3  ;;  %v7267_v3 = vld [vmem:[%s9168_s4 + $0x1e0] ss:$16 sps:$4 sm:$0xff]  }
 0x5e2   :  { %v2174_v56 = vpop.f32.mrf.mxu0  ;;  %v2215_v54 = vpop.f32.mrf.mxu1 }
 0x5e3   :  { %4740 = vpow2.f32 %v4357_v55  ;;  %v2133_v33 = vadd.f32 %v2124_v32, %v2047_v42  ;;  %v7279_v42 = vld [vmem:[%s9168_s4 + $0x1c4] ss:$16 sps:$4 sm:$0xff]  }
 0x5e4   :  { %4742 = vpow2.f32 %v4358_v40  ;;  %v7293_v40 = vld [vmem:[%s9168_s4 + $0x1c0] ss:$16 sps:$4 sm:$0xff]  }
 0x5e5   :  { %v2219_v0 = vadd.f32 %v2210_v29, %v2133_v33  ;;  %v7285_v33 = vld [vmem:[%s9168_s4 + $0x1cc] ss:$16 sps:$4 sm:$0xff]  }
 0x5ee   :  { %v4739_v54 = vpop.eup %4738 }
 0x5ef   :  { %v2224_v56 = vadd.f32 1.0, %v4739_v54  ;;  %v7299_v54 = vld [vmem:[%s9168_s4 + $0x1c8] ss:$16 sps:$4 sm:$0xff]  }
 0x5f0   :  { %v4741_v60 = vpop.eup %4740 }
 0x5f1   :  { %4744 = vrcp.f32 %v2224_v56  ;;  %v2230_v52 = vadd.f32 1.0, %v4741_v60  ;;  %v4743_v4 = vpop.eup %4742  ;;  %v7311_v56 = vld [vmem:[%s9168_s4 + $0x1ac] ss:$16 sps:$4 sm:$0xff]   ;;  %v7317_v60 = vld [vmem:[%s9168_s4 + $0x1a0] ss:$16 sps:$4 sm:$0xff]  }
 0x5f2   :  { %4746 = vtanh.f32 %v2219_v0  ;;  %v2237_v14 = vadd.f32 1.0, %v4743_v4  ;;  %v7305_v0 = vld [vmem:[%s9168_s4 + $0x1a4] ss:$16 sps:$4 sm:$0xff]  }
 0x5f3   :  { %4748 = vrcp.f32 %v2230_v52  ;;  %v7323_v52 = vld [vmem:[%s9168_s4 + $0x1a8] ss:$16 sps:$4 sm:$0xff]   ;;  %v7329_v4 = vld [vmem:[%s9168_s4 + $0x184] ss:$16 sps:$4 sm:$0xff]  }
 0x5f4   :  { %4750 = vrcp.f32 %v2237_v14  ;;  %v7353_v14 = vld [vmem:[%s9168_s4 + $0x164] ss:$16 sps:$4 sm:$0xff]  }
 0x5fe   :  { %v4745_v37 = vpop.eup %4744 }
 0x5ff   :  { %v4747_v61 = vpop.eup %4746 }
 0x600   :  { %v4749_v43 = vpop.eup %4748  ;;  %v2241_v13 = vmul.f32 %v4747_v61, %v4745_v37  ;;  %v7335_v37 = vld [vmem:[%s9168_s4 + $0x18c] ss:$16 sps:$4 sm:$0xff]   ;;  %v7341_v61 = vld [vmem:[%s9168_s4 + $0x180] ss:$16 sps:$4 sm:$0xff]  }
 0x601   :  { %v2240_v55 = vmul.f32 %v4749_v43, %v6617_v45  ;;  %v4751_v32 = vpop.eup %4750  ;;  %v7273_v45 = vld [vmem:[%s9168_s4 + $0x1e8] ss:$16 sps:$4 sm:$0xff]  }
 0x602   :  { %v7347_v43 = vld [vmem:[%s9168_s4 + $0x188] ss:$16 sps:$4 sm:$0xff]  }
 0x603   :  { %v7257_v21 = vadd.f32 %v2241_v13, %v2240_v55  ;;  %v7359_v13 = vld [vmem:[%s9168_s4 + $0x16c] ss:$16 sps:$4 sm:$0xff]   ;;  %v7365_v55 = vld [vmem:[%s9168_s4 + $0x160] ss:$16 sps:$4 sm:$0xff]  }
 0x604   :  { %9672 = vst [vmem:[#allocation58_spill] sm:$0xff] %v7365_v55 }
 0x605   :  { %4752 = vtanh.f32 %v7257_v21 }
 0x612   :  { %v4753_v29 = vpop.eup %4752 }
 0x613   :  { %v2244_v59 = vmul.f32 %v4753_v29, %v4751_v32  ;;  %v7371_v32 = vld [vmem:[%s9168_s4 + $0x168] ss:$16 sps:$4 sm:$0xff]   ;;  %v7377_v29 = vld [vmem:[%s9168_s4 + $0x144] ss:$16 sps:$4 sm:$0xff]  }
 0x614   :  { %9673 = vst [vmem:[#allocation59_spill] sm:$0xff] %v7371_v32  ;;  %9674 = vst [vmem:[#allocation60_spill] sm:$0xff] %v7377_v29 }
 0x615   :  { %v7260_v2 = vpack.c.bf16 %v2244_v59, %v2244_v59  ;;  %v7383_v59 = vld [vmem:[%s9168_s4 + $0x14c] ss:$16 sps:$4 sm:$0xff]  }
 0x616   :  { %9675 = vst [vmem:[#allocation61_spill] sm:$0xff] %v7383_v59 }
 0x617   :  { %2279 = vmatmul.mubr.bf16.vlgmr.msra.gmra.mxu0 %v7260_v2  ;;  %2320 = vmatmul.mubr.bf16.vlgmr.msra.gmra.mxu1 %v7260_v2 }
 0x618   :  { %2333 = vmatpush1.bf16.msra.mxu0 %v7267_v3  ;;  %2374 = vmatpush1.bf16.msra.mxu1 %v7273_v45 }
 0x619   :  { %2334 = vmatprep.subr.bf16.mxu0 %v7279_v42  ;;  %2375 = vmatprep.subr.bf16.mxu1 %v7285_v33 }
 0x61a   :  { %2364 = vmatprep.mubr.bf16.mxu0 %v9478_v48  ;;  %2405 = vmatprep.mubr.bf16.mxu1 %v9478_v48 }
 0x61c   :  { %2335 = vmatpush1.bf16.msra.mxu0 %v7293_v40  ;;  %2376 = vmatpush1.bf16.msra.mxu1 %v7299_v54 }
 0x61d   :  { %2336 = vmatprep.subr.bf16.mxu0 %v7305_v0  ;;  %2377 = vmatprep.subr.bf16.mxu1 %v7311_v56 }
 0x620   :  { %2337 = vmatpush1.bf16.msra.mxu0 %v7317_v60  ;;  %2378 = vmatpush1.bf16.msra.mxu1 %v7323_v52 }
 0x621   :  { %2338 = vmatprep.subr.bf16.mxu0 %v7329_v4  ;;  %2379 = vmatprep.subr.bf16.mxu1 %v7335_v37 }
 0x624   :  { %2339 = vmatpush1.bf16.msra.mxu0 %v7341_v61  ;;  %2380 = vmatpush1.bf16.msra.mxu1 %v7347_v43 }
 0x625   :  { %2340 = vmatprep.subr.bf16.mxu0 %v7353_v14  ;;  %2381 = vmatprep.subr.bf16.mxu1 %v7359_v13 }
 0x628   :  { %2341 = vmatpush1.bf16.msra.mxu0 %v7365_v55  ;;  %2382 = vmatpush1.bf16.msra.mxu1 %v7371_v32  ;;  %v7389_v55 = vld [vmem:[%s9168_s4 + $0x140] ss:$16 sps:$4 sm:$0xff]   ;;  %v7395_v32 = vld [vmem:[%s9168_s4 + $0x148] ss:$16 sps:$4 sm:$0xff]  }
 0x629   :  { %2342 = vmatprep.subr.bf16.mxu0 %v7377_v29  ;;  %2383 = vmatprep.subr.bf16.mxu1 %v7383_v59  ;;  %9676 = vst [vmem:[#allocation62_spill] sm:$0xff] %v7389_v55  ;;  %9677 = vst [vmem:[#allocation63_spill] sm:$0xff] %v7395_v32  ;;  %v7401_v29 = vld [vmem:[%s9168_s4 + $0x124] ss:$16 sps:$4 sm:$0xff]   ;;  %v7407_v59 = vld [vmem:[%s9168_s4 + $0x12c] ss:$16 sps:$4 sm:$0xff]  }
 0x62a   :  { %9678 = vst [vmem:[#allocation64_spill] sm:$0xff] %v7401_v29  ;;  %9679 = vst [vmem:[#allocation65_spill] sm:$0xff] %v7407_v59 }
 0x62c   :  { %2343 = vmatpush1.bf16.msra.mxu0 %v7389_v55  ;;  %2384 = vmatpush1.bf16.msra.mxu1 %v7395_v32  ;;  %v7413_v55 = vld [vmem:[%s9168_s4 + $0x120] ss:$16 sps:$4 sm:$0xff]   ;;  %v7419_v32 = vld [vmem:[%s9168_s4 + $0x128] ss:$16 sps:$4 sm:$0xff]  }
 0x62d   :  { %2344 = vmatprep.subr.bf16.mxu0 %v7401_v29  ;;  %2385 = vmatprep.subr.bf16.mxu1 %v7407_v59  ;;  %9680 = vst [vmem:[#allocation66_spill] sm:$0xff] %v7413_v55  ;;  %9681 = vst [vmem:[#allocation67_spill] sm:$0xff] %v7419_v32  ;;  %v7425_v29 = vld [vmem:[%s9168_s4 + $0x104] ss:$16 sps:$4 sm:$0xff]   ;;  %v7431_v59 = vld [vmem:[%s9168_s4 + $0x10c] ss:$16 sps:$4 sm:$0xff]  }
 0x62e   :  { %9682 = vst [vmem:[#allocation68_spill] sm:$0xff] %v7425_v29 }
 0x630   :  { %2345 = vmatpush1.bf16.msra.mxu0 %v7413_v55  ;;  %2386 = vmatpush1.bf16.msra.mxu1 %v7419_v32  ;;  %v7437_v55 = vld [vmem:[%s9168_s4 + $0x100] ss:$16 sps:$4 sm:$0xff]   ;;  %v7443_v32 = vld [vmem:[%s9168_s4 + $0x108] ss:$16 sps:$4 sm:$0xff]  }
 0x631   :  { %2346 = vmatprep.subr.bf16.mxu0 %v7425_v29  ;;  %2387 = vmatprep.subr.bf16.mxu1 %v7431_v59  ;;  %9683 = vst [vmem:[#allocation69_spill] sm:$0xff] %v7437_v55  ;;  %9684 = vst [vmem:[#allocation70_spill] sm:$0xff] %v7443_v32  ;;  %v7449_v29 = vld [vmem:[%s9166_s3 + $0xe4] ss:$16 sps:$4 sm:$0xff]  }
 0x634   :  { %2347 = vmatpush1.bf16.msra.mxu0 %v7437_v55  ;;  %2388 = vmatpush1.bf16.msra.mxu1 %v7443_v32  ;;  %v7458_v55 = vld [vmem:[%s9166_s3 + $0xe0] ss:$16 sps:$4 sm:$0xff]   ;;  %v7465_v32 = vld [vmem:[%s9166_s3 + $0xc4] ss:$16 sps:$4 sm:$0xff]  }
 0x635   :  { %2446 = vmatprep.subr.bf16.mxu0 %v7449_v29  ;;  %2487 = vmatprep.subr.bf16.mxu1 %v6660_v25  ;;  %9685 = vst [vmem:[#allocation71_spill] sm:$0xff] %v7465_v32  ;;  %v7474_v25 = vld [vmem:[%s9166_s3 + $0xc0] ss:$16 sps:$4 sm:$0xff]  }
 0x636   :  { %9686 = vst [vmem:[#allocation72_spill] sm:$0xff] %v7474_v25 }
 0x637   :  { %2365 = vmatmul.mubr.bf16.vlgmr.msra.gmra.mxu0 %v6796_v23  ;;  %2406 = vmatmul.mubr.bf16.vlgmr.msra.gmra.mxu1 %v6796_v23 }
 0x638   :  { %2447 = vmatpush1.bf16.msra.mxu0 %v7458_v55  ;;  %2488 = vmatpush1.bf16.msra.mxu1 %v6669_v38  ;;  %v7481_v38 = vld [vmem:[%s9166_s3 + $0xa4] ss:$16 sps:$4 sm:$0xff]  }
 0x639   :  { %2448 = vmatprep.subr.bf16.mxu0 %v7465_v32  ;;  %2489 = vmatprep.subr.bf16.mxu1 %v6676_v51  ;;  %9687 = vst [vmem:[#allocation73_spill] sm:$0xff] %v7481_v38  ;;  %v7488_v51 = vld [vmem:[%s9166_s3 + $0xa0] ss:$16 sps:$4 sm:$0xff]  }
 0x63a   :  { %2478 = vmatprep.mubr.bf16.mxu0 %v9478_v48  ;;  %2519 = vmatprep.mubr.bf16.mxu1 %v9478_v48  ;;  %9688 = vst [vmem:[#allocation74_spill] sm:$0xff] %v7488_v51 }
 0x63c   :  { %2449 = vmatpush1.bf16.msra.mxu0 %v7474_v25  ;;  %2490 = vmatpush1.bf16.msra.mxu1 %v6685_v24  ;;  %v7495_v24 = vld [vmem:[%s9166_s3 + $0x84] ss:$16 sps:$4 sm:$0xff]  }
 0x63d   :  { %2450 = vmatprep.subr.bf16.mxu0 %v7481_v38  ;;  %2491 = vmatprep.subr.bf16.mxu1 %v6692_v47  ;;  %9689 = vst [vmem:[#allocation75_spill] sm:$0xff] %v7495_v24  ;;  %v7502_v47 = vld [vmem:[%s9166_s3 + $0x80] ss:$16 sps:$4 sm:$0xff]  }
 0x63e   :  { %9690 = vst [vmem:[#allocation76_spill] sm:$0xff] %v7502_v47 }
 0x640   :  { %2451 = vmatpush1.bf16.msra.mxu0 %v7488_v51  ;;  %2492 = vmatpush1.bf16.msra.mxu1 %v6699_v27  ;;  %v7509_v27 = vld [vmem:[%s9166_s3 + $0x64] ss:$16 sps:$4 sm:$0xff]  }
 0x641   :  { %2452 = vmatprep.subr.bf16.mxu0 %v7495_v24  ;;  %2493 = vmatprep.subr.bf16.mxu1 %v6706_v53  ;;  %9691 = vst [vmem:[#allocation77_spill] sm:$0xff] %v7509_v27  ;;  %v7516_v53 = vld [vmem:[%s9166_s3 + $0x60] ss:$16 sps:$4 sm:$0xff]  }
 0x642   :  { %9692 = vst [vmem:[#allocation79_spill] sm:$0xff] %v7516_v53 }
 0x644   :  { %2453 = vmatpush1.bf16.msra.mxu0 %v7502_v47  ;;  %2494 = vmatpush1.bf16.msra.mxu1 %v6713_v20  ;;  %v7523_v20 = vld [vmem:[%s9166_s3 + $0x44] ss:$16 sps:$4 sm:$0xff]  }
 0x645   :  { %2454 = vmatprep.subr.bf16.mxu0 %v7509_v27  ;;  %2495 = vmatprep.subr.bf16.mxu1 %v6720_v28  ;;  %9693 = vst [vmem:[#allocation80_spill] sm:$0xff] %v7523_v20  ;;  %v7530_v28 = vld [vmem:[%s9166_s3 + $0x40] ss:$16 sps:$4 sm:$0xff]  }
 0x646   :  { %9694 = vst [vmem:[#allocation81_spill] sm:$0xff] %v7530_v28 }
 0x648   :  { %2455 = vmatpush1.bf16.msra.mxu0 %v7516_v53  ;;  %2496 = vmatpush1.bf16.msra.mxu1 %v6727_v58  ;;  %v7537_v58 = vld [vmem:[%s9166_s3 + $0x24] ss:$16 sps:$4 sm:$0xff]  }
 0x649   :  { %2456 = vmatprep.subr.bf16.mxu0 %v7523_v20  ;;  %2497 = vmatprep.subr.bf16.mxu1 %v6734_v17  ;;  %9695 = vst [vmem:[#allocation82_spill] sm:$0xff] %v7537_v58  ;;  %v7544_v17 = vld [vmem:[%s9166_s3 + $0x20] ss:$16 sps:$4 sm:$0xff]  }
 0x64a   :  { %9696 = vst [vmem:[#allocation83_spill] sm:$0xff] %v7544_v17 }
 0x64c   :  { %2457 = vmatpush1.bf16.msra.mxu0 %v7530_v28  ;;  %2498 = vmatpush1.bf16.msra.mxu1 %v6741_v63  ;;  %v7551_v63 = vld [vmem:[%s9166_s3 + $0x4] ss:$16 sps:$4 sm:$0xff]  }
 0x64d   :  { %2458 = vmatprep.subr.bf16.mxu0 %v7537_v58  ;;  %2499 = vmatprep.subr.bf16.mxu1 %v6748_v15  ;;  %9697 = vst [vmem:[#allocation84_spill] sm:$0xff] %v7551_v63  ;;  %v7560_v15 = vld [vmem:[%s9166_s3 + $0x1e4] ss:$16 sps:$4 sm:$0xff]  }
 0x64e   :  { %9698 = vst [vmem:[#allocation85_spill] sm:$0xff] %v7560_v15 }
 0x650   :  { %2459 = vmatpush1.bf16.msra.mxu0 %v7544_v17  ;;  %2500 = vmatpush1.bf16.msra.mxu1 %v6755_v19 }
 0x651   :  { %2460 = vmatprep.subr.bf16.mxu0 %v7551_v63  ;;  %2501 = vmatprep.subr.bf16.mxu1 %v6762_v16 }
 0x654   :  { %2461 = vmatpush1.bf16.msra.mxu0 %v6768_v1  ;;  %2502 = vmatpush1.bf16.msra.mxu1 %v6774_v30  ;;  %v7567_v1 = vld [vmem:[%s9170_s2] sm:$0xff] }
 0x655   :  { %2532 = vmatprep.subr.bf16.mxu0 %v7560_v15  ;;  %2573 = vmatprep.subr.bf16.mxu1 %v6781_v44  ;;  %9699 = vst [vmem:[#allocation86_spill] sm:$0xff] %v7567_v1  ;;  %v7573_v44 = vld [vmem:[%s9170_s2 + $0x8] sm:$0xff] }
 0x6d7   :  { %v2280_v19 = vpop.f32.mrf.mxu0  ;;  %v2321_v23 = vpop.f32.mrf.mxu1 }
 0x6d8   :  { %v2328_v30 = vadd.f32 %v7567_v1, %v2280_v19  ;;  %v7579_v1 = vld [vmem:[%s9170_s2 + $0x18] sm:$0xff] }
 0x6d9   :  { %v2282_v17 = vpop.f32.mrf.mxu0  ;;  %v2323_v58 = vpop.f32.mrf.mxu1  ;;  %9700 = vst [vmem:[#allocation87_spill] sm:$0xff] %v7579_v1 }
 0x6da   :  { %v2329_v15 = vadd.f32 %v7573_v44, %v2282_v17  ;;  %v2331_v32 = vadd.f32 %v7579_v1, %v2323_v58 }
 0x6db   :  { %v2284_v63 = vpop.f32.mrf.mxu0  ;;  %v2325_v28 = vpop.f32.mrf.mxu1 }
 0x6dd   :  { %v2285_v16 = vpop.f32.mrf.mxu0  ;;  %v2326_v20 = vpop.f32.mrf.mxu1 }
 0x6f7   :  { %v2366_v53 = vpop.f32.mrf.mxu0  ;;  %v2407_v27 = vpop.f32.mrf.mxu1 }
 0x6f8   :  { %v2414_v63 = vadd.f32 %v2366_v53, %v2328_v30  ;;  %v7585_v53 = vld [vmem:[%s9170_s2 + $0x10] sm:$0xff] }
 0x6f9   :  { %v2368_v28 = vpop.f32.mrf.mxu0  ;;  %v2409_v16 = vpop.f32.mrf.mxu1 }
 0x6fa   :  { %v4359_v20 = vmul.f32 -1.442695, %v2414_v63  ;;  %v2415_v47 = vadd.f32 %v2368_v28, %v2329_v15  ;;  %v2417_v17 = vadd.f32 %v2409_v16, %v2331_v32 }
 0x6fb   :  { %v2370_v24 = vpop.f32.mrf.mxu0  ;;  %v2411_v51 = vpop.f32.mrf.mxu1 }
 0x6fc   :  { %4754 = vpow2.f32 %v4359_v20  ;;  %v4360_v38 = vmul.f32 -1.442695, %v2415_v47  ;;  %v2330_v51 = vadd.f32 %v7585_v53, %v2321_v23  ;;  %v4361_v24 = vmul.f32 -1.442695, %v2417_v17 }
 0x6fd   :  { %v2371_v25 = vpop.f32.mrf.mxu0  ;;  %v2412_v19 = vpop.f32.mrf.mxu1 }
 0x6fe   :  { %4756 = vpow2.f32 %v4360_v38  ;;  %v2416_v25 = vadd.f32 %v2407_v27, %v2330_v51 }
 0x6ff   :  { %4758 = vpow2.f32 %v4361_v24  ;;  %v7610_v24 = vld [vmem:[%s9166_s3 + $0x1c4] ss:$16 sps:$4 sm:$0xff]  }
 0x709   :  { %v4755_v47 = vpop.eup %4754 }
 0x70a   :  { %v2421_v15 = vadd.f32 1.0, %v4755_v47  ;;  %v7619_v47 = vld [vmem:[%s9166_s3 + $0x1c0] ss:$16 sps:$4 sm:$0xff]  }
 0x70b   :  { %v4757_v38 = vpop.eup %4756 }
 0x70c   :  { %4760 = vrcp.f32 %v2421_v15  ;;  %v2427_v30 = vadd.f32 1.0, %v4757_v38  ;;  %v4759_v63 = vpop.eup %4758  ;;  %v7706_v15 = vld [vmem:[%s9166_s3 + $0x100] ss:$16 sps:$4 sm:$0xff]   ;;  %v7743_v38 = vld [vmem:[%s9166_s3 + $0x2a4] ss:$16 sps:$4 sm:$0xff]  }
 0x70d   :  { %4762 = vtanh.f32 %v2416_v25  ;;  %v2434_v16 = vadd.f32 1.0, %v4759_v63  ;;  %v7699_v25 = vld [vmem:[%s9166_s3 + $0x104] ss:$16 sps:$4 sm:$0xff]   ;;  %9706 = vst [vmem:[#allocation5_spill] sm:$0xff] %v7706_v15 }
 0x70e   :  { %4764 = vrcp.f32 %v2427_v30  ;;  %9705 = vst [vmem:[#allocation4_spill] sm:$0xff] %v7699_v25  ;;  %v7750_v30 = vld [vmem:[%s9166_s3 + $0x2a0] ss:$16 sps:$4 sm:$0xff]  }
 0x70f   :  { %4766 = vrcp.f32 %v2434_v16  ;;  %v9715_v63 = vld [vmem:[#allocation12_spill] sm:$0xff]  ;;  %v9719_v16 = vld [vmem:[#allocation14_spill] sm:$0xff] }
 0x719   :  { %v4761_v58 = vpop.eup %4760 }
 0x71a   :  { %v4763_v32 = vpop.eup %4762 }
 0x71b   :  { %v4765_v28 = vpop.eup %4764  ;;  %v2438_v20 = vmul.f32 %v4763_v32, %v4761_v58  ;;  %v7757_v58 = vld [vmem:[%s9166_s3 + $0x284] ss:$16 sps:$4 sm:$0xff]   ;;  %v9717_v32 = vld [vmem:[#allocation13_spill] sm:$0xff] }
 0x71c   :  { %v2437_v19 = vmul.f32 %v4765_v28, %v6789_v36  ;;  %v4767_v27 = vpop.eup %4766  ;;  %v7603_v36 = vld [vmem:[%s9166_s3 + $0x1e0] ss:$16 sps:$4 sm:$0xff]   ;;  %9716 = vst [vmem:[#allocation12_spill] sm:$0xff] %v7757_v58 }
 0x71d   :  { %v7764_v28 = vld [vmem:[%s9166_s3 + $0x280] ss:$16 sps:$4 sm:$0xff]  }
 0x71e   :  { %v7589_v1 = vadd.f32 %v2438_v20, %v2437_v19  ;;  %9718 = vst [vmem:[#allocation13_spill] sm:$0xff] %v7764_v28  ;;  %v7771_v20 = vld [vmem:[%s9166_s3 + $0x264] ss:$16 sps:$4 sm:$0xff]   ;;  %v9721_v19 = vld [vmem:[#allocation15_spill] sm:$0xff] }
 0x71f   :  { %9720 = vst [vmem:[#allocation14_spill] sm:$0xff] %v7771_v20 }
 0x720   :  { %4768 = vtanh.f32 %v7589_v1 }
 0x72d   :  { %v4769_v23 = vpop.eup %4768 }
 0x72e   :  { %v7592_v17 = vmul.f32 %v4769_v23, %v4767_v27  ;;  %v7778_v27 = vld [vmem:[%s9166_s3 + $0x260] ss:$16 sps:$4 sm:$0xff]  }
 0x72f   :  { %9722 = vst [vmem:[#allocation15_spill] sm:$0xff] %v7778_v27  ;;  %v9723_v23 = vld [vmem:[#allocation16_spill] sm:$0xff] }
 0x730   :  { %9701 = vst [vmem:[#allocation88_spill] sm:$0xff] %v7592_v17  ;;  %v7596_v51 = vpack.c.bf16 %v7592_v17, %v7592_v17  ;;  %v9736_v17 = vld [vmem:[#allocation23_spill] sm:$0xff] }
 0x732   :  { %2479 = vmatmul.mubr.bf16.vlgmr.msra.gmra.mxu0 %v7596_v51  ;;  %2520 = vmatmul.mubr.bf16.vlgmr.msra.gmra.mxu1 %v7596_v51 }
 0x733   :  { %2533 = vmatpush1.bf16.msra.mxu0 %v7603_v36  ;;  %2574 = vmatpush1.bf16.msra.mxu1 %v6804_v50  ;;  %v7626_v50 = vld [vmem:[%s9166_s3 + $0x1a4] ss:$16 sps:$4 sm:$0xff]  }
 0x734   :  { %2534 = vmatprep.subr.bf16.mxu0 %v7610_v24  ;;  %2575 = vmatprep.subr.bf16.mxu1 %v6811_v22  ;;  %v7633_v22 = vld [vmem:[%s9166_s3 + $0x1a0] ss:$16 sps:$4 sm:$0xff]  }
 0x735   :  { %2564 = vmatprep.mubr.bf16.mxu0 %v9478_v48  ;;  %2605 = vmatprep.mubr.bf16.mxu1 %v9478_v48 }
 0x737   :  { %2535 = vmatpush1.bf16.msra.mxu0 %v7619_v47  ;;  %2576 = vmatpush1.bf16.msra.mxu1 %v6820_v39  ;;  %v7640_v39 = vld [vmem:[%s9166_s3 + $0x184] ss:$16 sps:$4 sm:$0xff]  }
 0x738   :  { %2536 = vmatprep.subr.bf16.mxu0 %v7626_v50  ;;  %2577 = vmatprep.subr.bf16.mxu1 %v6827_v41  ;;  %v7647_v41 = vld [vmem:[%s9166_s3 + $0x180] ss:$16 sps:$4 sm:$0xff]  }
 0x73b   :  { %2537 = vmatpush1.bf16.msra.mxu0 %v7633_v22  ;;  %2578 = vmatpush1.bf16.msra.mxu1 %v6834_v35  ;;  %v7654_v35 = vld [vmem:[%s9166_s3 + $0x164] ss:$16 sps:$4 sm:$0xff]  }
 0x73c   :  { %2538 = vmatprep.subr.bf16.mxu0 %v7640_v39  ;;  %2579 = vmatprep.subr.bf16.mxu1 %v6841_v5  ;;  %v7661_v5 = vld [vmem:[%s9166_s3 + $0x160] ss:$16 sps:$4 sm:$0xff]  }
 0x73f   :  { %2539 = vmatpush1.bf16.msra.mxu0 %v7647_v41  ;;  %2580 = vmatpush1.bf16.msra.mxu1 %v6848_v6  ;;  %v7668_v6 = vld [vmem:[%s9166_s3 + $0x144] ss:$16 sps:$4 sm:$0xff]  }
 0x740   :  { %2540 = vmatprep.subr.bf16.mxu0 %v7654_v35  ;;  %2581 = vmatprep.subr.bf16.mxu1 %v6855_v7  ;;  %v7675_v7 = vld [vmem:[%s9166_s3 + $0x140] ss:$16 sps:$4 sm:$0xff]  }
 0x741   :  { %9702 = vst [vmem:[#allocation89_spill] sm:$0xff] %v7675_v7 }
 0x743   :  { %2541 = vmatpush1.bf16.msra.mxu0 %v7661_v5  ;;  %2582 = vmatpush1.bf16.msra.mxu1 %v6862_v8  ;;  %v7682_v8 = vld [vmem:[%s9166_s3 + $0x124] ss:$16 sps:$4 sm:$0xff]  }
 0x744   :  { %2542 = vmatprep.subr.bf16.mxu0 %v7668_v6  ;;  %2583 = vmatprep.subr.bf16.mxu1 %v6869_v9  ;;  %9703 = vst [vmem:[#allocation2_spill] sm:$0xff] %v7682_v8  ;;  %v7689_v9 = vld [vmem:[%s9166_s3 + $0x120] ss:$16 sps:$4 sm:$0xff]  }
 0x745   :  { %9704 = vst [vmem:[#allocation3_spill] sm:$0xff] %v7689_v9 }
 0x747   :  { %2543 = vmatpush1.bf16.msra.mxu0 %v7675_v7  ;;  %2584 = vmatpush1.bf16.msra.mxu1 %v6876_v10  ;;  %v4362_v10 = vld [vmem:[%s9167_s0 + $0x18] sm:$0xff] }
 0x748   :  { %2544 = vmatprep.subr.bf16.mxu0 %v7682_v8  ;;  %2585 = vmatprep.subr.bf16.mxu1 %v6883_v11  ;;  %v2444_v11 = vpack.c.bf16 %v4362_v10, %v4362_v10  ;;  %v7785_v10 = vld [vmem:[%s9166_s3 + $0x244] ss:$16 sps:$4 sm:$0xff]  }
 0x749   :  { %9724 = vst [vmem:[#allocation16_spill] sm:$0xff] %v7785_v10 }
 0x74b   :  { %2545 = vmatpush1.bf16.msra.mxu0 %v7689_v9  ;;  %2586 = vmatpush1.bf16.msra.mxu1 %v6890_v12  ;;  %v7713_v12 = vld [vmem:[%s9166_s3 + $0x2e4] ss:$16 sps:$4 sm:$0xff]  }
 0x74c   :  { %2546 = vmatprep.subr.bf16.mxu0 %v7699_v25  ;;  %2587 = vmatprep.subr.bf16.mxu1 %v6900_v26  ;;  %9707 = vst [vmem:[#allocation6_spill] sm:$0xff] %v7713_v12  ;;  %v7720_v26 = vld [vmem:[%s9166_s3 + $0x2e0] ss:$16 sps:$4 sm:$0xff]  }
 0x74d   :  { %9708 = vst [vmem:[#allocation7_spill] sm:$0xff] %v7720_v26 }
 0x74f   :  { %2547 = vmatpush1.bf16.msra.mxu0 %v7706_v15  ;;  %2588 = vmatpush1.bf16.msra.mxu1 %v6907_v49  ;;  %v7727_v49 = vld [vmem:[%s9166_s3 + $0x2c4] ss:$16 sps:$4 sm:$0xff]  }
 0x750   :  { %2618 = vmatprep.subr.bf16.mxu0 %v7713_v12  ;;  %2659 = vmatprep.subr.bf16.mxu1 %v6914_v18  ;;  %9709 = vst [vmem:[#allocation8_spill] sm:$0xff] %v7727_v49  ;;  %v7736_v18 = vld [vmem:[%s9166_s3 + $0x2c0] ss:$16 sps:$4 sm:$0xff]  }
 0x751   :  { %9710 = vst [vmem:[#allocation90_spill] sm:$0xff] %v7736_v18 }
 0x752   :  { %2565 = vmatmul.mubr.bf16.vlgmr.msra.gmra.mxu0 %v2444_v11  ;;  %2606 = vmatmul.mubr.bf16.vlgmr.msra.gmra.mxu1 %v2444_v11  ;;  %v9725_v11 = vld [vmem:[#allocation17_spill] sm:$0xff] }
 0x753   :  { %2619 = vmatpush1.bf16.msra.mxu0 %v7720_v26  ;;  %2660 = vmatpush1.bf16.msra.mxu1 %v6921_v34  ;;  %v9711_v34 = vld [vmem:[#allocation10_spill] sm:$0xff] }
 0x754   :  { %2620 = vmatprep.subr.bf16.mxu0 %v7727_v49  ;;  %2661 = vmatprep.subr.bf16.mxu1 %v6928_v31  ;;  %9712 = vst [vmem:[#allocation10_spill] sm:$0xff] %v7743_v38  ;;  %v9713_v31 = vld [vmem:[#allocation11_spill] sm:$0xff]  ;;  %v9770_v49 = vld [vmem:[#allocation57_spill] sm:$0xff] }
 0x755   :  { %2650 = vmatprep.mubr.bf16.mxu0 %v9478_v48  ;;  %2691 = vmatprep.mubr.bf16.mxu1 %v9478_v48  ;;  %9714 = vst [vmem:[#allocation11_spill] sm:$0xff] %v7750_v30 }
 0x757   :  { %2621 = vmatpush1.bf16.msra.mxu0 %v7736_v18  ;;  %2662 = vmatpush1.bf16.msra.mxu1 %v9711_v34  ;;  %v7792_v34 = vld [vmem:[%s9166_s3 + $0x240] ss:$16 sps:$4 sm:$0xff]  }
 0x758   :  { %2622 = vmatprep.subr.bf16.mxu0 %v7743_v38  ;;  %2663 = vmatprep.subr.bf16.mxu1 %v9713_v31  ;;  %9726 = vst [vmem:[#allocation17_spill] sm:$0xff] %v7792_v34  ;;  %v9727_v31 = vld [vmem:[#allocation18_spill] sm:$0xff] }
 0x75b   :  { %2623 = vmatpush1.bf16.msra.mxu0 %v7750_v30  ;;  %2664 = vmatpush1.bf16.msra.mxu1 %v9715_v63  ;;  %v7799_v63 = vld [vmem:[%s9166_s3 + $0x224] ss:$16 sps:$4 sm:$0xff]  }
 0x75c   :  { %2624 = vmatprep.subr.bf16.mxu0 %v7757_v58  ;;  %2665 = vmatprep.subr.bf16.mxu1 %v9717_v32  ;;  %9728 = vst [vmem:[#allocation18_spill] sm:$0xff] %v7799_v63  ;;  %v9729_v32 = vld [vmem:[#allocation19_spill] sm:$0xff] }
 0x75f   :  { %2625 = vmatpush1.bf16.msra.mxu0 %v7764_v28  ;;  %2666 = vmatpush1.bf16.msra.mxu1 %v9719_v16  ;;  %v7806_v16 = vld [vmem:[%s9166_s3 + $0x220] ss:$16 sps:$4 sm:$0xff]  }
 0x760   :  { %2626 = vmatprep.subr.bf16.mxu0 %v7771_v20  ;;  %2667 = vmatprep.subr.bf16.mxu1 %v9721_v19  ;;  %9730 = vst [vmem:[#allocation19_spill] sm:$0xff] %v7806_v16  ;;  %v9731_v19 = vld [vmem:[#allocation20_spill] sm:$0xff] }
 0x763   :  { %2627 = vmatpush1.bf16.msra.mxu0 %v7778_v27  ;;  %2668 = vmatpush1.bf16.msra.mxu1 %v9723_v23  ;;  %v7813_v23 = vld [vmem:[%s9166_s3 + $0x204] ss:$16 sps:$4 sm:$0xff]  }
 0x764   :  { %2628 = vmatprep.subr.bf16.mxu0 %v7785_v10  ;;  %2669 = vmatprep.subr.bf16.mxu1 %v9725_v11  ;;  %9732 = vst [vmem:[#allocation20_spill] sm:$0xff] %v7813_v23  ;;  %v9733_v11 = vld [vmem:[#allocation21_spill] sm:$0xff]  ;;  %v9752_v10 = vld [vmem:[#allocation40_spill] sm:$0xff] }
 0x767   :  { %2629 = vmatpush1.bf16.msra.mxu0 %v7792_v34  ;;  %2670 = vmatpush1.bf16.msra.mxu1 %v9727_v31  ;;  %v7820_v31 = vld [vmem:[%s9166_s3 + $0x200] ss:$16 sps:$4 sm:$0xff]   ;;  %v9751_v34 = vld [vmem:[#allocation39_spill] sm:$0xff] }
 0x768   :  { %2630 = vmatprep.subr.bf16.mxu0 %v7799_v63  ;;  %2671 = vmatprep.subr.bf16.mxu1 %v9729_v32  ;;  %9734 = vst [vmem:[#allocation21_spill] sm:$0xff] %v7820_v31  ;;  %v9735_v32 = vld [vmem:[#allocation22_spill] sm:$0xff]  ;;  %v9741_v63 = vld [vmem:[#allocation28_spill] sm:$0xff] }
 0x76b   :  { %2631 = vmatpush1.bf16.msra.mxu0 %v7806_v16  ;;  %2672 = vmatpush1.bf16.msra.mxu1 %v9731_v19  ;;  %v9737_v19 = vld [vmem:[#allocation24_spill] sm:$0xff]  ;;  %v9740_v16 = vld [vmem:[#allocation27_spill] sm:$0xff] }
 0x76c   :  { %2632 = vmatprep.subr.bf16.mxu0 %v7813_v23  ;;  %2673 = vmatprep.subr.bf16.mxu1 %v9733_v11  ;;  %v9738_v23 = vld [vmem:[#allocation25_spill] sm:$0xff]  ;;  %v9739_v11 = vld [vmem:[#allocation26_spill] sm:$0xff] }
 0x76f   :  { %2633 = vmatpush1.bf16.msra.mxu0 %v7820_v31  ;;  %2674 = vmatpush1.bf16.msra.mxu1 %v9735_v32  ;;  %v9742_v32 = vld [vmem:[#allocation29_spill] sm:$0xff]  ;;  %v9745_v31 = vld [vmem:[#allocation32_spill] sm:$0xff] }
 0x770   :  { %2729 = vmatprep.subr.bf16.mxu0 %v9736_v17  ;;  %2770 = vmatprep.subr.bf16.mxu1 %v9737_v19  ;;  %v9743_v17 = vld [vmem:[#allocation30_spill] sm:$0xff]  ;;  %v9744_v19 = vld [vmem:[#allocation31_spill] sm:$0xff] }
 0x772   :  { %2651 = vmatmul.mubr.bf16.vlgmr.msra.gmra.mxu0 %v7260_v2  ;;  %2692 = vmatmul.mubr.bf16.vlgmr.msra.gmra.mxu1 %v7260_v2  ;;  %v9746_v2 = vld [vmem:[#allocation33_spill] sm:$0xff] }
 0x773   :  { %2730 = vmatpush1.bf16.msra.mxu0 %v9738_v23  ;;  %2771 = vmatpush1.bf16.msra.mxu1 %v9739_v11  ;;  %v9747_v23 = vld [vmem:[#allocation34_spill] sm:$0xff]  ;;  %v9748_v11 = vld [vmem:[#allocation35_spill] sm:$0xff] }
 0x774   :  { %2731 = vmatprep.subr.bf16.mxu0 %v9740_v16  ;;  %2772 = vmatprep.subr.bf16.mxu1 %v9741_v63  ;;  %v9749_v16 = vld [vmem:[#allocation37_spill] sm:$0xff]  ;;  %v9750_v63 = vld [vmem:[#allocation38_spill] sm:$0xff] }
 0x775   :  { %2761 = vmatprep.mubr.bf16.mxu0 %v9478_v48  ;;  %2802 = vmatprep.mubr.bf16.mxu1 %v9478_v48 }
 0x777   :  { %2732 = vmatpush1.bf16.msra.mxu0 %v9742_v32  ;;  %2773 = vmatpush1.bf16.msra.mxu1 %v9743_v17  ;;  %v9753_v32 = vld [vmem:[#allocation42_spill] sm:$0xff]  ;;  %v9754_v17 = vld [vmem:[#allocation43_spill] sm:$0xff] }
 0x778   :  { %2733 = vmatprep.subr.bf16.mxu0 %v9744_v19  ;;  %2774 = vmatprep.subr.bf16.mxu1 %v9745_v31  ;;  %v9755_v19 = vld [vmem:[#allocation44_spill] sm:$0xff]  ;;  %v9756_v31 = vld [vmem:[#allocation45_spill] sm:$0xff] }
 0x77b   :  { %2734 = vmatpush1.bf16.msra.mxu0 %v9746_v2  ;;  %2775 = vmatpush1.bf16.msra.mxu1 %v9747_v23  ;;  %v9757_v2 = vld [vmem:[#allocation36_spill] sm:$0xff]  ;;  %v9758_v23 = vld [vmem:[#allocation41_spill] sm:$0xff] }
 0x77c   :  { %2735 = vmatprep.subr.bf16.mxu0 %v9748_v11  ;;  %2776 = vmatprep.subr.bf16.mxu1 %v9749_v16  ;;  %v9759_v11 = vld [vmem:[#allocation46_spill] sm:$0xff]  ;;  %v9760_v16 = vld [vmem:[#allocation47_spill] sm:$0xff] }
 0x77f   :  { %2736 = vmatpush1.bf16.msra.mxu0 %v9750_v63  ;;  %2777 = vmatpush1.bf16.msra.mxu1 %v9751_v34  ;;  %v9761_v63 = vld [vmem:[#allocation48_spill] sm:$0xff]  ;;  %v9762_v34 = vld [vmem:[#allocation49_spill] sm:$0xff] }
 0x780   :  { %2737 = vmatprep.subr.bf16.mxu0 %v9752_v10  ;;  %2778 = vmatprep.subr.bf16.mxu1 %v9753_v32  ;;  %v9763_v10 = vld [vmem:[#allocation50_spill] sm:$0xff]  ;;  %v9764_v32 = vld [vmem:[#allocation51_spill] sm:$0xff] }
 0x783   :  { %2738 = vmatpush1.bf16.msra.mxu0 %v9754_v17  ;;  %2779 = vmatpush1.bf16.msra.mxu1 %v9755_v19  ;;  %v9765_v17 = vld [vmem:[#allocation52_spill] sm:$0xff]  ;;  %v9766_v19 = vld [vmem:[#allocation53_spill] sm:$0xff] }
 0x784   :  { %2739 = vmatprep.subr.bf16.mxu0 %v9756_v31  ;;  %2780 = vmatprep.subr.bf16.mxu1 %v9757_v2  ;;  %v9767_v31 = vld [vmem:[#allocation54_spill] sm:$0xff]  ;;  %v9768_v2 = vld [vmem:[#allocation55_spill] sm:$0xff] }
 0x787   :  { %2740 = vmatpush1.bf16.msra.mxu0 %v9758_v23  ;;  %2781 = vmatpush1.bf16.msra.mxu1 %v9759_v11  ;;  %v9769_v23 = vld [vmem:[#allocation56_spill] sm:$0xff] }
 0x788   :  { %2741 = vmatprep.subr.bf16.mxu0 %v9760_v16  ;;  %2782 = vmatprep.subr.bf16.mxu1 %v9761_v63 }
 0x78b   :  { %2742 = vmatpush1.bf16.msra.mxu0 %v9762_v34  ;;  %2783 = vmatpush1.bf16.msra.mxu1 %v9763_v10 }
 0x78c   :  { %2743 = vmatprep.subr.bf16.mxu0 %v9764_v32  ;;  %2784 = vmatprep.subr.bf16.mxu1 %v9765_v17 }
 0x78f   :  { %2744 = vmatpush1.bf16.msra.mxu0 %v9766_v19  ;;  %2785 = vmatpush1.bf16.msra.mxu1 %v9767_v31 }
 0x790   :  { %2815 = vmatprep.subr.bf16.mxu0 %v9768_v2  ;;  %2856 = vmatprep.subr.bf16.mxu1 %v9769_v23 }
 0x7f2   :  { %v2480_v11 = vpop.f32.mrf.mxu0  ;;  %v2521_v16 = vpop.f32.mrf.mxu1 }
 0x7f3   :  { %v2528_v2 = vadd.f32 %v9770_v49, %v2480_v11 }
 0x7f4   :  { %v2482_v27 = vpop.f32.mrf.mxu0  ;;  %v2523_v63 = vpop.f32.mrf.mxu1 }
 0x7f5   :  { %v2529_v23 = vadd.f32 %v7241_v62, %v2482_v27  ;;  %v2531_v49 = vadd.f32 %v7247_v57, %v2523_v63 }
 0x7f6   :  { %v2484_v20 = vpop.f32.mrf.mxu0  ;;  %v2525_v34 = vpop.f32.mrf.mxu1 }
 0x7f8   :  { %v2485_v28 = vpop.f32.mrf.mxu0  ;;  %v2526_v10 = vpop.f32.mrf.mxu1 }
 0x812   :  { %v2566_v58 = vpop.f32.mrf.mxu0  ;;  %v2607_v32 = vpop.f32.mrf.mxu1 }
 0x813   :  { %v2614_v26 = vadd.f32 %v2566_v58, %v2528_v2  ;;  %v2530_v58 = vadd.f32 %v7253_v46, %v2521_v16 }
 0x814   :  { %v2568_v30 = vpop.f32.mrf.mxu0  ;;  %v2609_v17 = vpop.f32.mrf.mxu1 }
 0x815   :  { %v2615_v25 = vadd.f32 %v2568_v30, %v2529_v23  ;;  %v2617_v11 = vadd.f32 %v2609_v17, %v2531_v49  ;;  %v2616_v27 = vadd.f32 %v2607_v32, %v2530_v58  ;;  %v9790_v49 = vld [vmem:[#allocation77_spill] sm:$0xff] }
 0x816   :  { %v2570_v38 = vpop.f32.mrf.mxu0  ;;  %v2611_v19 = vpop.f32.mrf.mxu1  ;;  %v7977_v58 = vld [vmem:[%s9166_s3 + $0x68] ss:$16 sps:$4 sm:$0xff]  }
 0x818   :  { %v2571_v18 = vpop.f32.mrf.mxu0  ;;  %v2612_v31 = vpop.f32.mrf.mxu1 }
 0x832   :  { %v2652_v12 = vpop.f32.mrf.mxu0  ;;  %v2693_v15 = vpop.f32.mrf.mxu1 }
 0x833   :  { %v2700_v20 = vadd.f32 %v2652_v12, %v2614_v26  ;;  %v2702_v26 = vadd.f32 %v2693_v15, %v2616_v27  ;;  %v9792_v27 = vld [vmem:[#allocation80_spill] sm:$0xff] }
 0x834   :  { %v2654_v34 = vpop.f32.mrf.mxu0  ;;  %v2695_v28 = vpop.f32.mrf.mxu1 }
 0x835   :  { %v4363_v10 = vmul.f32 -1.442695, %v2700_v20  ;;  %v2701_v9 = vadd.f32 %v2654_v34, %v2615_v25  ;;  %v2703_v62 = vadd.f32 %v2695_v28, %v2617_v11  ;;  %v9787_v34 = vld [vmem:[#allocation74_spill] sm:$0xff]  ;;  %v7949_v28 = vld [vmem:[%s9166_s3 + $0xa8] ss:$16 sps:$4 sm:$0xff]  }
 0x836   :  { %v2656_v8 = vpop.f32.mrf.mxu0  ;;  %v2697_v7 = vpop.f32.mrf.mxu1  ;;  %v7970_v11 = vld [vmem:[%s9166_s3 + $0x6c] ss:$16 sps:$4 sm:$0xff]  }
 0x837   :  { %4770 = vpow2.f32 %v4363_v10  ;;  %v4364_v38 = vmul.f32 -1.442695, %v2701_v9  ;;  %v4365_v30 = vmul.f32 -1.442695, %v2703_v62  ;;  %v9788_v10 = vld [vmem:[#allocation75_spill] sm:$0xff] }
 0x838   :  { %v2657_v19 = vpop.f32.mrf.mxu0  ;;  %v2698_v18 = vpop.f32.mrf.mxu1  ;;  %v9791_v62 = vld [vmem:[#allocation79_spill] sm:$0xff] }
 0x839   :  { %4772 = vpow2.f32 %v4364_v38  ;;  %v7956_v38 = vld [vmem:[%s9166_s3 + $0x8c] ss:$16 sps:$4 sm:$0xff]   ;;  %v9789_v19 = vld [vmem:[#allocation76_spill] sm:$0xff]  ;;  %v7963_v18 = vld [vmem:[%s9166_s3 + $0x88] ss:$16 sps:$4 sm:$0xff]  }
 0x83a   :  { %4774 = vpow2.f32 %v4365_v30  ;;  %v7984_v30 = vld [vmem:[%s9166_s3 + $0x4c] ss:$16 sps:$4 sm:$0xff]  }
 0x844   :  { %v4771_v12 = vpop.eup %4770 }
 0x845   :  { %v2707_v31 = vadd.f32 1.0, %v4771_v12  ;;  %v9793_v12 = vld [vmem:[#allocation81_spill] sm:$0xff] }
 0x846   :  { %v4773_v2 = vpop.eup %4772 }
 0x847   :  { %4776 = vrcp.f32 %v2707_v31  ;;  %v2713_v7 = vadd.f32 1.0, %v4773_v2  ;;  %v4775_v8 = vpop.eup %4774  ;;  %v9794_v31 = vld [vmem:[#allocation82_spill] sm:$0xff]  ;;  %v7998_v2 = vld [vmem:[%s9166_s3 + $0x2c] ss:$16 sps:$4 sm:$0xff]  }
 0x848   :  { %4778 = vtanh.f32 %v2702_v26  ;;  %v2720_v57 = vadd.f32 1.0, %v4775_v8  ;;  %v7991_v26 = vld [vmem:[%s9166_s3 + $0x48] ss:$16 sps:$4 sm:$0xff]  }
 0x849   :  { %4780 = vrcp.f32 %v2713_v7  ;;  %v9795_v7 = vld [vmem:[#allocation83_spill] sm:$0xff] }
 0x84a   :  { %4782 = vrcp.f32 %v2720_v57  ;;  %v8005_v8 = vld [vmem:[%s9166_s3 + $0x28] ss:$16 sps:$4 sm:$0xff]  }
 0x84b   :  { %v8024_v57 = vld [vmem:[%s9166_s3 + $0x8] ss:$16 sps:$4 sm:$0xff]  }
 0x854   :  { %v4777_v9 = vpop.eup %4776 }
 0x855   :  { %v4779_v25 = vpop.eup %4778 }
 0x856   :  { %v4781_v23 = vpop.eup %4780  ;;  %v2724_v63 = vmul.f32 %v4779_v25, %v4777_v9  ;;  %v9796_v9 = vld [vmem:[#allocation84_spill] sm:$0xff]  ;;  %v8012_v25 = vld [vmem:[%s9166_s3 + $0xc] ss:$16 sps:$4 sm:$0xff]  }
 0x857   :  { %v2723_v17 = vmul.f32 %v4781_v23, %v7257_v21  ;;  %v4783_v15 = vpop.eup %4782  ;;  %v9771_v21 = vld [vmem:[#allocation58_spill] sm:$0xff] }
 0x858   :  { %v8018_v23 = vld [vmem:[%s9166_s3] ss:$16 sps:$4 sm:$0xff]  }
 0x859   :  { %v7867_v46 = vadd.f32 %v2724_v63, %v2723_v17  ;;  %v9797_v63 = vld [vmem:[#allocation85_spill] sm:$0xff] }
 0x85a   :  { %v8031_v17 = vld [vmem:[%s9166_s3 + $0x1ec] ss:$16 sps:$4 sm:$0xff]  }
 0x85b   :  { %4784 = vtanh.f32 %v7867_v46 }
 0x868   :  { %v4785_v16 = vpop.eup %4784 }
 0x869   :  { %v2727_v32 = vmul.f32 %v4785_v16, %v4783_v15 }
 0x86b   :  { %v7870_v20 = vpack.c.bf16 %v2727_v32, %v2727_v32 }
 0x86d   :  { %2762 = vmatmul.mubr.bf16.vlgmr.msra.gmra.mxu0 %v7870_v20  ;;  %2803 = vmatmul.mubr.bf16.vlgmr.msra.gmra.mxu1 %v7870_v20 }
 0x86e   :  { %2816 = vmatpush1.bf16.msra.mxu0 %v7267_v3  ;;  %2857 = vmatpush1.bf16.msra.mxu1 %v7273_v45  ;;  %v9772_v3 = vld [vmem:[#allocation59_spill] sm:$0xff]  ;;  %v9773_v45 = vld [vmem:[#allocation60_spill] sm:$0xff] }
 0x86f   :  { %2817 = vmatprep.subr.bf16.mxu0 %v7279_v42  ;;  %2858 = vmatprep.subr.bf16.mxu1 %v7285_v33  ;;  %v9774_v42 = vld [vmem:[#allocation61_spill] sm:$0xff]  ;;  %v9775_v33 = vld [vmem:[#allocation62_spill] sm:$0xff] }
 0x870   :  { %2847 = vmatprep.mubr.bf16.mxu0 %v9478_v48  ;;  %2888 = vmatprep.mubr.bf16.mxu1 %v9478_v48 }
 0x872   :  { %2818 = vmatpush1.bf16.msra.mxu0 %v7293_v40  ;;  %2859 = vmatpush1.bf16.msra.mxu1 %v7299_v54  ;;  %v9776_v40 = vld [vmem:[#allocation63_spill] sm:$0xff]  ;;  %v9777_v54 = vld [vmem:[#allocation64_spill] sm:$0xff] }
 0x873   :  { %2819 = vmatprep.subr.bf16.mxu0 %v7305_v0  ;;  %2860 = vmatprep.subr.bf16.mxu1 %v7311_v56  ;;  %v9778_v0 = vld [vmem:[#allocation65_spill] sm:$0xff]  ;;  %v9779_v56 = vld [vmem:[#allocation66_spill] sm:$0xff] }
 0x876   :  { %2820 = vmatpush1.bf16.msra.mxu0 %v7317_v60  ;;  %2861 = vmatpush1.bf16.msra.mxu1 %v7323_v52  ;;  %v9780_v60 = vld [vmem:[#allocation67_spill] sm:$0xff]  ;;  %v9781_v52 = vld [vmem:[#allocation68_spill] sm:$0xff] }
 0x877   :  { %2821 = vmatprep.subr.bf16.mxu0 %v7329_v4  ;;  %2862 = vmatprep.subr.bf16.mxu1 %v7335_v37  ;;  %v9782_v4 = vld [vmem:[#allocation69_spill] sm:$0xff]  ;;  %v9783_v37 = vld [vmem:[#allocation70_spill] sm:$0xff] }
 0x87a   :  { %2822 = vmatpush1.bf16.msra.mxu0 %v7341_v61  ;;  %2863 = vmatpush1.bf16.msra.mxu1 %v7347_v43  ;;  %v7910_v61 = vld [vmem:[%s9166_s3 + $0xec] ss:$16 sps:$4 sm:$0xff]   ;;  %v7919_v43 = vld [vmem:[%s9166_s3 + $0xe8] ss:$16 sps:$4 sm:$0xff]  }
 0x87b   :  { %2823 = vmatprep.subr.bf16.mxu0 %v7353_v14  ;;  %2864 = vmatprep.subr.bf16.mxu1 %v7359_v13  ;;  %v9784_v14 = vld [vmem:[#allocation71_spill] sm:$0xff] }
 0x87c   :  { %v7926_v13 = vld [vmem:[%s9166_s3 + $0xcc] ss:$16 sps:$4 sm:$0xff]  }
 0x87e   :  { %2824 = vmatpush1.bf16.msra.mxu0 %v9771_v21  ;;  %2865 = vmatpush1.bf16.msra.mxu1 %v9772_v3 }
 0x87f   :  { %2825 = vmatprep.subr.bf16.mxu0 %v9773_v45  ;;  %2866 = vmatprep.subr.bf16.mxu1 %v9774_v42 }
 0x882   :  { %2826 = vmatpush1.bf16.msra.mxu0 %v9775_v33  ;;  %2867 = vmatpush1.bf16.msra.mxu1 %v9776_v40  ;;  %v9798_v40 = vld [vmem:[#allocation86_spill] sm:$0xff] }
 0x883   :  { %2827 = vmatprep.subr.bf16.mxu0 %v9777_v54  ;;  %2868 = vmatprep.subr.bf16.mxu1 %v9778_v0 }
 0x886   :  { %2828 = vmatpush1.bf16.msra.mxu0 %v9779_v56  ;;  %2869 = vmatpush1.bf16.msra.mxu1 %v9780_v60 }
 0x887   :  { %2829 = vmatprep.subr.bf16.mxu0 %v9781_v52  ;;  %2870 = vmatprep.subr.bf16.mxu1 %v7431_v59  ;;  %v9786_v59 = vld [vmem:[#allocation73_spill] sm:$0xff] }
 0x88a   :  { %2830 = vmatpush1.bf16.msra.mxu0 %v9782_v4  ;;  %2871 = vmatpush1.bf16.msra.mxu1 %v9783_v37 }
 0x88b   :  { %2929 = vmatprep.subr.bf16.mxu0 %v7449_v29  ;;  %2970 = vmatprep.subr.bf16.mxu1 %v7910_v61  ;;  %v7935_v29 = vld [vmem:[%s9166_s3 + $0xc8] ss:$16 sps:$4 sm:$0xff]  }
 0x88d   :  { %2848 = vmatmul.mubr.bf16.vlgmr.msra.gmra.mxu0 %v7596_v51  ;;  %2889 = vmatmul.mubr.bf16.vlgmr.msra.gmra.mxu1 %v7596_v51  ;;  %v7942_v51 = vld [vmem:[%s9166_s3 + $0xac] ss:$16 sps:$4 sm:$0xff]  }
 0x88e   :  { %2930 = vmatpush1.bf16.msra.mxu0 %v7458_v55  ;;  %2971 = vmatpush1.bf16.msra.mxu1 %v7919_v43  ;;  %v9785_v55 = vld [vmem:[#allocation72_spill] sm:$0xff] }
 0x88f   :  { %2931 = vmatprep.subr.bf16.mxu0 %v9784_v14  ;;  %2972 = vmatprep.subr.bf16.mxu1 %v7926_v13 }
 0x890   :  { %2961 = vmatprep.mubr.bf16.mxu0 %v9478_v48  ;;  %3002 = vmatprep.mubr.bf16.mxu1 %v9478_v48 }
 0x892   :  { %2932 = vmatpush1.bf16.msra.mxu0 %v9785_v55  ;;  %2973 = vmatpush1.bf16.msra.mxu1 %v7935_v29 }
 0x893   :  { %2933 = vmatprep.subr.bf16.mxu0 %v9786_v59  ;;  %2974 = vmatprep.subr.bf16.mxu1 %v7942_v51 }
 0x896   :  { %2934 = vmatpush1.bf16.msra.mxu0 %v9787_v34  ;;  %2975 = vmatpush1.bf16.msra.mxu1 %v7949_v28 }
 0x897   :  { %2935 = vmatprep.subr.bf16.mxu0 %v9788_v10  ;;  %2976 = vmatprep.subr.bf16.mxu1 %v7956_v38 }
 0x89a   :  { %2936 = vmatpush1.bf16.msra.mxu0 %v9789_v19  ;;  %2977 = vmatpush1.bf16.msra.mxu1 %v7963_v18 }
 0x89b   :  { %2937 = vmatprep.subr.bf16.mxu0 %v9790_v49  ;;  %2978 = vmatprep.subr.bf16.mxu1 %v7970_v11 }
 0x89e   :  { %2938 = vmatpush1.bf16.msra.mxu0 %v9791_v62  ;;  %2979 = vmatpush1.bf16.msra.mxu1 %v7977_v58  ;;  %v9799_v62 = vld [vmem:[#allocation87_spill] sm:$0xff] }
 0x89f   :  { %2939 = vmatprep.subr.bf16.mxu0 %v9792_v27  ;;  %2980 = vmatprep.subr.bf16.mxu1 %v7984_v30 }
 0x8a2   :  { %2940 = vmatpush1.bf16.msra.mxu0 %v9793_v12  ;;  %2981 = vmatpush1.bf16.msra.mxu1 %v7991_v26 }
 0x8a3   :  { %2941 = vmatprep.subr.bf16.mxu0 %v9794_v31  ;;  %2982 = vmatprep.subr.bf16.mxu1 %v7998_v2 }
 0x8a6   :  { %2942 = vmatpush1.bf16.msra.mxu0 %v9795_v7  ;;  %2983 = vmatpush1.bf16.msra.mxu1 %v8005_v8 }
 0x8a7   :  { %2943 = vmatprep.subr.bf16.mxu0 %v9796_v9  ;;  %2984 = vmatprep.subr.bf16.mxu1 %v8012_v25 }
 0x8aa   :  { %2944 = vmatpush1.bf16.msra.mxu0 %v8018_v23  ;;  %2985 = vmatpush1.bf16.msra.mxu1 %v8024_v57 }
 0x8ab   :  { %3015 = vmatprep.subr.bf16.mxu0 %v9797_v63  ;;  %3056 = vmatprep.subr.bf16.mxu1 %v8031_v17 }
 0x92d   :  { %v2763_v15 = vpop.f32.mrf.mxu0  ;;  %v2804_v16 = vpop.f32.mrf.mxu1 }
 0x92e   :  { %v2811_v54 = vadd.f32 %v9798_v40, %v2763_v15  ;;  %v2813_v31 = vadd.f32 %v7585_v53, %v2804_v16 }
 0x92f   :  { %v2765_v32 = vpop.f32.mrf.mxu0  ;;  %v2806_v21 = vpop.f32.mrf.mxu1 }
 0x930   :  { %v2812_v60 = vadd.f32 %v7573_v44, %v2765_v32  ;;  %v2814_v27 = vadd.f32 %v9799_v62, %v2806_v21  ;;  %v8157_v62 = vld [vmem:[%s9166_s3 + $0x108] ss:$16 sps:$4 sm:$0xff]  }
 0x931   :  { %v2767_v3 = vpop.f32.mrf.mxu0  ;;  %v2808_v45 = vpop.f32.mrf.mxu1 }
 0x933   :  { %v2768_v42 = vpop.f32.mrf.mxu0  ;;  %v2809_v33 = vpop.f32.mrf.mxu1 }
 0x94d   :  { %v2849_v0 = vpop.f32.mrf.mxu0  ;;  %v2890_v56 = vpop.f32.mrf.mxu1 }
 0x94e   :  { %v2897_v52 = vadd.f32 %v2849_v0, %v2811_v54  ;;  %v2899_v44 = vadd.f32 %v2890_v56, %v2813_v31  ;;  %v9807_v31 = vld [vmem:[#allocation7_spill] sm:$0xff] }
 0x94f   :  { %v2851_v4 = vpop.f32.mrf.mxu0  ;;  %v2892_v37 = vpop.f32.mrf.mxu1 }
 0x950   :  { %v4366_v14 = vmul.f32 -1.442695, %v2897_v52  ;;  %v2898_v55 = vadd.f32 %v2851_v4, %v2812_v60  ;;  %v2900_v12 = vadd.f32 %v2892_v37, %v2814_v27  ;;  %v8061_v52 = vld [vmem:[%s9166_s3 + $0x1cc] ss:$16 sps:$4 sm:$0xff]   ;;  %v9802_v37 = vld [vmem:[#allocation2_spill] sm:$0xff] }
 0x951   :  { %v2853_v59 = vpop.f32.mrf.mxu0  ;;  %v2894_v34 = vpop.f32.mrf.mxu1  ;;  %v9801_v4 = vld [vmem:[#allocation89_spill] sm:$0xff]  ;;  %v9806_v27 = vld [vmem:[#allocation6_spill] sm:$0xff] }
 0x952   :  { %4786 = vpow2.f32 %v4366_v14  ;;  %v4367_v10 = vmul.f32 -1.442695, %v2898_v55  ;;  %v4368_v7 = vmul.f32 -1.442695, %v2900_v12  ;;  %v9803_v14 = vld [vmem:[#allocation3_spill] sm:$0xff]  ;;  %v4369_v59 = vld [vmem:[%s9167_s0 + $0x20] sm:$0xff] }
 0x953   :  { %v2854_v19 = vpop.f32.mrf.mxu0  ;;  %v2895_v49 = vpop.f32.mrf.mxu1  ;;  %v8140_v55 = vld [vmem:[%s9166_s3 + $0x128] ss:$16 sps:$4 sm:$0xff]   ;;  %v9804_v34 = vld [vmem:[#allocation4_spill] sm:$0xff]  ;;  %v8164_v12 = vld [vmem:[%s9166_s3 + $0x2ec] ss:$16 sps:$4 sm:$0xff]  }
 0x954   :  { %4788 = vpow2.f32 %v4367_v10  ;;  %v8150_v10 = vld [vmem:[%s9166_s3 + $0x10c] ss:$16 sps:$4 sm:$0xff]   ;;  %v2927_v19 = vpack.c.bf16 %v4369_v59, %v4369_v59 }
 0x955   :  { %4790 = vpow2.f32 %v4368_v7  ;;  %v9805_v49 = vld [vmem:[#allocation5_spill] sm:$0xff] }
 0x956   :  { %v8171_v7 = vld [vmem:[%s9166_s3 + $0x2e8] ss:$16 sps:$4 sm:$0xff]   ;;  %v8236_v59 = vld [vmem:[%s9166_s3 + $0x24c] ss:$16 sps:$4 sm:$0xff]  }
 0x957   :  { %9824 = vst [vmem:[#allocation30_spill] sm:$0xff] %v8236_v59 }
 0x95f   :  { %v4787_v9 = vpop.eup %4786 }
 0x960   :  { %v2904_v63 = vadd.f32 1.0, %v4787_v9  ;;  %v9808_v9 = vld [vmem:[#allocation8_spill] sm:$0xff] }
 0x961   :  { %v4789_v15 = vpop.eup %4788 }
 0x962   :  { %4792 = vrcp.f32 %v2904_v63  ;;  %v2910_v32 = vadd.f32 1.0, %v4789_v15  ;;  %v4791_v3 = vpop.eup %4790  ;;  %v9809_v63 = vld [vmem:[#allocation90_spill] sm:$0xff]  ;;  %v8187_v15 = vld [vmem:[%s9166_s3 + $0x2c8] ss:$16 sps:$4 sm:$0xff]  }
 0x963   :  { %4794 = vtanh.f32 %v2899_v44  ;;  %v2917_v40 = vadd.f32 1.0, %v4791_v3  ;;  %v8178_v44 = vld [vmem:[%s9166_s3 + $0x2cc] ss:$16 sps:$4 sm:$0xff]   ;;  %9810 = vst [vmem:[#allocation23_spill] sm:$0xff] %v8187_v15 }
 0x964   :  { %4796 = vrcp.f32 %v2910_v32  ;;  %v9811_v32 = vld [vmem:[#allocation10_spill] sm:$0xff]  ;;  %v8194_v3 = vld [vmem:[%s9166_s3 + $0x2ac] ss:$16 sps:$4 sm:$0xff]  }
 0x965   :  { %4798 = vrcp.f32 %v2917_v40  ;;  %9812 = vst [vmem:[#allocation24_spill] sm:$0xff] %v8194_v3  ;;  %v8208_v40 = vld [vmem:[%s9166_s3 + $0x28c] ss:$16 sps:$4 sm:$0xff]  }
 0x966   :  { %9816 = vst [vmem:[#allocation26_spill] sm:$0xff] %v8208_v40 }
 0x96f   :  { %v4793_v45 = vpop.eup %4792 }
 0x970   :  { %v4795_v42 = vpop.eup %4794 }
 0x971   :  { %v4797_v33 = vpop.eup %4796  ;;  %v2921_v54 = vmul.f32 %v4795_v42, %v4793_v45  ;;  %v9813_v45 = vld [vmem:[#allocation11_spill] sm:$0xff] }
 0x972   :  { %v2920_v21 = vmul.f32 %v4797_v33, %v7589_v1  ;;  %v4799_v53 = vpop.eup %4798  ;;  %v8054_v1 = vld [vmem:[%s9166_s3 + $0x1e8] ss:$16 sps:$4 sm:$0xff]   ;;  %v9815_v33 = vld [vmem:[#allocation12_spill] sm:$0xff] }
 0x973   :  { %v8201_v42 = vld [vmem:[%s9166_s3 + $0x2a8] ss:$16 sps:$4 sm:$0xff]  }
 0x974   :  { %v8039_v0 = vadd.f32 %v2921_v54, %v2920_v21  ;;  %9814 = vst [vmem:[#allocation25_spill] sm:$0xff] %v8201_v42  ;;  %v9817_v54 = vld [vmem:[#allocation13_spill] sm:$0xff] }
 0x975   :  { %v8215_v21 = vld [vmem:[%s9166_s3 + $0x288] ss:$16 sps:$4 sm:$0xff]  }
 0x976   :  { %4800 = vtanh.f32 %v8039_v0  ;;  %9818 = vst [vmem:[#allocation27_spill] sm:$0xff] %v8215_v21 }
 0x983   :  { %v4801_v16 = vpop.eup %4800 }
 0x984   :  { %v8042_v56 = vmul.f32 %v4801_v16, %v4799_v53  ;;  %v9819_v53 = vld [vmem:[#allocation14_spill] sm:$0xff]  ;;  %v8222_v16 = vld [vmem:[%s9166_s3 + $0x26c] ss:$16 sps:$4 sm:$0xff]  }
 0x985   :  { %9820 = vst [vmem:[#allocation28_spill] sm:$0xff] %v8222_v16 }
 0x986   :  { %9800 = vst [vmem:[#allocation22_spill] sm:$0xff] %v8042_v56  ;;  %v8046_v60 = vpack.c.bf16 %v8042_v56, %v8042_v56  ;;  %v8341_v56 = vld [vmem:[%s9168_s4 + $0xa0] ss:$16 sps:$4 sm:$0xff]  }
 0x987   :  { %9845 = vst [vmem:[#allocation46_spill] sm:$0xff] %v8341_v56 }
 0x988   :  { %2962 = vmatmul.mubr.bf16.vlgmr.msra.gmra.mxu0 %v8046_v60  ;;  %3003 = vmatmul.mubr.bf16.vlgmr.msra.gmra.mxu1 %v8046_v60 }
 0x989   :  { %3016 = vmatpush1.bf16.msra.mxu0 %v7603_v36  ;;  %3057 = vmatpush1.bf16.msra.mxu1 %v8054_v1  ;;  %v8070_v36 = vld [vmem:[%s9166_s3 + $0x1c8] ss:$16 sps:$4 sm:$0xff]  }
 0x98a   :  { %3017 = vmatprep.subr.bf16.mxu0 %v7610_v24  ;;  %3058 = vmatprep.subr.bf16.mxu1 %v8061_v52  ;;  %v8077_v24 = vld [vmem:[%s9166_s3 + $0x1ac] ss:$16 sps:$4 sm:$0xff]  }
 0x98b   :  { %3047 = vmatprep.mubr.bf16.mxu0 %v9478_v48  ;;  %3088 = vmatprep.mubr.bf16.mxu1 %v9478_v48 }
 0x98d   :  { %3018 = vmatpush1.bf16.msra.mxu0 %v7619_v47  ;;  %3059 = vmatpush1.bf16.msra.mxu1 %v8070_v36  ;;  %v8084_v47 = vld [vmem:[%s9166_s3 + $0x1a8] ss:$16 sps:$4 sm:$0xff]  }
 0x98e   :  { %3019 = vmatprep.subr.bf16.mxu0 %v7626_v50  ;;  %3060 = vmatprep.subr.bf16.mxu1 %v8077_v24  ;;  %v8091_v50 = vld [vmem:[%s9166_s3 + $0x18c] ss:$16 sps:$4 sm:$0xff]  }
 0x991   :  { %3020 = vmatpush1.bf16.msra.mxu0 %v7633_v22  ;;  %3061 = vmatpush1.bf16.msra.mxu1 %v8084_v47  ;;  %v8098_v22 = vld [vmem:[%s9166_s3 + $0x188] ss:$16 sps:$4 sm:$0xff]  }
 0x992   :  { %3021 = vmatprep.subr.bf16.mxu0 %v7640_v39  ;;  %3062 = vmatprep.subr.bf16.mxu1 %v8091_v50  ;;  %v8105_v39 = vld [vmem:[%s9166_s3 + $0x16c] ss:$16 sps:$4 sm:$0xff]  }
 0x995   :  { %3022 = vmatpush1.bf16.msra.mxu0 %v7647_v41  ;;  %3063 = vmatpush1.bf16.msra.mxu1 %v8098_v22  ;;  %v8112_v41 = vld [vmem:[%s9166_s3 + $0x168] ss:$16 sps:$4 sm:$0xff]  }
 0x996   :  { %3023 = vmatprep.subr.bf16.mxu0 %v7654_v35  ;;  %3064 = vmatprep.subr.bf16.mxu1 %v8105_v39  ;;  %v8119_v35 = vld [vmem:[%s9166_s3 + $0x14c] ss:$16 sps:$4 sm:$0xff]  }
 0x999   :  { %3024 = vmatpush1.bf16.msra.mxu0 %v7661_v5  ;;  %3065 = vmatpush1.bf16.msra.mxu1 %v8112_v41  ;;  %v8126_v5 = vld [vmem:[%s9166_s3 + $0x148] ss:$16 sps:$4 sm:$0xff]  }
 0x99a   :  { %3025 = vmatprep.subr.bf16.mxu0 %v7668_v6  ;;  %3066 = vmatprep.subr.bf16.mxu1 %v8119_v35  ;;  %v8133_v6 = vld [vmem:[%s9166_s3 + $0x12c] ss:$16 sps:$4 sm:$0xff]  }
 0x99d   :  { %3026 = vmatpush1.bf16.msra.mxu0 %v9801_v4  ;;  %3067 = vmatpush1.bf16.msra.mxu1 %v8126_v5  ;;  %v9821_v4 = vld [vmem:[#allocation15_spill] sm:$0xff] }
 0x99e   :  { %3027 = vmatprep.subr.bf16.mxu0 %v9802_v37  ;;  %3068 = vmatprep.subr.bf16.mxu1 %v8133_v6  ;;  %v8229_v37 = vld [vmem:[%s9166_s3 + $0x268] ss:$16 sps:$4 sm:$0xff]  }
 0x99f   :  { %9822 = vst [vmem:[#allocation29_spill] sm:$0xff] %v8229_v37 }
 0x9a1   :  { %3028 = vmatpush1.bf16.msra.mxu0 %v9803_v14  ;;  %3069 = vmatpush1.bf16.msra.mxu1 %v8140_v55  ;;  %v9823_v14 = vld [vmem:[#allocation16_spill] sm:$0xff] }
 0x9a2   :  { %3029 = vmatprep.subr.bf16.mxu0 %v9804_v34  ;;  %3070 = vmatprep.subr.bf16.mxu1 %v8150_v10  ;;  %v9825_v34 = vld [vmem:[#allocation17_spill] sm:$0xff] }
 0x9a5   :  { %3030 = vmatpush1.bf16.msra.mxu0 %v9805_v49  ;;  %3071 = vmatpush1.bf16.msra.mxu1 %v8157_v62  ;;  %v9827_v49 = vld [vmem:[#allocation18_spill] sm:$0xff] }
 0x9a6   :  { %3101 = vmatprep.subr.bf16.mxu0 %v9806_v27  ;;  %3142 = vmatprep.subr.bf16.mxu1 %v8164_v12  ;;  %v8250_v27 = vld [vmem:[%s9166_s3 + $0x22c] ss:$16 sps:$4 sm:$0xff]  }
 0x9a7   :  { %9828 = vst [vmem:[#allocation32_spill] sm:$0xff] %v8250_v27 }
 0x9a8   :  { %3048 = vmatmul.mubr.bf16.vlgmr.msra.gmra.mxu0 %v2927_v19  ;;  %3089 = vmatmul.mubr.bf16.vlgmr.msra.gmra.mxu1 %v2927_v19  ;;  %v8243_v19 = vld [vmem:[%s9166_s3 + $0x248] ss:$16 sps:$4 sm:$0xff]  }
 0x9a9   :  { %3102 = vmatpush1.bf16.msra.mxu0 %v9807_v31  ;;  %3143 = vmatpush1.bf16.msra.mxu1 %v8171_v7  ;;  %9826 = vst [vmem:[#allocation31_spill] sm:$0xff] %v8243_v19  ;;  %v9829_v31 = vld [vmem:[#allocation19_spill] sm:$0xff] }
 0x9aa   :  { %3103 = vmatprep.subr.bf16.mxu0 %v9808_v9  ;;  %3144 = vmatprep.subr.bf16.mxu1 %v8178_v44  ;;  %v8257_v9 = vld [vmem:[%s9166_s3 + $0x228] ss:$16 sps:$4 sm:$0xff]  }
 0x9ab   :  { %3133 = vmatprep.mubr.bf16.mxu0 %v9478_v48  ;;  %3174 = vmatprep.mubr.bf16.mxu1 %v9478_v48  ;;  %9830 = vst [vmem:[#allocation33_spill] sm:$0xff] %v8257_v9 }
 0x9ad   :  { %3104 = vmatpush1.bf16.msra.mxu0 %v9809_v63  ;;  %3145 = vmatpush1.bf16.msra.mxu1 %v8187_v15  ;;  %v9831_v63 = vld [vmem:[#allocation20_spill] sm:$0xff] }
 0x9ae   :  { %3105 = vmatprep.subr.bf16.mxu0 %v9811_v32  ;;  %3146 = vmatprep.subr.bf16.mxu1 %v8194_v3  ;;  %v8264_v32 = vld [vmem:[%s9166_s3 + $0x20c] ss:$16 sps:$4 sm:$0xff]  }
 0x9af   :  { %9832 = vst [vmem:[#allocation34_spill] sm:$0xff] %v8264_v32 }
 0x9b1   :  { %3106 = vmatpush1.bf16.msra.mxu0 %v9813_v45  ;;  %3147 = vmatpush1.bf16.msra.mxu1 %v8201_v42  ;;  %v9833_v45 = vld [vmem:[#allocation21_spill] sm:$0xff] }
 0x9b2   :  { %3107 = vmatprep.subr.bf16.mxu0 %v9815_v33  ;;  %3148 = vmatprep.subr.bf16.mxu1 %v8208_v40  ;;  %v8271_v33 = vld [vmem:[%s9166_s3 + $0x208] ss:$16 sps:$4 sm:$0xff]  }
 0x9b3   :  { %9834 = vst [vmem:[#allocation35_spill] sm:$0xff] %v8271_v33 }
 0x9b5   :  { %3108 = vmatpush1.bf16.msra.mxu0 %v9817_v54  ;;  %3149 = vmatpush1.bf16.msra.mxu1 %v8215_v21  ;;  %v8277_v54 = vld [vmem:[%s9168_s4 + $0xe4] ss:$16 sps:$4 sm:$0xff]  }
 0x9b6   :  { %3109 = vmatprep.subr.bf16.mxu0 %v9819_v53  ;;  %3150 = vmatprep.subr.bf16.mxu1 %v8222_v16  ;;  %9835 = vst [vmem:[#allocation37_spill] sm:$0xff] %v8277_v54  ;;  %v8283_v53 = vld [vmem:[%s9168_s4 + $0xec] ss:$16 sps:$4 sm:$0xff]  }
 0x9b7   :  { %9836 = vst [vmem:[#allocation38_spill] sm:$0xff] %v8283_v53 }
 0x9b9   :  { %3110 = vmatpush1.bf16.msra.mxu0 %v9821_v4  ;;  %3151 = vmatpush1.bf16.msra.mxu1 %v8229_v37  ;;  %v8291_v4 = vld [vmem:[%s9168_s4 + $0xe0] ss:$16 sps:$4 sm:$0xff]  }
 0x9ba   :  { %3111 = vmatprep.subr.bf16.mxu0 %v9823_v14  ;;  %3152 = vmatprep.subr.bf16.mxu1 %v8236_v59  ;;  %9837 = vst [vmem:[#allocation39_spill] sm:$0xff] %v8291_v4  ;;  %v8297_v14 = vld [vmem:[%s9168_s4 + $0xe8] ss:$16 sps:$4 sm:$0xff]  }
 0x9bb   :  { %9838 = vst [vmem:[#allocation40_spill] sm:$0xff] %v8297_v14 }
 0x9bd   :  { %3112 = vmatpush1.bf16.msra.mxu0 %v9825_v34  ;;  %3153 = vmatpush1.bf16.msra.mxu1 %v8243_v19  ;;  %v8303_v34 = vld [vmem:[%s9168_s4 + $0xc4] ss:$16 sps:$4 sm:$0xff]  }
 0x9be   :  { %3113 = vmatprep.subr.bf16.mxu0 %v9827_v49  ;;  %3154 = vmatprep.subr.bf16.mxu1 %v8250_v27  ;;  %9839 = vst [vmem:[#allocation42_spill] sm:$0xff] %v8303_v34  ;;  %v8317_v49 = vld [vmem:[%s9168_s4 + $0xc0] ss:$16 sps:$4 sm:$0xff]  }
 0x9bf   :  { %9841 = vst [vmem:[#allocation44_spill] sm:$0xff] %v8317_v49 }
 0x9c1   :  { %3114 = vmatpush1.bf16.msra.mxu0 %v9829_v31  ;;  %3155 = vmatpush1.bf16.msra.mxu1 %v8257_v9  ;;  %v8323_v31 = vld [vmem:[%s9168_s4 + $0xc8] ss:$16 sps:$4 sm:$0xff]  }
 0x9c2   :  { %3115 = vmatprep.subr.bf16.mxu0 %v9831_v63  ;;  %3156 = vmatprep.subr.bf16.mxu1 %v8264_v32  ;;  %9842 = vst [vmem:[#allocation45_spill] sm:$0xff] %v8323_v31  ;;  %v8329_v63 = vld [vmem:[%s9168_s4 + $0xa4] ss:$16 sps:$4 sm:$0xff]  }
 0x9c3   :  { %9843 = vst [vmem:[#allocation36_spill] sm:$0xff] %v8329_v63 }
 0x9c5   :  { %3116 = vmatpush1.bf16.msra.mxu0 %v9833_v45  ;;  %3157 = vmatpush1.bf16.msra.mxu1 %v8271_v33  ;;  %v8335_v45 = vld [vmem:[%s9168_s4 + $0xac] ss:$16 sps:$4 sm:$0xff]  }
 0x9c6   :  { %3212 = vmatprep.subr.bf16.mxu0 %v8277_v54  ;;  %3253 = vmatprep.subr.bf16.mxu1 %v8283_v53  ;;  %9844 = vst [vmem:[#allocation41_spill] sm:$0xff] %v8335_v45 }
 0x9c8   :  { %3134 = vmatmul.mubr.bf16.vlgmr.msra.gmra.mxu0 %v7870_v20  ;;  %3175 = vmatmul.mubr.bf16.vlgmr.msra.gmra.mxu1 %v7870_v20  ;;  %v8309_v20 = vld [vmem:[%s9168_s4 + $0xcc] ss:$16 sps:$4 sm:$0xff]  }
 0x9c9   :  { %3213 = vmatpush1.bf16.msra.mxu0 %v8291_v4  ;;  %3254 = vmatpush1.bf16.msra.mxu1 %v8297_v14  ;;  %9840 = vst [vmem:[#allocation43_spill] sm:$0xff] %v8309_v20 }
 0x9ca   :  { %3214 = vmatprep.subr.bf16.mxu0 %v8303_v34  ;;  %3255 = vmatprep.subr.bf16.mxu1 %v8309_v20 }
 0x9cb   :  { %3244 = vmatprep.mubr.bf16.mxu0 %v9478_v48  ;;  %3285 = vmatprep.mubr.bf16.mxu1 %v9478_v48 }
 0x9cd   :  { %3215 = vmatpush1.bf16.msra.mxu0 %v8317_v49  ;;  %3256 = vmatpush1.bf16.msra.mxu1 %v8323_v31  ;;  %v8347_v31 = vld [vmem:[%s9168_s4 + $0xa8] ss:$16 sps:$4 sm:$0xff]  }
 0x9ce   :  { %3216 = vmatprep.subr.bf16.mxu0 %v8329_v63  ;;  %3257 = vmatprep.subr.bf16.mxu1 %v8335_v45  ;;  %9846 = vst [vmem:[#allocation47_spill] sm:$0xff] %v8347_v31  ;;  %v8353_v63 = vld [vmem:[%s9168_s4 + $0x84] ss:$16 sps:$4 sm:$0xff]   ;;  %v8359_v45 = vld [vmem:[%s9168_s4 + $0x8c] ss:$16 sps:$4 sm:$0xff]  }
 0x9cf   :  { %9847 = vst [vmem:[#allocation48_spill] sm:$0xff] %v8353_v63  ;;  %9848 = vst [vmem:[#allocation49_spill] sm:$0xff] %v8359_v45 }
 0x9d1   :  { %3217 = vmatpush1.bf16.msra.mxu0 %v8341_v56  ;;  %3258 = vmatpush1.bf16.msra.mxu1 %v8347_v31  ;;  %v8365_v56 = vld [vmem:[%s9168_s4 + $0x80] ss:$16 sps:$4 sm:$0xff]   ;;  %v8371_v31 = vld [vmem:[%s9168_s4 + $0x88] ss:$16 sps:$4 sm:$0xff]  }
 0x9d2   :  { %3218 = vmatprep.subr.bf16.mxu0 %v8353_v63  ;;  %3259 = vmatprep.subr.bf16.mxu1 %v8359_v45  ;;  %9849 = vst [vmem:[#allocation50_spill] sm:$0xff] %v8365_v56  ;;  %9850 = vst [vmem:[#allocation51_spill] sm:$0xff] %v8371_v31  ;;  %v8377_v63 = vld [vmem:[%s9168_s4 + $0x64] ss:$16 sps:$4 sm:$0xff]   ;;  %v8383_v45 = vld [vmem:[%s9168_s4 + $0x6c] ss:$16 sps:$4 sm:$0xff]  }
 0x9d3   :  { %9851 = vst [vmem:[#allocation52_spill] sm:$0xff] %v8377_v63  ;;  %9852 = vst [vmem:[#allocation53_spill] sm:$0xff] %v8383_v45 }
 0x9d5   :  { %3219 = vmatpush1.bf16.msra.mxu0 %v8365_v56  ;;  %3260 = vmatpush1.bf16.msra.mxu1 %v8371_v31  ;;  %v8389_v56 = vld [vmem:[%s9168_s4 + $0x60] ss:$16 sps:$4 sm:$0xff]   ;;  %v8395_v31 = vld [vmem:[%s9168_s4 + $0x68] ss:$16 sps:$4 sm:$0xff]  }
 0x9d6   :  { %3220 = vmatprep.subr.bf16.mxu0 %v8377_v63  ;;  %3261 = vmatprep.subr.bf16.mxu1 %v8383_v45  ;;  %9853 = vst [vmem:[#allocation54_spill] sm:$0xff] %v8389_v56  ;;  %9854 = vst [vmem:[#allocation55_spill] sm:$0xff] %v8395_v31  ;;  %v8401_v63 = vld [vmem:[%s9168_s4 + $0x44] ss:$16 sps:$4 sm:$0xff]   ;;  %v8407_v45 = vld [vmem:[%s9168_s4 + $0x4c] ss:$16 sps:$4 sm:$0xff]  }
 0x9d7   :  { %9855 = vst [vmem:[#allocation56_spill] sm:$0xff] %v8401_v63  ;;  %9856 = vst [vmem:[#allocation57_spill] sm:$0xff] %v8407_v45 }
 0x9d9   :  { %3221 = vmatpush1.bf16.msra.mxu0 %v8389_v56  ;;  %3262 = vmatpush1.bf16.msra.mxu1 %v8395_v31  ;;  %v8413_v56 = vld [vmem:[%s9168_s4 + $0x40] ss:$16 sps:$4 sm:$0xff]   ;;  %v8419_v31 = vld [vmem:[%s9168_s4 + $0x48] ss:$16 sps:$4 sm:$0xff]  }
 0x9da   :  { %3222 = vmatprep.subr.bf16.mxu0 %v8401_v63  ;;  %3263 = vmatprep.subr.bf16.mxu1 %v8407_v45  ;;  %9857 = vst [vmem:[#allocation58_spill] sm:$0xff] %v8413_v56  ;;  %9858 = vst [vmem:[#allocation59_spill] sm:$0xff] %v8419_v31  ;;  %v8425_v63 = vld [vmem:[%s9168_s4 + $0x24] ss:$16 sps:$4 sm:$0xff]   ;;  %v8431_v45 = vld [vmem:[%s9168_s4 + $0x2c] ss:$16 sps:$4 sm:$0xff]  }
 0x9db   :  { %9859 = vst [vmem:[#allocation60_spill] sm:$0xff] %v8425_v63  ;;  %9860 = vst [vmem:[#allocation61_spill] sm:$0xff] %v8431_v45 }
 0x9dd   :  { %3223 = vmatpush1.bf16.msra.mxu0 %v8413_v56  ;;  %3264 = vmatpush1.bf16.msra.mxu1 %v8419_v31  ;;  %v8437_v56 = vld [vmem:[%s9168_s4 + $0x20] ss:$16 sps:$4 sm:$0xff]   ;;  %v8443_v31 = vld [vmem:[%s9168_s4 + $0x28] ss:$16 sps:$4 sm:$0xff]  }
 0x9de   :  { %3224 = vmatprep.subr.bf16.mxu0 %v8425_v63  ;;  %3265 = vmatprep.subr.bf16.mxu1 %v8431_v45  ;;  %9861 = vst [vmem:[#allocation62_spill] sm:$0xff] %v8437_v56  ;;  %9862 = vst [vmem:[#allocation63_spill] sm:$0xff] %v8443_v31  ;;  %v8449_v63 = vld [vmem:[%s9168_s4 + $0x4] ss:$16 sps:$4 sm:$0xff]   ;;  %v8455_v45 = vld [vmem:[%s9168_s4 + $0xc] ss:$16 sps:$4 sm:$0xff]  }
 0x9df   :  { %9863 = vst [vmem:[#allocation64_spill] sm:$0xff] %v8449_v63  ;;  %9864 = vst [vmem:[#allocation65_spill] sm:$0xff] %v8455_v45 }
 0x9e1   :  { %3225 = vmatpush1.bf16.msra.mxu0 %v8437_v56  ;;  %3266 = vmatpush1.bf16.msra.mxu1 %v8443_v31  ;;  %v8461_v56 = vld [vmem:[%s9168_s4] ss:$16 sps:$4 sm:$0xff]   ;;  %v8467_v31 = vld [vmem:[%s9168_s4 + $0x8] ss:$16 sps:$4 sm:$0xff]  }
 0x9e2   :  { %3226 = vmatprep.subr.bf16.mxu0 %v8449_v63  ;;  %3267 = vmatprep.subr.bf16.mxu1 %v8455_v45  ;;  %9865 = vst [vmem:[#allocation66_spill] sm:$0xff] %v8461_v56  ;;  %9866 = vst [vmem:[#allocation67_spill] sm:$0xff] %v8467_v31  ;;  %v8473_v63 = vld [vmem:[%s9168_s4 + $0x1e4] ss:$16 sps:$4 sm:$0xff]   ;;  %v8479_v45 = vld [vmem:[%s9168_s4 + $0x1ec] ss:$16 sps:$4 sm:$0xff]  }
 0x9e3   :  { %9867 = vst [vmem:[#allocation68_spill] sm:$0xff] %v8473_v63  ;;  %9868 = vst [vmem:[#allocation69_spill] sm:$0xff] %v8479_v45 }
 0x9e5   :  { %3227 = vmatpush1.bf16.msra.mxu0 %v8461_v56  ;;  %3268 = vmatpush1.bf16.msra.mxu1 %v8467_v31 }
 0x9e6   :  { %3298 = vmatprep.subr.bf16.mxu0 %v8473_v63  ;;  %3339 = vmatprep.subr.bf16.mxu1 %v8479_v45  ;;  %v8485_v45 = vld [vmem:[%s9169_s1] sm:$0xff] }
 0x9e7   :  { %9869 = vst [vmem:[#allocation70_spill] sm:$0xff] %v8485_v45 }
 0xa48   :  { %v2963_v56 = vpop.f32.mrf.mxu0  ;;  %v3004_v49 = vpop.f32.mrf.mxu1 }
 0xa49   :  { %v3011_v37 = vadd.f32 %v8485_v45, %v2963_v56 }
 0xa4a   :  { %v2965_v20 = vpop.f32.mrf.mxu0  ;;  %v3006_v34 = vpop.f32.mrf.mxu1 }
 0xa4c   :  { %v2967_v14 = vpop.f32.mrf.mxu0  ;;  %v3008_v31 = vpop.f32.mrf.mxu1 }
 0xa4e   :  { %v2968_v4 = vpop.f32.mrf.mxu0  ;;  %v3009_v53 = vpop.f32.mrf.mxu1 }
 0xa4f   :  { %v8491_v4 = vld [vmem:[%s9169_s1 + $0x8] sm:$0xff] }
 0xa50   :  { %v3012_v53 = vadd.f32 %v8491_v4, %v2965_v20  ;;  %v8497_v20 = vld [vmem:[%s9169_s1 + $0x18] sm:$0xff] }
 0xa68   :  { %v3049_v54 = vpop.f32.mrf.mxu0  ;;  %v3090_v33 = vpop.f32.mrf.mxu1 }
 0xa69   :  { %v3097_v14 = vadd.f32 %v3049_v54, %v3011_v37  ;;  %v3014_v37 = vadd.f32 %v8497_v20, %v3006_v34 }
 0xa6a   :  { %v3051_v32 = vpop.f32.mrf.mxu0  ;;  %v3092_v9 = vpop.f32.mrf.mxu1 }
 0xa6c   :  { %v3053_v63 = vpop.f32.mrf.mxu0  ;;  %v3094_v27 = vpop.f32.mrf.mxu1 }
 0xa6d   :  { %v3098_v27 = vadd.f32 %v3051_v32, %v3012_v53  ;;  %v3100_v32 = vadd.f32 %v3092_v9, %v3014_v37  ;;  %v8503_v53 = vld [vmem:[%s9169_s1 + $0x10] sm:$0xff] }
 0xa6e   :  { %v3054_v19 = vpop.f32.mrf.mxu0  ;;  %v3095_v59 = vpop.f32.mrf.mxu1 }
 0xa88   :  { %v3135_v31 = vpop.f32.mrf.mxu0  ;;  %v3176_v63 = vpop.f32.mrf.mxu1 }
 0xa89   :  { %v3183_v19 = vadd.f32 %v3135_v31, %v3097_v14 }
 0xa8a   :  { %v3137_v59 = vpop.f32.mrf.mxu0  ;;  %v3178_v16 = vpop.f32.mrf.mxu1 }
 0xa8b   :  { %v4370_v21 = vmul.f32 -1.442695, %v3183_v19  ;;  %v3184_v40 = vadd.f32 %v3137_v59, %v3098_v27  ;;  %v3186_v54 = vadd.f32 %v3178_v16, %v3100_v32 }
 0xa8c   :  { %v3139_v42 = vpop.f32.mrf.mxu0  ;;  %v3180_v3 = vpop.f32.mrf.mxu1 }
 0xa8d   :  { %4802 = vpow2.f32 %v4370_v21  ;;  %v4371_v56 = vmul.f32 -1.442695, %v3184_v40  ;;  %v3013_v3 = vadd.f32 %v8503_v53, %v3004_v49  ;;  %v4372_v40 = vmul.f32 -1.442695, %v3186_v54  ;;  %v8517_v54 = vld [vmem:[%s9168_s4 + $0x1e0] ss:$16 sps:$4 sm:$0xff]  }
 0xa8e   :  { %v3140_v45 = vpop.f32.mrf.mxu0  ;;  %v3181_v15 = vpop.f32.mrf.mxu1 }
 0xa8f   :  { %4804 = vpow2.f32 %v4371_v56  ;;  %v3099_v42 = vadd.f32 %v3090_v33, %v3013_v3  ;;  %v8529_v3 = vld [vmem:[%s9168_s4 + $0x1c4] ss:$16 sps:$4 sm:$0xff]  }
 0xa90   :  { %4806 = vpow2.f32 %v4372_v40  ;;  %v8543_v40 = vld [vmem:[%s9168_s4 + $0x1c0] ss:$16 sps:$4 sm:$0xff]  }
 0xa91   :  { %v3185_v21 = vadd.f32 %v3176_v63, %v3099_v42  ;;  %v8535_v42 = vld [vmem:[%s9168_s4 + $0x1cc] ss:$16 sps:$4 sm:$0xff]  }
 0xa9a   :  { %v4803_v15 = vpop.eup %4802 }
 0xa9b   :  { %v3190_v45 = vadd.f32 1.0, %v4803_v15  ;;  %v8549_v15 = vld [vmem:[%s9168_s4 + $0x1c8] ss:$16 sps:$4 sm:$0xff]  }
 0xa9c   :  { %v4805_v14 = vpop.eup %4804 }
 0xa9d   :  { %4808 = vrcp.f32 %v3190_v45  ;;  %v3196_v31 = vadd.f32 1.0, %v4805_v14  ;;  %v4807_v9 = vpop.eup %4806  ;;  %v8561_v45 = vld [vmem:[%s9168_s4 + $0x1ac] ss:$16 sps:$4 sm:$0xff]   ;;  %v8567_v14 = vld [vmem:[%s9168_s4 + $0x1a0] ss:$16 sps:$4 sm:$0xff]  }
 0xa9e   :  { %4810 = vtanh.f32 %v3185_v21  ;;  %v3203_v19 = vadd.f32 1.0, %v4807_v9  ;;  %v8555_v21 = vld [vmem:[%s9168_s4 + $0x1a4] ss:$16 sps:$4 sm:$0xff]  }
 0xa9f   :  { %4812 = vrcp.f32 %v3196_v31  ;;  %v8573_v31 = vld [vmem:[%s9168_s4 + $0x1a8] ss:$16 sps:$4 sm:$0xff]   ;;  %v8579_v9 = vld [vmem:[%s9168_s4 + $0x184] ss:$16 sps:$4 sm:$0xff]  }
 0xaa0   :  { %4814 = vrcp.f32 %v3203_v19  ;;  %v8603_v19 = vld [vmem:[%s9168_s4 + $0x164] ss:$16 sps:$4 sm:$0xff]  }
 0xaaa   :  { %v4809_v16 = vpop.eup %4808 }
 0xaab   :  { %v4811_v34 = vpop.eup %4810 }
 0xaac   :  { %v4813_v27 = vpop.eup %4812  ;;  %v3207_v59 = vmul.f32 %v4811_v34, %v4809_v16  ;;  %v8585_v16 = vld [vmem:[%s9168_s4 + $0x18c] ss:$16 sps:$4 sm:$0xff]   ;;  %v8591_v34 = vld [vmem:[%s9168_s4 + $0x180] ss:$16 sps:$4 sm:$0xff]  }
 0xaad   :  { %v3206_v56 = vmul.f32 %v4813_v27, %v7867_v46  ;;  %v4815_v33 = vpop.eup %4814  ;;  %v8523_v46 = vld [vmem:[%s9168_s4 + $0x1e8] ss:$16 sps:$4 sm:$0xff]  }
 0xaae   :  { %v8597_v27 = vld [vmem:[%s9168_s4 + $0x188] ss:$16 sps:$4 sm:$0xff]  }
 0xaaf   :  { %v8507_v49 = vadd.f32 %v3207_v59, %v3206_v56  ;;  %v8609_v59 = vld [vmem:[%s9168_s4 + $0x16c] ss:$16 sps:$4 sm:$0xff]   ;;  %v8615_v56 = vld [vmem:[%s9168_s4 + $0x160] ss:$16 sps:$4 sm:$0xff]  }
 0xab0   :  { %9870 = vst [vmem:[#allocation71_spill] sm:$0xff] %v8615_v56 }
 0xab1   :  { %4816 = vtanh.f32 %v8507_v49 }
 0xabe   :  { %v4817_v63 = vpop.eup %4816 }
 0xabf   :  { %v3210_v37 = vmul.f32 %v4817_v63, %v4815_v33  ;;  %v8621_v33 = vld [vmem:[%s9168_s4 + $0x168] ss:$16 sps:$4 sm:$0xff]   ;;  %v8627_v63 = vld [vmem:[%s9168_s4 + $0x144] ss:$16 sps:$4 sm:$0xff]  }
 0xac0   :  { %9871 = vst [vmem:[#allocation72_spill] sm:$0xff] %v8621_v33  ;;  %9872 = vst [vmem:[#allocation73_spill] sm:$0xff] %v8627_v63 }
 0xac1   :  { %v8510_v32 = vpack.c.bf16 %v3210_v37, %v3210_v37  ;;  %v8633_v37 = vld [vmem:[%s9168_s4 + $0x14c] ss:$16 sps:$4 sm:$0xff]  }
 0xac2   :  { %9873 = vst [vmem:[#allocation74_spill] sm:$0xff] %v8633_v37 }
 0xac3   :  { %3245 = vmatmul.mubr.bf16.vlgmr.msra.gmra.mxu0 %v8510_v32  ;;  %3286 = vmatmul.mubr.bf16.vlgmr.msra.gmra.mxu1 %v8510_v32 }
 0xac4   :  { %3299 = vmatpush1.bf16.msra.mxu0 %v8517_v54  ;;  %3340 = vmatpush1.bf16.msra.mxu1 %v8523_v46 }
 0xac5   :  { %3300 = vmatprep.subr.bf16.mxu0 %v8529_v3  ;;  %3341 = vmatprep.subr.bf16.mxu1 %v8535_v42 }
 0xac6   :  { %3330 = vmatprep.mubr.bf16.mxu0 %v9478_v48  ;;  %3371 = vmatprep.mubr.bf16.mxu1 %v9478_v48 }
 0xac8   :  { %3301 = vmatpush1.bf16.msra.mxu0 %v8543_v40  ;;  %3342 = vmatpush1.bf16.msra.mxu1 %v8549_v15 }
 0xac9   :  { %3302 = vmatprep.subr.bf16.mxu0 %v8555_v21  ;;  %3343 = vmatprep.subr.bf16.mxu1 %v8561_v45 }
 0xacc   :  { %3303 = vmatpush1.bf16.msra.mxu0 %v8567_v14  ;;  %3344 = vmatpush1.bf16.msra.mxu1 %v8573_v31 }
 0xacd   :  { %3304 = vmatprep.subr.bf16.mxu0 %v8579_v9  ;;  %3345 = vmatprep.subr.bf16.mxu1 %v8585_v16 }
 0xad0   :  { %3305 = vmatpush1.bf16.msra.mxu0 %v8591_v34  ;;  %3346 = vmatpush1.bf16.msra.mxu1 %v8597_v27 }
 0xad1   :  { %3306 = vmatprep.subr.bf16.mxu0 %v8603_v19  ;;  %3347 = vmatprep.subr.bf16.mxu1 %v8609_v59 }
 0xad4   :  { %3307 = vmatpush1.bf16.msra.mxu0 %v8615_v56  ;;  %3348 = vmatpush1.bf16.msra.mxu1 %v8621_v33  ;;  %v8639_v56 = vld [vmem:[%s9168_s4 + $0x140] ss:$16 sps:$4 sm:$0xff]   ;;  %v8645_v33 = vld [vmem:[%s9168_s4 + $0x148] ss:$16 sps:$4 sm:$0xff]  }
 0xad5   :  { %3308 = vmatprep.subr.bf16.mxu0 %v8627_v63  ;;  %3349 = vmatprep.subr.bf16.mxu1 %v8633_v37  ;;  %9874 = vst [vmem:[#allocation75_spill] sm:$0xff] %v8639_v56  ;;  %9875 = vst [vmem:[#allocation76_spill] sm:$0xff] %v8645_v33  ;;  %v8651_v63 = vld [vmem:[%s9168_s4 + $0x124] ss:$16 sps:$4 sm:$0xff]   ;;  %v8657_v37 = vld [vmem:[%s9168_s4 + $0x12c] ss:$16 sps:$4 sm:$0xff]  }
 0xad6   :  { %9876 = vst [vmem:[#allocation77_spill] sm:$0xff] %v8651_v63  ;;  %9877 = vst [vmem:[#allocation79_spill] sm:$0xff] %v8657_v37 }
 0xad8   :  { %3309 = vmatpush1.bf16.msra.mxu0 %v8639_v56  ;;  %3350 = vmatpush1.bf16.msra.mxu1 %v8645_v33  ;;  %v8663_v56 = vld [vmem:[%s9168_s4 + $0x120] ss:$16 sps:$4 sm:$0xff]   ;;  %v8669_v33 = vld [vmem:[%s9168_s4 + $0x128] ss:$16 sps:$4 sm:$0xff]  }
 0xad9   :  { %3310 = vmatprep.subr.bf16.mxu0 %v8651_v63  ;;  %3351 = vmatprep.subr.bf16.mxu1 %v8657_v37  ;;  %9878 = vst [vmem:[#allocation80_spill] sm:$0xff] %v8663_v56  ;;  %9879 = vst [vmem:[#allocation81_spill] sm:$0xff] %v8669_v33  ;;  %v8675_v63 = vld [vmem:[%s9168_s4 + $0x104] ss:$16 sps:$4 sm:$0xff]   ;;  %v8681_v37 = vld [vmem:[%s9168_s4 + $0x10c] ss:$16 sps:$4 sm:$0xff]  }
 0xada   :  { %9880 = vst [vmem:[#allocation82_spill] sm:$0xff] %v8675_v63 }
 0xadc   :  { %3311 = vmatpush1.bf16.msra.mxu0 %v8663_v56  ;;  %3352 = vmatpush1.bf16.msra.mxu1 %v8669_v33  ;;  %v8687_v56 = vld [vmem:[%s9168_s4 + $0x100] ss:$16 sps:$4 sm:$0xff]   ;;  %v8693_v33 = vld [vmem:[%s9168_s4 + $0x108] ss:$16 sps:$4 sm:$0xff]  }
 0xadd   :  { %3312 = vmatprep.subr.bf16.mxu0 %v8675_v63  ;;  %3353 = vmatprep.subr.bf16.mxu1 %v8681_v37  ;;  %9881 = vst [vmem:[#allocation83_spill] sm:$0xff] %v8687_v56  ;;  %9882 = vst [vmem:[#allocation84_spill] sm:$0xff] %v8693_v33  ;;  %v5234_v63 = vld [vmem:[%s9166_s3 + $0xe4] ss:$16 sps:$4 sm:$0xff]  }
 0xae0   :  { %3313 = vmatpush1.bf16.msra.mxu0 %v8687_v56  ;;  %3354 = vmatpush1.bf16.msra.mxu1 %v8693_v33  ;;  %v5235_v56 = vld [vmem:[%s9166_s3 + $0xe0] ss:$16 sps:$4 sm:$0xff]   ;;  %v5236_v33 = vld [vmem:[%s9166_s3 + $0xc4] ss:$16 sps:$4 sm:$0xff]  }
 0xae1   :  { %3412 = vmatprep.subr.bf16.mxu0 %v5234_v63  ;;  %3453 = vmatprep.subr.bf16.mxu1 %v7910_v61  ;;  %v5237_v61 = vld [vmem:[%s9166_s3 + $0xc0] ss:$16 sps:$4 sm:$0xff]  }
 0xae3   :  { %3331 = vmatmul.mubr.bf16.vlgmr.msra.gmra.mxu0 %v8046_v60  ;;  %3372 = vmatmul.mubr.bf16.vlgmr.msra.gmra.mxu1 %v8046_v60  ;;  %v5240_v60 = vld [vmem:[%s9166_s3 + $0x84] ss:$16 sps:$4 sm:$0xff]  }
 0xae4   :  { %3413 = vmatpush1.bf16.msra.mxu0 %v5235_v56  ;;  %3454 = vmatpush1.bf16.msra.mxu1 %v7919_v43  ;;  %v5238_v43 = vld [vmem:[%s9166_s3 + $0xa4] ss:$16 sps:$4 sm:$0xff]  }
 0xae5   :  { %3414 = vmatprep.subr.bf16.mxu0 %v5236_v33  ;;  %3455 = vmatprep.subr.bf16.mxu1 %v7926_v13  ;;  %v5239_v13 = vld [vmem:[%s9166_s3 + $0xa0] ss:$16 sps:$4 sm:$0xff]  }
 0xae6   :  { %3444 = vmatprep.mubr.bf16.mxu0 %v9478_v48  ;;  %3485 = vmatprep.mubr.bf16.mxu1 %v9478_v48 }
 0xae8   :  { %3415 = vmatpush1.bf16.msra.mxu0 %v5237_v61  ;;  %3456 = vmatpush1.bf16.msra.mxu1 %v7935_v29  ;;  %v5241_v29 = vld [vmem:[%s9166_s3 + $0x80] ss:$16 sps:$4 sm:$0xff]  }
 0xae9   :  { %3416 = vmatprep.subr.bf16.mxu0 %v5238_v43  ;;  %3457 = vmatprep.subr.bf16.mxu1 %v7942_v51  ;;  %v5242_v51 = vld [vmem:[%s9166_s3 + $0x64] ss:$16 sps:$4 sm:$0xff]  }
 0xaec   :  { %3417 = vmatpush1.bf16.msra.mxu0 %v5239_v13  ;;  %3458 = vmatpush1.bf16.msra.mxu1 %v7949_v28  ;;  %v5243_v28 = vld [vmem:[%s9166_s3 + $0x60] ss:$16 sps:$4 sm:$0xff]  }
 0xaed   :  { %3418 = vmatprep.subr.bf16.mxu0 %v5240_v60  ;;  %3459 = vmatprep.subr.bf16.mxu1 %v7956_v38  ;;  %v5244_v38 = vld [vmem:[%s9166_s3 + $0x44] ss:$16 sps:$4 sm:$0xff]  }
 0xaf0   :  { %3419 = vmatpush1.bf16.msra.mxu0 %v5241_v29  ;;  %3460 = vmatpush1.bf16.msra.mxu1 %v7963_v18  ;;  %v5245_v18 = vld [vmem:[%s9166_s3 + $0x40] ss:$16 sps:$4 sm:$0xff]  }
 0xaf1   :  { %3420 = vmatprep.subr.bf16.mxu0 %v5242_v51  ;;  %3461 = vmatprep.subr.bf16.mxu1 %v7970_v11  ;;  %v5246_v11 = vld [vmem:[%s9166_s3 + $0x24] ss:$16 sps:$4 sm:$0xff]  }
 0xaf4   :  { %3421 = vmatpush1.bf16.msra.mxu0 %v5243_v28  ;;  %3462 = vmatpush1.bf16.msra.mxu1 %v7977_v58  ;;  %v5247_v58 = vld [vmem:[%s9166_s3 + $0x20] ss:$16 sps:$4 sm:$0xff]  }
 0xaf5   :  { %3422 = vmatprep.subr.bf16.mxu0 %v5244_v38  ;;  %3463 = vmatprep.subr.bf16.mxu1 %v7984_v30  ;;  %v5248_v30 = vld [vmem:[%s9166_s3 + $0x4] ss:$16 sps:$4 sm:$0xff]  }
 0xaf8   :  { %3423 = vmatpush1.bf16.msra.mxu0 %v5245_v18  ;;  %3464 = vmatpush1.bf16.msra.mxu1 %v7991_v26  ;;  %v5249_v26 = vld [vmem:[%s9166_s3 + $0x1e4] ss:$16 sps:$4 sm:$0xff]  }
 0xaf9   :  { %3424 = vmatprep.subr.bf16.mxu0 %v5246_v11  ;;  %3465 = vmatprep.subr.bf16.mxu1 %v7998_v2 }
 0xafc   :  { %3425 = vmatpush1.bf16.msra.mxu0 %v5247_v58  ;;  %3466 = vmatpush1.bf16.msra.mxu1 %v8005_v8 }
 0xafd   :  { %3426 = vmatprep.subr.bf16.mxu0 %v5248_v30  ;;  %3467 = vmatprep.subr.bf16.mxu1 %v8012_v25  ;;  %v8769_v25 = vld [vmem:[%s9170_s2] sm:$0xff] }
 0xb00   :  { %3427 = vmatpush1.bf16.msra.mxu0 %v8018_v23  ;;  %3468 = vmatpush1.bf16.msra.mxu1 %v8024_v57 }
 0xb01   :  { %3498 = vmatprep.subr.bf16.mxu0 %v5249_v26  ;;  %3539 = vmatprep.subr.bf16.mxu1 %v8031_v17  ;;  %v8775_v17 = vld [vmem:[%s9170_s2 + $0x8] sm:$0xff] }
 0xb83   :  { %v3246_v2 = vpop.f32.mrf.mxu0  ;;  %v3287_v8 = vpop.f32.mrf.mxu1 }
 0xb84   :  { %v3294_v23 = vadd.f32 %v8769_v25, %v3246_v2 }
 0xb85   :  { %v3248_v56 = vpop.f32.mrf.mxu0  ;;  %v3289_v33 = vpop.f32.mrf.mxu1 }
 0xb86   :  { %v3295_v29 = vadd.f32 %v8775_v17, %v3248_v56 }
 0xb87   :  { %v3250_v63 = vpop.f32.mrf.mxu0  ;;  %v3291_v61 = vpop.f32.mrf.mxu1 }
 0xb88   :  { %v8781_v61 = vld [vmem:[%s9170_s2 + $0x18] sm:$0xff] }
 0xb89   :  { %v3251_v43 = vpop.f32.mrf.mxu0  ;;  %v3292_v13 = vpop.f32.mrf.mxu1 }
 0xb8a   :  { %v3297_v43 = vadd.f32 %v8781_v61, %v3289_v33  ;;  %v8787_v13 = vld [vmem:[%s9170_s2 + $0x10] sm:$0xff] }
 0xba3   :  { %v3332_v57 = vpop.f32.mrf.mxu0  ;;  %v3373_v60 = vpop.f32.mrf.mxu1 }
 0xba4   :  { %v3380_v51 = vadd.f32 %v3332_v57, %v3294_v23  ;;  %v3296_v23 = vadd.f32 %v8787_v13, %v3287_v8 }
 0xba5   :  { %v3334_v28 = vpop.f32.mrf.mxu0  ;;  %v3375_v38 = vpop.f32.mrf.mxu1 }
 0xba6   :  { %v4373_v18 = vmul.f32 -1.442695, %v3380_v51  ;;  %v3381_v11 = vadd.f32 %v3334_v28, %v3295_v29  ;;  %v3383_v56 = vadd.f32 %v3375_v38, %v3297_v43  ;;  %v3382_v51 = vadd.f32 %v3373_v60, %v3296_v23 }
 0xba7   :  { %v3336_v58 = vpop.f32.mrf.mxu0  ;;  %v3377_v30 = vpop.f32.mrf.mxu1 }
 0xba8   :  { %4818 = vpow2.f32 %v4373_v18  ;;  %v4374_v26 = vmul.f32 -1.442695, %v3381_v11  ;;  %v4375_v57 = vmul.f32 -1.442695, %v3383_v56 }
 0xba9   :  { %v3337_v63 = vpop.f32.mrf.mxu0  ;;  %v3378_v2 = vpop.f32.mrf.mxu1 }
 0xbaa   :  { %4820 = vpow2.f32 %v4374_v26 }
 0xbab   :  { %4822 = vpow2.f32 %v4375_v57  ;;  %v5255_v57 = vld [vmem:[%s9166_s3 + $0x1c4] ss:$16 sps:$4 sm:$0xff]  }
 0xbb5   :  { %v4819_v29 = vpop.eup %4818 }
 0xbb6   :  { %v3387_v28 = vadd.f32 1.0, %v4819_v29  ;;  %v5256_v29 = vld [vmem:[%s9166_s3 + $0x1c0] ss:$16 sps:$4 sm:$0xff]  }
 0xbb7   :  { %v4821_v18 = vpop.eup %4820 }
 0xbb8   :  { %4824 = vrcp.f32 %v3387_v28  ;;  %v3393_v11 = vadd.f32 1.0, %v4821_v18  ;;  %v4823_v58 = vpop.eup %4822  ;;  %v9883_v18 = vld [vmem:[#allocation23_spill] sm:$0xff] }
 0xbb9   :  { %4826 = vtanh.f32 %v3382_v51  ;;  %v3400_v26 = vadd.f32 1.0, %v4823_v58  ;;  %v5259_v51 = vld [vmem:[%s9166_s3 + $0x184] ss:$16 sps:$4 sm:$0xff]   ;;  %v9885_v58 = vld [vmem:[#allocation25_spill] sm:$0xff] }
 0xbba   :  { %4828 = vrcp.f32 %v3393_v11  ;;  %v9884_v11 = vld [vmem:[#allocation24_spill] sm:$0xff] }
 0xbbb   :  { %4830 = vrcp.f32 %v3400_v26  ;;  %v9887_v26 = vld [vmem:[#allocation27_spill] sm:$0xff] }
 0xbc5   :  { %v4825_v33 = vpop.eup %4824 }
 0xbc6   :  { %v4827_v38 = vpop.eup %4826 }
 0xbc7   :  { %v4829_v30 = vpop.eup %4828  ;;  %v3404_v63 = vmul.f32 %v4827_v38, %v4825_v33  ;;  %v5275_v33 = vld [vmem:[%s9166_s3 + $0x284] ss:$16 sps:$4 sm:$0xff]  }
 0xbc8   :  { %v3403_v2 = vmul.f32 %v4829_v30, %v8039_v0  ;;  %v4831_v8 = vpop.eup %4830  ;;  %v5254_v0 = vld [vmem:[%s9166_s3 + $0x1e0] ss:$16 sps:$4 sm:$0xff]  }
 0xbc9   :  { %v9886_v38 = vld [vmem:[#allocation26_spill] sm:$0xff] }
 0xbca   :  { %v8791_v43 = vadd.f32 %v3404_v63, %v3403_v2  ;;  %v5276_v30 = vld [vmem:[%s9166_s3 + $0x280] ss:$16 sps:$4 sm:$0xff]   ;;  %v5277_v63 = vld [vmem:[%s9166_s3 + $0x264] ss:$16 sps:$4 sm:$0xff]  }
 0xbcb   :  { %v9888_v2 = vld [vmem:[#allocation28_spill] sm:$0xff] }
 0xbcc   :  { %4832 = vtanh.f32 %v8791_v43 }
 0xbd9   :  { %v4833_v60 = vpop.eup %4832 }
 0xbda   :  { %v8794_v56 = vmul.f32 %v4833_v60, %v4831_v8  ;;  %v5278_v8 = vld [vmem:[%s9166_s3 + $0x260] ss:$16 sps:$4 sm:$0xff]   ;;  %v9889_v60 = vld [vmem:[#allocation29_spill] sm:$0xff] }
 0xbdc   :  { %v8798_v23 = vpack.c.bf16 %v8794_v56, %v8794_v56 }
 0xbde   :  { %3445 = vmatmul.mubr.bf16.vlgmr.msra.gmra.mxu0 %v8798_v23  ;;  %3486 = vmatmul.mubr.bf16.vlgmr.msra.gmra.mxu1 %v8798_v23 }
 0xbdf   :  { %3499 = vmatpush1.bf16.msra.mxu0 %v5254_v0  ;;  %3540 = vmatpush1.bf16.msra.mxu1 %v8054_v1  ;;  %v5257_v1 = vld [vmem:[%s9166_s3 + $0x1a4] ss:$16 sps:$4 sm:$0xff]  }
 0xbe0   :  { %3500 = vmatprep.subr.bf16.mxu0 %v5255_v57  ;;  %3541 = vmatprep.subr.bf16.mxu1 %v8061_v52  ;;  %v5258_v52 = vld [vmem:[%s9166_s3 + $0x1a0] ss:$16 sps:$4 sm:$0xff]   ;;  %v5279_v0 = vld [vmem:[%s9166_s3 + $0x244] ss:$16 sps:$4 sm:$0xff]  }
 0xbe1   :  { %3530 = vmatprep.mubr.bf16.mxu0 %v9478_v48  ;;  %3571 = vmatprep.mubr.bf16.mxu1 %v9478_v48  ;;  %v9890_v57 = vld [vmem:[#allocation30_spill] sm:$0xff] }
 0xbe3   :  { %3501 = vmatpush1.bf16.msra.mxu0 %v5256_v29  ;;  %3542 = vmatpush1.bf16.msra.mxu1 %v8070_v36  ;;  %v5260_v36 = vld [vmem:[%s9166_s3 + $0x180] ss:$16 sps:$4 sm:$0xff]  }
 0xbe4   :  { %3502 = vmatprep.subr.bf16.mxu0 %v5257_v1  ;;  %3543 = vmatprep.subr.bf16.mxu1 %v8077_v24  ;;  %v5261_v24 = vld [vmem:[%s9166_s3 + $0x164] ss:$16 sps:$4 sm:$0xff]   ;;  %v5280_v29 = vld [vmem:[%s9166_s3 + $0x240] ss:$16 sps:$4 sm:$0xff]   ;;  %v9891_v1 = vld [vmem:[#allocation31_spill] sm:$0xff] }
 0xbe7   :  { %3503 = vmatpush1.bf16.msra.mxu0 %v5258_v52  ;;  %3544 = vmatpush1.bf16.msra.mxu1 %v8084_v47  ;;  %v5262_v47 = vld [vmem:[%s9166_s3 + $0x160] ss:$16 sps:$4 sm:$0xff]   ;;  %v5281_v52 = vld [vmem:[%s9166_s3 + $0x224] ss:$16 sps:$4 sm:$0xff]  }
 0xbe8   :  { %3504 = vmatprep.subr.bf16.mxu0 %v5259_v51  ;;  %3545 = vmatprep.subr.bf16.mxu1 %v8091_v50  ;;  %v5263_v50 = vld [vmem:[%s9166_s3 + $0x144] ss:$16 sps:$4 sm:$0xff]  }
 0xbe9   :  { %v9892_v51 = vld [vmem:[#allocation32_spill] sm:$0xff] }
 0xbeb   :  { %3505 = vmatpush1.bf16.msra.mxu0 %v5260_v36  ;;  %3546 = vmatpush1.bf16.msra.mxu1 %v8098_v22  ;;  %v5264_v22 = vld [vmem:[%s9166_s3 + $0x140] ss:$16 sps:$4 sm:$0xff]  }
 0xbec   :  { %3506 = vmatprep.subr.bf16.mxu0 %v5261_v24  ;;  %3547 = vmatprep.subr.bf16.mxu1 %v8105_v39  ;;  %v5265_v39 = vld [vmem:[%s9166_s3 + $0x124] ss:$16 sps:$4 sm:$0xff]   ;;  %v5282_v36 = vld [vmem:[%s9166_s3 + $0x220] ss:$16 sps:$4 sm:$0xff]   ;;  %v9893_v24 = vld [vmem:[#allocation33_spill] sm:$0xff] }
 0xbef   :  { %3507 = vmatpush1.bf16.msra.mxu0 %v5262_v47  ;;  %3548 = vmatpush1.bf16.msra.mxu1 %v8112_v41  ;;  %v5266_v41 = vld [vmem:[%s9166_s3 + $0x120] ss:$16 sps:$4 sm:$0xff]   ;;  %v5283_v47 = vld [vmem:[%s9166_s3 + $0x204] ss:$16 sps:$4 sm:$0xff]  }
 0xbf0   :  { %3508 = vmatprep.subr.bf16.mxu0 %v5263_v50  ;;  %3549 = vmatprep.subr.bf16.mxu1 %v8119_v35  ;;  %v4376_v35 = vld [vmem:[%s9167_s0 + $0x28] sm:$0xff]  ;;  %v9894_v50 = vld [vmem:[#allocation34_spill] sm:$0xff] }
 0xbf1   :  { %v3410_v28 = vpack.c.bf16 %v4376_v35, %v4376_v35  ;;  %v9897_v35 = vld [vmem:[#allocation38_spill] sm:$0xff] }
 0xbf3   :  { %3509 = vmatpush1.bf16.msra.mxu0 %v5264_v22  ;;  %3550 = vmatpush1.bf16.msra.mxu1 %v8126_v5  ;;  %v5267_v5 = vld [vmem:[%s9166_s3 + $0x104] ss:$16 sps:$4 sm:$0xff]   ;;  %v5284_v22 = vld [vmem:[%s9166_s3 + $0x200] ss:$16 sps:$4 sm:$0xff]  }
 0xbf4   :  { %3510 = vmatprep.subr.bf16.mxu0 %v5265_v39  ;;  %3551 = vmatprep.subr.bf16.mxu1 %v8133_v6  ;;  %v5268_v6 = vld [vmem:[%s9166_s3 + $0x100] ss:$16 sps:$4 sm:$0xff]   ;;  %v9895_v39 = vld [vmem:[#allocation35_spill] sm:$0xff] }
 0xbf7   :  { %3511 = vmatpush1.bf16.msra.mxu0 %v5266_v41  ;;  %3552 = vmatpush1.bf16.msra.mxu1 %v8140_v55  ;;  %v5269_v55 = vld [vmem:[%s9166_s3 + $0x2e4] ss:$16 sps:$4 sm:$0xff]   ;;  %v9896_v41 = vld [vmem:[#allocation37_spill] sm:$0xff] }
 0xbf8   :  { %3512 = vmatprep.subr.bf16.mxu0 %v5267_v5  ;;  %3553 = vmatprep.subr.bf16.mxu1 %v8150_v10  ;;  %v5270_v10 = vld [vmem:[%s9166_s3 + $0x2e0] ss:$16 sps:$4 sm:$0xff]   ;;  %v9898_v5 = vld [vmem:[#allocation39_spill] sm:$0xff] }
 0xbfb   :  { %3513 = vmatpush1.bf16.msra.mxu0 %v5268_v6  ;;  %3554 = vmatpush1.bf16.msra.mxu1 %v8157_v62  ;;  %v5271_v62 = vld [vmem:[%s9166_s3 + $0x2c4] ss:$16 sps:$4 sm:$0xff]  }
 0xbfc   :  { %3584 = vmatprep.subr.bf16.mxu0 %v5269_v55  ;;  %3625 = vmatprep.subr.bf16.mxu1 %v8164_v12  ;;  %v5272_v12 = vld [vmem:[%s9166_s3 + $0x2c0] ss:$16 sps:$4 sm:$0xff]   ;;  %v9901_v55 = vld [vmem:[#allocation43_spill] sm:$0xff] }
 0xbfd   :  { %v9900_v6 = vld [vmem:[#allocation42_spill] sm:$0xff] }
 0xbfe   :  { %3531 = vmatmul.mubr.bf16.vlgmr.msra.gmra.mxu0 %v3410_v28  ;;  %3572 = vmatmul.mubr.bf16.vlgmr.msra.gmra.mxu1 %v3410_v28  ;;  %v9899_v28 = vld [vmem:[#allocation40_spill] sm:$0xff] }
 0xbff   :  { %3585 = vmatpush1.bf16.msra.mxu0 %v5270_v10  ;;  %3626 = vmatpush1.bf16.msra.mxu1 %v8171_v7  ;;  %v5273_v7 = vld [vmem:[%s9166_s3 + $0x2a4] ss:$16 sps:$4 sm:$0xff]  }
 0xc00   :  { %3586 = vmatprep.subr.bf16.mxu0 %v5271_v62  ;;  %3627 = vmatprep.subr.bf16.mxu1 %v8178_v44  ;;  %v5274_v44 = vld [vmem:[%s9166_s3 + $0x2a0] ss:$16 sps:$4 sm:$0xff]   ;;  %v9903_v62 = vld [vmem:[#allocation45_spill] sm:$0xff] }
 0xc01   :  { %3616 = vmatprep.mubr.bf16.mxu0 %v9478_v48  ;;  %3657 = vmatprep.mubr.bf16.mxu1 %v9478_v48  ;;  %v9902_v10 = vld [vmem:[#allocation44_spill] sm:$0xff] }
 0xc03   :  { %3587 = vmatpush1.bf16.msra.mxu0 %v5272_v12  ;;  %3628 = vmatpush1.bf16.msra.mxu1 %v9883_v18  ;;  %v9904_v12 = vld [vmem:[#allocation36_spill] sm:$0xff]  ;;  %v9905_v18 = vld [vmem:[#allocation41_spill] sm:$0xff] }
 0xc04   :  { %3588 = vmatprep.subr.bf16.mxu0 %v5273_v7  ;;  %3629 = vmatprep.subr.bf16.mxu1 %v9884_v11  ;;  %v9907_v7 = vld [vmem:[#allocation47_spill] sm:$0xff]  ;;  %v9908_v11 = vld [vmem:[#allocation48_spill] sm:$0xff] }
 0xc07   :  { %3589 = vmatpush1.bf16.msra.mxu0 %v5274_v44  ;;  %3630 = vmatpush1.bf16.msra.mxu1 %v9885_v58  ;;  %v9909_v44 = vld [vmem:[#allocation49_spill] sm:$0xff]  ;;  %v9910_v58 = vld [vmem:[#allocation50_spill] sm:$0xff] }
 0xc08   :  { %3590 = vmatprep.subr.bf16.mxu0 %v5275_v33  ;;  %3631 = vmatprep.subr.bf16.mxu1 %v9886_v38  ;;  %v9911_v33 = vld [vmem:[#allocation51_spill] sm:$0xff]  ;;  %v9912_v38 = vld [vmem:[#allocation52_spill] sm:$0xff] }
 0xc0b   :  { %3591 = vmatpush1.bf16.msra.mxu0 %v5276_v30  ;;  %3632 = vmatpush1.bf16.msra.mxu1 %v9887_v26  ;;  %v9913_v30 = vld [vmem:[#allocation53_spill] sm:$0xff]  ;;  %v9914_v26 = vld [vmem:[#allocation54_spill] sm:$0xff] }
 0xc0c   :  { %3592 = vmatprep.subr.bf16.mxu0 %v5277_v63  ;;  %3633 = vmatprep.subr.bf16.mxu1 %v9888_v2  ;;  %v9915_v63 = vld [vmem:[#allocation55_spill] sm:$0xff]  ;;  %v9916_v2 = vld [vmem:[#allocation56_spill] sm:$0xff] }
 0xc0f   :  { %3593 = vmatpush1.bf16.msra.mxu0 %v5278_v8  ;;  %3634 = vmatpush1.bf16.msra.mxu1 %v9889_v60  ;;  %v9917_v8 = vld [vmem:[#allocation57_spill] sm:$0xff]  ;;  %v9918_v60 = vld [vmem:[#allocation58_spill] sm:$0xff] }
 0xc10   :  { %3594 = vmatprep.subr.bf16.mxu0 %v5279_v0  ;;  %3635 = vmatprep.subr.bf16.mxu1 %v9890_v57  ;;  %v9919_v0 = vld [vmem:[#allocation59_spill] sm:$0xff]  ;;  %v9920_v57 = vld [vmem:[#allocation60_spill] sm:$0xff] }
 0xc13   :  { %3595 = vmatpush1.bf16.msra.mxu0 %v5280_v29  ;;  %3636 = vmatpush1.bf16.msra.mxu1 %v9891_v1  ;;  %v9921_v29 = vld [vmem:[#allocation61_spill] sm:$0xff]  ;;  %v9922_v1 = vld [vmem:[#allocation62_spill] sm:$0xff] }
 0xc14   :  { %3596 = vmatprep.subr.bf16.mxu0 %v5281_v52  ;;  %3637 = vmatprep.subr.bf16.mxu1 %v9892_v51  ;;  %v9923_v52 = vld [vmem:[#allocation63_spill] sm:$0xff]  ;;  %v9924_v51 = vld [vmem:[#allocation64_spill] sm:$0xff] }
 0xc17   :  { %3597 = vmatpush1.bf16.msra.mxu0 %v5282_v36  ;;  %3638 = vmatpush1.bf16.msra.mxu1 %v9893_v24  ;;  %v9925_v36 = vld [vmem:[#allocation65_spill] sm:$0xff]  ;;  %v9926_v24 = vld [vmem:[#allocation66_spill] sm:$0xff] }
 0xc18   :  { %3598 = vmatprep.subr.bf16.mxu0 %v5283_v47  ;;  %3639 = vmatprep.subr.bf16.mxu1 %v9894_v50  ;;  %v9927_v47 = vld [vmem:[#allocation67_spill] sm:$0xff]  ;;  %v9928_v50 = vld [vmem:[#allocation68_spill] sm:$0xff] }
 0xc1b   :  { %3599 = vmatpush1.bf16.msra.mxu0 %v5284_v22  ;;  %3640 = vmatpush1.bf16.msra.mxu1 %v9895_v39  ;;  %v9929_v22 = vld [vmem:[#allocation69_spill] sm:$0xff] }
 0xc1c   :  { %3695 = vmatprep.subr.bf16.mxu0 %v9896_v41  ;;  %3736 = vmatprep.subr.bf16.mxu1 %v9897_v35 }
 0xc1e   :  { %3617 = vmatmul.mubr.bf16.vlgmr.msra.gmra.mxu0 %v8510_v32  ;;  %3658 = vmatmul.mubr.bf16.vlgmr.msra.gmra.mxu1 %v8510_v32  ;;  %v9906_v32 = vld [vmem:[#allocation46_spill] sm:$0xff] }
 0xc1f   :  { %3696 = vmatpush1.bf16.msra.mxu0 %v9898_v5  ;;  %3737 = vmatpush1.bf16.msra.mxu1 %v9899_v28 }
 0xc20   :  { %3697 = vmatprep.subr.bf16.mxu0 %v9900_v6  ;;  %3738 = vmatprep.subr.bf16.mxu1 %v9901_v55 }
 0xc21   :  { %3727 = vmatprep.mubr.bf16.mxu0 %v9478_v48  ;;  %3768 = vmatprep.mubr.bf16.mxu1 %v9478_v48 }
 0xc23   :  { %3698 = vmatpush1.bf16.msra.mxu0 %v9902_v10  ;;  %3739 = vmatpush1.bf16.msra.mxu1 %v9903_v62 }
 0xc24   :  { %3699 = vmatprep.subr.bf16.mxu0 %v9904_v12  ;;  %3740 = vmatprep.subr.bf16.mxu1 %v9905_v18 }
 0xc27   :  { %3700 = vmatpush1.bf16.msra.mxu0 %v9906_v32  ;;  %3741 = vmatpush1.bf16.msra.mxu1 %v9907_v7 }
 0xc28   :  { %3701 = vmatprep.subr.bf16.mxu0 %v9908_v11  ;;  %3742 = vmatprep.subr.bf16.mxu1 %v9909_v44 }
 0xc2b   :  { %3702 = vmatpush1.bf16.msra.mxu0 %v9910_v58  ;;  %3743 = vmatpush1.bf16.msra.mxu1 %v9911_v33  ;;  %v9930_v33 = vld [vmem:[#allocation70_spill] sm:$0xff] }
 0xc2c   :  { %3703 = vmatprep.subr.bf16.mxu0 %v9912_v38  ;;  %3744 = vmatprep.subr.bf16.mxu1 %v9913_v30 }
 0xc2f   :  { %3704 = vmatpush1.bf16.msra.mxu0 %v9914_v26  ;;  %3745 = vmatpush1.bf16.msra.mxu1 %v9915_v63 }
 0xc30   :  { %3705 = vmatprep.subr.bf16.mxu0 %v9916_v2  ;;  %3746 = vmatprep.subr.bf16.mxu1 %v9917_v8 }
 0xc33   :  { %3706 = vmatpush1.bf16.msra.mxu0 %v9918_v60  ;;  %3747 = vmatpush1.bf16.msra.mxu1 %v9919_v0 }
 0xc34   :  { %3707 = vmatprep.subr.bf16.mxu0 %v9920_v57  ;;  %3748 = vmatprep.subr.bf16.mxu1 %v9921_v29 }
 0xc37   :  { %3708 = vmatpush1.bf16.msra.mxu0 %v9922_v1  ;;  %3749 = vmatpush1.bf16.msra.mxu1 %v9923_v52 }
 0xc38   :  { %3709 = vmatprep.subr.bf16.mxu0 %v9924_v51  ;;  %3750 = vmatprep.subr.bf16.mxu1 %v9925_v36 }
 0xc3b   :  { %3710 = vmatpush1.bf16.msra.mxu0 %v9926_v24  ;;  %3751 = vmatpush1.bf16.msra.mxu1 %v9927_v47 }
 0xc3c   :  { %3781 = vmatprep.subr.bf16.mxu0 %v9928_v50  ;;  %3822 = vmatprep.subr.bf16.mxu1 %v9929_v22 }
 0xc9e   :  { %v3446_v39 = vpop.f32.mrf.mxu0  ;;  %v3487_v41 = vpop.f32.mrf.mxu1 }
 0xc9f   :  { %v3494_v38 = vadd.f32 %v9930_v33, %v3446_v39  ;;  %v3496_v39 = vadd.f32 %v8503_v53, %v3487_v41 }
 0xca0   :  { %v3448_v35 = vpop.f32.mrf.mxu0  ;;  %v3489_v5 = vpop.f32.mrf.mxu1 }
 0xca1   :  { %v3495_v30 = vadd.f32 %v8491_v4, %v3448_v35  ;;  %v3497_v50 = vadd.f32 %v8497_v20, %v3489_v5 }
 0xca2   :  { %v3450_v28 = vpop.f32.mrf.mxu0  ;;  %v3491_v6 = vpop.f32.mrf.mxu1 }
 0xca4   :  { %v3451_v55 = vpop.f32.mrf.mxu0  ;;  %v3492_v10 = vpop.f32.mrf.mxu1 }
 0xcbe   :  { %v3532_v62 = vpop.f32.mrf.mxu0  ;;  %v3573_v12 = vpop.f32.mrf.mxu1 }
 0xcbf   :  { %v3580_v26 = vadd.f32 %v3532_v62, %v3494_v38  ;;  %v3582_v35 = vadd.f32 %v3573_v12, %v3496_v39 }
 0xcc0   :  { %v3534_v18 = vpop.f32.mrf.mxu0  ;;  %v3575_v32 = vpop.f32.mrf.mxu1 }
 0xcc1   :  { %v3581_v8 = vadd.f32 %v3534_v18, %v3495_v30  ;;  %v3583_v22 = vadd.f32 %v3575_v32, %v3497_v50  ;;  %v4656_v30 = vld [vmem:[%s9171_s5 + $0x50] ss:$8 sps:$4 sm:$0xff]  }
 0xcc2   :  { %v3536_v7 = vpop.f32.mrf.mxu0  ;;  %v3577_v11 = vpop.f32.mrf.mxu1 }
 0xcc4   :  { %v3537_v44 = vpop.f32.mrf.mxu0  ;;  %v3578_v58 = vpop.f32.mrf.mxu1 }
 0xcde   :  { %v3618_v63 = vpop.f32.mrf.mxu0  ;;  %v3659_v2 = vpop.f32.mrf.mxu1 }
 0xcdf   :  { %v3666_v60 = vadd.f32 %v3618_v63, %v3580_v26  ;;  %v3668_v55 = vadd.f32 %v3659_v2, %v3582_v35  ;;  %v4659_v26 = vld [vmem:[%s9171_s5 + $0x40] ss:$8 sps:$4 sm:$0xff]   ;;  %v4664_v63 = vld [vmem:[%s9171_s5 + $0x34] ss:$8 sps:$4 sm:$0xff]   ;;  %v4662_v2 = vld [vmem:[%s9171_s5 + $0x30] ss:$8 sps:$4 sm:$0xff]  }
 0xce0   :  { %v3620_v0 = vpop.f32.mrf.mxu0  ;;  %v3661_v57 = vpop.f32.mrf.mxu1 }
 0xce1   :  { %v4377_v29 = vmul.f32 -1.442695, %v3666_v60  ;;  %v3667_v1 = vadd.f32 %v3620_v0, %v3581_v8  ;;  %v3669_v4 = vadd.f32 %v3661_v57, %v3583_v22  ;;  %v4667_v8 = vld [vmem:[%s9171_s5 + $0x24] ss:$8 sps:$4 sm:$0xff]   ;;  %v4665_v60 = vld [vmem:[%s9171_s5 + $0x20] ss:$8 sps:$4 sm:$0xff]  }
 0xce2   :  { %v3622_v52 = vpop.f32.mrf.mxu0  ;;  %v3663_v51 = vpop.f32.mrf.mxu1  ;;  %v4670_v0 = vld [vmem:[%s9171_s5 + $0x14] ss:$8 sps:$4 sm:$0xff]   ;;  %v4668_v57 = vld [vmem:[%s9171_s5 + $0x10] ss:$8 sps:$4 sm:$0xff]  }
 0xce3   :  { %4834 = vpow2.f32 %v4377_v29  ;;  %v4378_v36 = vmul.f32 -1.442695, %v3667_v1  ;;  %v4379_v28 = vmul.f32 -1.442695, %v3669_v4  ;;  %v4673_v29 = vld [vmem:[%s9171_s5 + $0x4] ss:$8 sps:$4 sm:$0xff]  }
 0xce4   :  { %v3623_v24 = vpop.f32.mrf.mxu0  ;;  %v3664_v47 = vpop.f32.mrf.mxu1  ;;  %v4671_v1 = vld [vmem:[%s9171_s5] ss:$8 sps:$4 sm:$0xff]   ;;  %v9945_v51 = vld [vmem:[#allocation9_spill] sm:$0xff] }
 0xce5   :  { %4836 = vpow2.f32 %v4378_v36  ;;  %v9944_v52 = vld [vmem:[#allocation78_spill] sm:$0xff]  ;;  %v9946_v24 = vld [vmem:[#allocation88_spill] sm:$0xff] }
 0xce6   :  { %4838 = vpow2.f32 %v4379_v28  ;;  %v3891_v36 = vpack.c.bf16 %v9945_v51, %v9944_v52  ;;  %v9947_v47 = vld [vmem:[#allocation22_spill] sm:$0xff] }
 0xce7   :  { %v3892_v50 = vpack.c.bf16 %v9947_v47, %v9946_v24 }
 0xcf0   :  { %v4835_v6 = vpop.eup %4834 }
 0xcf1   :  { %v3673_v10 = vadd.f32 1.0, %v4835_v6 }
 0xcf2   :  { %v4837_v62 = vpop.eup %4836 }
 0xcf3   :  { %4840 = vrcp.f32 %v3673_v10  ;;  %v3679_v18 = vadd.f32 1.0, %v4837_v62  ;;  %v4839_v7 = vpop.eup %4838 }
 0xcf4   :  { %4842 = vtanh.f32 %v3668_v55  ;;  %v3686_v20 = vadd.f32 1.0, %v4839_v7 }
 0xcf5   :  { %4844 = vrcp.f32 %v3679_v18 }
 0xcf6   :  { %4846 = vrcp.f32 %v3686_v20 }
 0xd00   :  { %v4841_v11 = vpop.eup %4840 }
 0xd01   :  { %v4843_v44 = vpop.eup %4842 }
 0xd02   :  { %v4845_v58 = vpop.eup %4844  ;;  %v3690_v5 = vmul.f32 %v4843_v44, %v4841_v11 }
 0xd03   :  { %v3689_v32 = vmul.f32 %v4845_v58, %v8507_v49  ;;  %v4847_v41 = vpop.eup %4846  ;;  %v9931_v49 = vld [vmem:[#allocation71_spill] sm:$0xff] }
 0xd05   :  { %v3691_v53 = vadd.f32 %v3690_v5, %v3689_v32 }
 0xd07   :  { %4848 = vtanh.f32 %v3691_v53 }
 0xd14   :  { %v4849_v12 = vpop.eup %4848 }
 0xd15   :  { %v3693_v33 = vmul.f32 %v4849_v12, %v4847_v41 }
 0xd17   :  { %v3694_v38 = vpack.c.bf16 %v3693_v33, %v3693_v33 }
 0xd19   :  { %3728 = vmatmul.mubr.bf16.vlgmr.msra.gmra.mxu0 %v3694_v38  ;;  %3769 = vmatmul.mubr.bf16.vlgmr.msra.gmra.mxu1 %v3694_v38 }
 0xd1a   :  { %3782 = vmatpush1.bf16.msra.mxu0 %v8517_v54  ;;  %3823 = vmatpush1.bf16.msra.mxu1 %v8523_v46  ;;  %v9932_v54 = vld [vmem:[#allocation72_spill] sm:$0xff]  ;;  %v9933_v46 = vld [vmem:[#allocation73_spill] sm:$0xff] }
 0xd1b   :  { %3783 = vmatprep.subr.bf16.mxu0 %v8529_v3  ;;  %3824 = vmatprep.subr.bf16.mxu1 %v8535_v42  ;;  %v9934_v3 = vld [vmem:[#allocation74_spill] sm:$0xff]  ;;  %v9935_v42 = vld [vmem:[#allocation75_spill] sm:$0xff] }
 0xd1c   :  { %3813 = vmatprep.mubr.bf16.mxu0 %v9478_v48  ;;  %3854 = vmatprep.mubr.bf16.mxu1 %v9478_v48 }
 0xd1e   :  { %3784 = vmatpush1.bf16.msra.mxu0 %v8543_v40  ;;  %3825 = vmatpush1.bf16.msra.mxu1 %v8549_v15  ;;  %v9936_v40 = vld [vmem:[#allocation76_spill] sm:$0xff]  ;;  %v9937_v15 = vld [vmem:[#allocation77_spill] sm:$0xff] }
 0xd1f   :  { %3785 = vmatprep.subr.bf16.mxu0 %v8555_v21  ;;  %3826 = vmatprep.subr.bf16.mxu1 %v8561_v45  ;;  %v9938_v21 = vld [vmem:[#allocation79_spill] sm:$0xff]  ;;  %v9939_v45 = vld [vmem:[#allocation80_spill] sm:$0xff] }
 0xd22   :  { %3786 = vmatpush1.bf16.msra.mxu0 %v8567_v14  ;;  %3827 = vmatpush1.bf16.msra.mxu1 %v8573_v31  ;;  %v9940_v14 = vld [vmem:[#allocation81_spill] sm:$0xff]  ;;  %v9941_v31 = vld [vmem:[#allocation82_spill] sm:$0xff] }
 0xd23   :  { %3787 = vmatprep.subr.bf16.mxu0 %v8579_v9  ;;  %3828 = vmatprep.subr.bf16.mxu1 %v8585_v16  ;;  %v4652_v9 = vld [vmem:[%s9171_s5 + $0x74] ss:$8 sps:$4 sm:$0xff]   ;;  %v9942_v16 = vld [vmem:[#allocation83_spill] sm:$0xff] }
 0xd26   :  { %3788 = vmatpush1.bf16.msra.mxu0 %v8591_v34  ;;  %3829 = vmatpush1.bf16.msra.mxu1 %v8597_v27  ;;  %v9943_v34 = vld [vmem:[#allocation84_spill] sm:$0xff] }
 0xd27   :  { %3789 = vmatprep.subr.bf16.mxu0 %v8603_v19  ;;  %3830 = vmatprep.subr.bf16.mxu1 %v8609_v59  ;;  %v4650_v27 = vld [vmem:[%s9171_s5 + $0x70] ss:$8 sps:$4 sm:$0xff]   ;;  %v4655_v19 = vld [vmem:[%s9171_s5 + $0x64] ss:$8 sps:$4 sm:$0xff]   ;;  %v4653_v59 = vld [vmem:[%s9171_s5 + $0x60] ss:$8 sps:$4 sm:$0xff]  }
 0xd2a   :  { %3790 = vmatpush1.bf16.msra.mxu0 %v9931_v49  ;;  %3831 = vmatpush1.bf16.msra.mxu1 %v9932_v54 }
 0xd2b   :  { %3791 = vmatprep.subr.bf16.mxu0 %v9933_v46  ;;  %3832 = vmatprep.subr.bf16.mxu1 %v9934_v3 }
 0xd2e   :  { %3792 = vmatpush1.bf16.msra.mxu0 %v9935_v42  ;;  %3833 = vmatpush1.bf16.msra.mxu1 %v9936_v40  ;;  %v3912_v42 = vlaneseq }
 0xd2f   :  { %3793 = vmatprep.subr.bf16.mxu0 %v9937_v15  ;;  %3834 = vmatprep.subr.bf16.mxu1 %v9938_v21 }
 0xd30   :  { %v3913_v21 = vshrl.u32 %v3912_v42, 7 }
 0xd32   :  { %3794 = vmatpush1.bf16.msra.mxu0 %v9939_v45  ;;  %3835 = vmatpush1.bf16.msra.mxu1 %v9940_v14  ;;  %v3914_v45 = vsub.s32 0, %v3913_v21  ;;  %v3918_v14 = vsub.s32 1, %v3913_v21 }
 0xd33   :  { %3795 = vmatprep.subr.bf16.mxu0 %v9941_v31  ;;  %3836 = vmatprep.subr.bf16.mxu1 %v8681_v37  ;;  %v4658_v37 = vld [vmem:[%s9171_s5 + $0x54] ss:$8 sps:$4 sm:$0xff]  }
 0xd36   :  { %3796 = vmatpush1.bf16.msra.mxu0 %v9942_v16  ;;  %3837 = vmatpush1.bf16.msra.mxu1 %v9943_v34 }
 0xd37   :  { %4002 = vmatprep.subr.bf16.mxu0 %v4652_v9 }
 0xd39   :  { %3814 = vmatmul.mubr.bf16.vlgmr.msra.gmra.mxu0 %v8798_v23  ;;  %3855 = vmatmul.mubr.bf16.vlgmr.msra.gmra.mxu1 %v8798_v23  ;;  %v4661_v23 = vld [vmem:[%s9171_s5 + $0x44] ss:$8 sps:$4 sm:$0xff]  }
 0xd3a   :  { %4003 = vmatpush1.bf16.msra.mxu0 %v4650_v27  ;;  %4034 = vmatprep.mubr.bf16.mxu0 %v9478_v48 }
 0xd3b   :  { %4004 = vmatprep.subr.bf16.mxu0 %v4655_v19 }
 0xd3e   :  { %4005 = vmatpush1.bf16.msra.mxu0 %v4653_v59 }
 0xd3f   :  { %4006 = vmatprep.subr.bf16.mxu0 %v4658_v37 }
 0xd42   :  { %4007 = vmatpush1.bf16.msra.mxu0 %v4656_v30 }
 0xd43   :  { %4008 = vmatprep.subr.bf16.mxu0 %v4661_v23 }
 0xd46   :  { %4009 = vmatpush1.bf16.msra.mxu0 %v4659_v26 }
 0xd47   :  { %4010 = vmatprep.subr.bf16.mxu0 %v4664_v63 }
 0xd4a   :  { %4011 = vmatpush1.bf16.msra.mxu0 %v4662_v2 }
 0xd4b   :  { %4012 = vmatprep.subr.bf16.mxu0 %v4667_v8 }
 0xd4e   :  { %4013 = vmatpush1.bf16.msra.mxu0 %v4665_v60 }
 0xd4f   :  { %4014 = vmatprep.subr.bf16.mxu0 %v4670_v0 }
 0xd52   :  { %4015 = vmatpush1.bf16.msra.mxu0 %v4668_v57 }
 0xd53   :  { %4016 = vmatprep.subr.bf16.mxu0 %v4673_v29 }
 0xd56   :  { %4017 = vmatpush1.bf16.msra.mxu0 %v4671_v1 }
 0xd59   :  { %4035 = vmatmul.mubr.bf16.vlgmr.msra.gmra.mxu0 %v3891_v36 }
 0xd5a   :  { %4044 = vmatprep.mubr.bf16.mxu0 %v9478_v48 }
 0xd61   :  { %4045 = vmatmul.mubr.bf16.gmra.mxu0 %v3892_v50 }
 0xd62   :  { %4054 = vmatprep.mubr.bf16.mxu0 %v9478_v48 }
 0xdd9   :  { %v3729_v22 = vpop.f32.mrf.mxu0  ;;  %v3770_v4 = vpop.f32.mrf.mxu1 }
 0xdda   :  { %v3777_v62 = vadd.f32 %v8769_v25, %v3729_v22  ;;  %v3779_v25 = vadd.f32 %v8787_v13, %v3770_v4 }
 0xddb   :  { %v3731_v39 = vpop.f32.mrf.mxu0  ;;  %v3772_v35 = vpop.f32.mrf.mxu1 }
 0xddc   :  { %v3778_v11 = vadd.f32 %v8775_v17, %v3731_v39  ;;  %v3780_v38 = vadd.f32 %v8781_v61, %v3772_v35  ;;  %v3910_v61 = vld [vmem:[%s9172_s6] sm:$0x3] }
 0xddd   :  { %v3733_v28 = vpop.f32.mrf.mxu0  ;;  %v3774_v6 = vpop.f32.mrf.mxu1  ;;  %v9072_v31 = vrot.slane %v3910_v61, %v3914_v45  ;;  %v9074_v13 = vrot.slane %v3910_v61, %v3918_v14 }
 0xddf   :  { %v3734_v55 = vpop.f32.mrf.mxu0  ;;  %v3775_v10 = vpop.f32.mrf.mxu1 }
 0xdf9   :  { %v3815_v18 = vpop.f32.mrf.mxu0  ;;  %v3856_v7 = vpop.f32.mrf.mxu1 }
 0xdfa   :  { %v3863_v44 = vadd.f32 %v3815_v18, %v3777_v62  ;;  %v3865_v17 = vadd.f32 %v3856_v7, %v3779_v25 }
 0xdfb   :  { %v3817_v58 = vpop.f32.mrf.mxu0  ;;  %v3858_v20 = vpop.f32.mrf.mxu1 }
 0xdfc   :  { %v4380_v5 = vmul.f32 -1.442695, %v3863_v44  ;;  %v3864_v32 = vadd.f32 %v3817_v58, %v3778_v11  ;;  %v3866_v49 = vadd.f32 %v3858_v20, %v3780_v38 }
 0xdfd   :  { %v3819_v48 = vpop.f32.mrf.mxu0  ;;  %v3860_v53 = vpop.f32.mrf.mxu1 }
 0xdfe   :  { %4850 = vpow2.f32 %v4380_v5  ;;  %v4381_v41 = vmul.f32 -1.442695, %v3864_v32  ;;  %v4382_v54 = vmul.f32 -1.442695, %v3866_v49 }
 0xdff   :  { %v3820_v12 = vpop.f32.mrf.mxu0  ;;  %v3861_v33 = vpop.f32.mrf.mxu1 }
 0xe00   :  { %4852 = vpow2.f32 %v4381_v41 }
 0xe01   :  { %4854 = vpow2.f32 %v4382_v54 }
 0xe0b   :  { %v4851_v46 = vpop.eup %4850 }
 0xe0c   :  { %v3870_v3 = vadd.f32 1.0, %v4851_v46 }
 0xe0d   :  { %v4853_v40 = vpop.eup %4852 }
 0xe0e   :  { %4856 = vrcp.f32 %v3870_v3  ;;  %v3876_v15 = vadd.f32 1.0, %v4853_v40  ;;  %v4855_v16 = vpop.eup %4854 }
 0xe0f   :  { %4858 = vtanh.f32 %v3865_v17  ;;  %v3883_v23 = vadd.f32 1.0, %v4855_v16 }
 0xe10   :  { %4860 = vrcp.f32 %v3876_v15 }
 0xe11   :  { %4862 = vrcp.f32 %v3883_v23 }
 0xe19   :  { %v4036_v9 = vpop.f32.mrf.mxu0 }
 0xe1a   :  { %v4037_v59 = vadd.f32 %v4036_v9, %v9072_v31 }
 0xe1b   :  { %v4857_v34 = vpop.eup %4856  ;;  %v4038_v27 = vpop.f32.mrf.mxu0 }
 0xe1c   :  { %v4859_v19 = vpop.eup %4858  ;;  %v4039_v37 = vadd.f32 %v4038_v27, %v9074_v13 }
 0xe1d   :  { %v4861_v30 = vpop.eup %4860  ;;  %v4040_v26 = vpop.f32.mrf.mxu0  ;;  %v3887_v63 = vmul.f32 %v4859_v19, %v4857_v34 }
 0xe1e   :  { %v3886_v2 = vmul.f32 %v4861_v30, %v8791_v43  ;;  %v4065_v8 = vmax.f32 %v4037_v59, %v4039_v37  ;;  %v4041_v57 = vadd.f32 %v4040_v26, %v9072_v31  ;;  %v4863_v35 = vpop.eup %4862 }
 0xe1f   :  { %v4042_v60 = vpop.f32.mrf.mxu0 }
 0xe20   :  { %v3888_v0 = vadd.f32 %v3887_v63, %v3886_v2  ;;  %v4043_v29 = vadd.f32 %v4042_v60, %v9074_v13  ;;  %4066 = vmax.xlane.f32.xlu0 %v4065_v8 }
 0xe21   :  { %v4046_v1 = vpop.f32.mrf.mxu0 }
 0xe22   :  { %4864 = vtanh.f32 %v3888_v0  ;;  %v4068_v52 = vmax.f32 %v4041_v57, %v4043_v29  ;;  %v4047_v36 = vadd.f32 %v4046_v1, %v9072_v31 }
 0xe23   :  { %v4048_v51 = vpop.f32.mrf.mxu0 }
 0xe24   :  { %v4049_v24 = vadd.f32 %v4048_v51, %v9074_v13  ;;  %4069 = vmax.xlane.f32.xlu0 %v4068_v52 }
 0xe25   :  { %v4050_v47 = vpop.f32.mrf.mxu0 }
 0xe26   :  { %v4071_v43 = vmax.f32 %v4047_v36, %v4049_v24  ;;  %v4051_v22 = vadd.f32 %v4050_v47, %v9072_v31 }
 0xe27   :  { %v4052_v50 = vpop.f32.mrf.mxu0 }
 0xe28   :  { %v4053_v4 = vadd.f32 %v4052_v50, %v9074_v13  ;;  %4072 = vmax.xlane.f32.xlu1 %v4071_v43 }
 0xe2a   :  { %v4074_v39 = vmax.f32 %v4051_v22, %v4053_v4 }
 0xe2c   :  { %4075 = vmax.xlane.f32.xlu1 %v4074_v39 }
 0xe2f   :  { %v4865_v28 = vpop.eup %4864 }
 0xe30   :  { %v3890_v6 = vmul.f32 %v4865_v28, %v4863_v35 }
 0xe32   :  { %v3893_v55 = vpack.c.bf16 %v3890_v6, %v8794_v56 }
 0xe34   :  { %4055 = vmatmul.mubr.bf16.gmra.mxu0 %v3893_v55 }
 0xea9   :  { %v4067_v10 = vpop.xlane.xlu0 %4066 }
 0xeaa   :  { %v9086_v7 = vsub.f32 %v4037_v59, %v4067_v10  ;;  %v9088_v11 = vsub.f32 %v4039_v37, %v4067_v10 }
 0xeac   :  { %v4095_v20 = vmul.f32 1.442695, %v9086_v7  ;;  %v4097_v32 = vmul.f32 1.442695, %v9088_v11 }
 0xead   :  { %v4070_v62 = vpop.xlane.xlu0 %4069 }
 0xeae   :  { %v9090_v44 = vsub.f32 %v4041_v57, %v4070_v62  ;;  %v9092_v58 = vsub.f32 %v4043_v29, %v4070_v62  ;;  %4866 = vpow2.f32 %v4095_v20 }
 0xeaf   :  { %4868 = vpow2.f32 %v4097_v32 }
 0xeb0   :  { %v4099_v53 = vmul.f32 1.442695, %v9090_v44  ;;  %v4101_v41 = vmul.f32 1.442695, %v9092_v58 }
 0xeb1   :  { %v4073_v18 = vpop.xlane.xlu1 %4072 }
 0xeb2   :  { %v9095_v5 = vsub.f32 %v4047_v36, %v4073_v18  ;;  %v9098_v48 = vsub.f32 %v4049_v24, %v4073_v18  ;;  %4870 = vpow2.f32 %v4099_v53 }
 0xeb3   :  { %4872 = vpow2.f32 %v4101_v41 }
 0xeb4   :  { %v4103_v12 = vmul.f32 1.442695, %v9095_v5  ;;  %v4105_v38 = vmul.f32 1.442695, %v9098_v48 }
 0xeb5   :  { %v4076_v56 = vpop.xlane.xlu1 %4075 }
 0xeb6   :  { %v9103_v33 = vsub.f32 %v4051_v22, %v4076_v56  ;;  %v9106_v49 = vsub.f32 %v4053_v4, %v4076_v56  ;;  %4874 = vpow2.f32 %v4103_v12 }
 0xeb7   :  { %4876 = vpow2.f32 %v4105_v38 }
 0xeb8   :  { %v4107_v25 = vmul.f32 1.442695, %v9103_v33  ;;  %v4109_v54 = vmul.f32 1.442695, %v9106_v49 }
 0xeba   :  { %4878 = vpow2.f32 %v4107_v25 }
 0xebb   :  { %4880 = vpow2.f32 %v4109_v54  ;;  %v4867_v15 = vpop.eup %4866 }
 0xebc   :  { %v4869_v45 = vpop.eup %4868 }
 0xebd   :  { %v4119_v59 = vadd.f32 %v4869_v45, %v4867_v15 }
 0xebf   :  { %v4871_v61 = vpop.eup %4870 }
 0xec0   :  { %v4873_v34 = vpop.eup %4872 }
 0xec1   :  { %v4122_v26 = vadd.f32 %v4873_v34, %v4871_v61 }
 0xec3   :  { %v4875_v27 = vpop.eup %4874 }
 0xec4   :  { %v4877_v37 = vpop.eup %4876 }
 0xec5   :  { %v4125_v23 = vadd.f32 %v4877_v37, %v4875_v27 }
 0xec7   :  { %v4879_v30 = vpop.eup %4878 }
 0xec8   :  { %v4881_v63 = vpop.eup %4880 }
 0xec9   :  { %v4128_v2 = vadd.f32 %v4881_v63, %v4879_v30 }
 0xef4   :  { %v4056_v46 = vpop.f32.mrf.mxu0 }
 0xef5   :  { %v4057_v3 = vadd.f32 %v4056_v46, %v9072_v31 }
 0xef6   :  { %v4058_v17 = vpop.f32.mrf.mxu0 }
 0xef7   :  { %v4059_v42 = vadd.f32 %v4058_v17, %v9074_v13 }
 0xef8   :  { %v4060_v40 = vpop.f32.mrf.mxu0 }
 0xef9   :  { %v4077_v21 = vmax.f32 %v4057_v3, %v4059_v42  ;;  %v4061_v9 = vadd.f32 %v4060_v40, %v9072_v31 }
 0xefa   :  { %v4062_v14 = vpop.f32.mrf.mxu0 }
 0xefb   :  { %v4063_v16 = vadd.f32 %v4062_v14, %v9074_v13  ;;  %4078 = vmax.xlane.f32.xlu0 %v4077_v21 }
 0xefd   :  { %v4080_v19 = vmax.f32 %v4061_v9, %v4063_v16 }
 0xeff   :  { %4081 = vmax.xlane.f32.xlu1 %v4080_v19  ;;  %4120 = vadd.xlane.f32.xlu0 %v4119_v59 }
 0xf03   :  { %4126 = vadd.xlane.f32.xlu0 %v4125_v23  ;;  %4123 = vadd.xlane.f32.xlu1 %v4122_v26 }
 0xf07   :  { %4129 = vadd.xlane.f32.xlu1 %v4128_v2 }
 0xf84   :  { %v4079_v8 = vpop.xlane.xlu0 %4078 }
 0xf85   :  { %v9114_v31 = vsub.f32 %v4057_v3, %v4079_v8  ;;  %v9116_v13 = vsub.f32 %v4059_v42, %v4079_v8 }
 0xf87   :  { %v4111_v60 = vmul.f32 1.442695, %v9114_v31  ;;  %v4113_v0 = vmul.f32 1.442695, %v9116_v13 }
 0xf88   :  { %v4082_v57 = vpop.xlane.xlu1 %4081  ;;  %v4121_v29 = vpop.xlane.xlu0 %4120 }
 0xf89   :  { %4882 = vpow2.f32 %v4111_v60  ;;  %v4093_v1 = vsub.f32 %v4061_v9, %v4082_v57  ;;  %v4094_v52 = vsub.f32 %v4063_v16, %v4082_v57 }
 0xf8a   :  { %4884 = vpow2.f32 %v4113_v0 }
 0xf8b   :  { %v4115_v51 = vmul.f32 1.442695, %v4093_v1  ;;  %v4117_v36 = vmul.f32 1.442695, %v4094_v52  ;;  %4886 = vlog2.f32 %v4121_v29 }
 0xf8c   :  { %v4124_v24 = vpop.xlane.xlu1 %4123  ;;  %v4127_v47 = vpop.xlane.xlu0 %4126 }
 0xf8d   :  { %4888 = vpow2.f32 %v4115_v51 }
 0xf8e   :  { %4890 = vpow2.f32 %v4117_v36 }
 0xf8f   :  { %4892 = vlog2.f32 %v4124_v24 }
 0xf90   :  { %4894 = vlog2.f32 %v4127_v47  ;;  %v4130_v43 = vpop.xlane.xlu1 %4129 }
 0xf91   :  { %4896 = vlog2.f32 %v4130_v43 }
 0xf96   :  { %v4883_v50 = vpop.eup %4882 }
 0xf97   :  { %v4885_v22 = vpop.eup %4884 }
 0xf98   :  { %v4887_v4 = vpop.eup %4886  ;;  %v4131_v39 = vadd.f32 %v4885_v22, %v4883_v50 }
 0xf99   :  { %v4138_v35 = vmul.f32 0.6931472, %v4887_v4 }
 0xf9a   :  { %v4889_v28 = vpop.eup %4888  ;;  %4132 = vadd.xlane.f32.xlu0 %v4131_v39 }
 0xf9b   :  { %v4891_v6 = vpop.eup %4890  ;;  %v4149_v55 = vsub.f32 %v9086_v7, %v4138_v35  ;;  %v4150_v10 = vsub.f32 %v9088_v11, %v4138_v35 }
 0xf9c   :  { %v4893_v62 = vpop.eup %4892  ;;  %v4134_v18 = vadd.f32 %v4891_v6, %v4889_v28 }
 0xf9d   :  { %v4895_v20 = vpop.eup %4894  ;;  %4161 = vst [vmem:[%s9173_s7] sm:$0xff] %v4149_v55  ;;  %4162 = vst [vmem:[%s9173_s7 + $0x8] sm:$0xff] %v4150_v10  ;;  %v4140_v32 = vmul.f32 0.6931472, %v4893_v62 }
 0xf9e   :  { %v4897_v56 = vpop.eup %4896  ;;  %v4142_v53 = vmul.f32 0.6931472, %v4895_v20  ;;  %4135 = vadd.xlane.f32.xlu1 %v4134_v18 }
 0xf9f   :  { %v4151_v41 = vsub.f32 %v9090_v44, %v4140_v32  ;;  %v4152_v7 = vsub.f32 %v9092_v58, %v4140_v32  ;;  %v4144_v11 = vmul.f32 0.6931472, %v4897_v56 }
 0xfa0   :  { %v4153_v12 = vsub.f32 %v9095_v5, %v4142_v53  ;;  %v4154_v38 = vsub.f32 %v9098_v48, %v4142_v53 }
 0xfa1   :  { %4399 = vst [vmem:[%s9173_s7 + $0x10] sm:$0xff] %v4151_v41  ;;  %4400 = vst [vmem:[%s9173_s7 + $0x18] sm:$0xff] %v4152_v7  ;;  %v4155_v25 = vsub.f32 %v9103_v33, %v4144_v11  ;;  %v4156_v54 = vsub.f32 %v9106_v49, %v4144_v11 }
 0xfa2   :  { %4401 = vst [vmem:[%s9173_s7 + $0x20] sm:$0xff] %v4153_v12  ;;  %4402 = vst [vmem:[%s9173_s7 + $0x28] sm:$0xff] %v4154_v38 }
 0xfa3   :  { %4403 = vst [vmem:[%s9173_s7 + $0x30] sm:$0xff] %v4155_v25  ;;  %4404 = vst [vmem:[%s9173_s7 + $0x38] sm:$0xff] %v4156_v54 }
0x1023   :  { %v4133_v44 = vpop.xlane.xlu0 %4132 }
0x1024   :  { %4898 = vlog2.f32 %v4133_v44 }
0x1027   :  { %v4136_v58 = vpop.xlane.xlu1 %4135 }
0x1028   :  { %4900 = vlog2.f32 %v4136_v58 }
0x1031   :  { %v4899_v5 = vpop.eup %4898 }
0x1032   :  { %v4146_v48 = vmul.f32 0.6931472, %v4899_v5 }
0x1034   :  { %v4157_v33 = vsub.f32 %v9114_v31, %v4146_v48  ;;  %v4158_v49 = vsub.f32 %v9116_v13, %v4146_v48 }
0x1035   :  { %v4901_v46 = vpop.eup %4900 }
0x1036   :  { %4405 = vst [vmem:[%s9173_s7 + $0x40] sm:$0xff] %v4157_v33  ;;  %4406 = vst [vmem:[%s9173_s7 + $0x48] sm:$0xff] %v4158_v49  ;;  %v4148_v17 = vmul.f32 0.6931472, %v4901_v46 }
0x1038   :  { %v4159_v3 = vsub.f32 %v4093_v1, %v4148_v17  ;;  %v4160_v42 = vsub.f32 %v4094_v52, %v4148_v17 }
0x103a   :  { %4407 = vst [vmem:[%s9173_s7 + $0x50] sm:$0xff] %v4159_v3  ;;  %4408 = vst [vmem:[%s9173_s7 + $0x58] sm:$0xff] %v4160_v42 }

</bundles_post_ra>
